<compile_context>
chip_gen: v7x
topology: tpu7x:2x2x1
jax: 0.10.0
libtpu: 0.0.40
codegen_flags: <defaults>
</compile_context>

<pallas_src>
import math
import jax
import jax.numpy as jnp
from jax.experimental import pallas as pl
from jax.experimental.pallas import tpu as pltpu


FEA_DIM = 256  # feature_num_x2 in the torch module


# ---------------------------------------------------------------------------
# Kernel
# ---------------------------------------------------------------------------
def _memae_kernel(shrink_thres, fused):
    lambd = float(shrink_thres)

    def attention(x, we, be, wmt):
        # encoder: Linear(input_dim, 256) + ReLU  (f32 accumulation on the MXU)
        f = jnp.dot(x, we, preferred_element_type=jnp.float32)
        f = jnp.maximum(f + be, 0.0)

        # attention logits: f @ W_mem.T via the pre-transposed weight
        a = jnp.dot(f.astype(x.dtype), wmt, preferred_element_type=jnp.float32)

        # softmax over mem_dim (exact reciprocal only on the (tile_n, 1) denom)
        a = a - jnp.max(a, axis=1, keepdims=True)
        e = jnp.exp(a)
        a = e * pl.reciprocal(jnp.sum(e, axis=1, keepdims=True), approx=False)

        if lambd > 0.0:
            # hard_shrink_relu == where(a > lambd, a, 0) up to the eps=1e-12
            # guard (O(1e-9) deviation) -- avoids a (tile_n, mem_dim) divide.
            a = jnp.where(a > lambd, a, 0.0)
            # F.normalize(p=1, dim=1); a >= 0 so |a| == a
            norm = jnp.maximum(jnp.sum(a, axis=1, keepdims=True), 1e-12)
            a = a * pl.reciprocal(norm, approx=False)
        return a

    if fused:
        def kernel(x_ref, we_ref, be_ref, wmt_ref, wmd_ref, bd_ref,
                   out_ref, att_ref):
            x = x_ref[...]
            a = attention(x, we_ref[...], be_ref[...], wmt_ref[...])
            att_ref[...] = a.astype(att_ref.dtype)
            # fused memory readout + decoder: relu(a @ (W_mem @ W_dec) + b_dec)
            out = jnp.dot(a.astype(x.dtype), wmd_ref[...],
                          preferred_element_type=jnp.float32) + bd_ref[...]
            out_ref[...] = jnp.maximum(out, 0.0).astype(out_ref.dtype)
        return kernel

    def kernel(x_ref, we_ref, be_ref, wmt_ref, wm_ref, wd_ref, bd_ref,
               out_ref, att_ref):
        x = x_ref[...]
        a = attention(x, we_ref[...], be_ref[...], wmt_ref[...])
        att_ref[...] = a.astype(att_ref.dtype)
        # memory readout: a @ W_mem, then decoder: relu(f2 @ W_dec + b_dec)
        f2 = jnp.dot(a.astype(x.dtype), wm_ref[...],
                     preferred_element_type=jnp.float32)
        out = jnp.dot(f2.astype(x.dtype), wd_ref[...],
                      preferred_element_type=jnp.float32) + bd_ref[...]
        out_ref[...] = jnp.maximum(out, 0.0).astype(out_ref.dtype)
    return kernel


# ---------------------------------------------------------------------------
# VMEM budget / tile sizing
# ---------------------------------------------------------------------------
def _vmem_budget_bytes():
    """~80% of the physical per-TensorCore VMEM (generation-aware)."""
    try:
        cap = int(pltpu.get_tpu_info().vmem_capacity_bytes)
    except Exception:
        cap = 64 << 20  # conservative default: v7x per-TensorCore VMEM
    return int(0.8 * cap)


def _auto_tile_n(N, requested, bytes_per_row, weight_bytes, sublane):
    """Batch tile: fits (double-buffered) activation tiles into what's left of
    the VMEM budget after the resident (single-buffered) weights; keeps >= 2
    grid steps for small N (v7x megacore); rounds big tiles to 256."""
    budget = _vmem_budget_bytes()
    avail = budget - weight_bytes - (4 << 20)  # slack for compiler scratch
    # TODO(synk): if weights alone exceed the budget (huge input_dim/mem_dim on
    # v7x), a second 'arbitrary' grid axis streaming W_dec column tiles would
    # be needed; not implemented here.
    cap = max(sublane, avail // max(2 * bytes_per_row, 1))
    t = max(sublane, min(int(requested), int(cap)))
    if N <= sublane:
        return sublane
    if t >= N:
        t = -(-N // 2)  # split into two parallel tiles (megacore)
    if t >= 256:
        t = (t // 256) * 256        # v6e/v7x MXU M-width
    else:
        t = -(-t // sublane) * sublane
    return int(t)


# ---------------------------------------------------------------------------
# Wrapper
# ---------------------------------------------------------------------------
def memae_forward(x, params, *, shrink_thres=0.0025, tile_n=256,
                  compute_dtype=jnp.float32, fuse_readout=None,
                  att_dtype=jnp.float32):
    """x: (N, input_dim) float32. Returns dict(output=(N, input_dim), att=(N, mem_dim))."""
    w_enc, b_enc, w_mem, w_dec, b_dec = (
        params["w_enc"], params["b_enc"], params["w_mem"],
        params["w_dec"], params["b_dec"],
    )
    N, input_dim = x.shape
    mem_dim, fea_dim = w_mem.shape
    assert fea_dim == FEA_DIM
    # Keep output stores lane-dense (unmasked vst). Pad in the caller otherwise.
    assert input_dim % 128 == 0 and mem_dim % 128 == 0, \
        "pad input_dim / mem_dim to multiples of 128"

    if fuse_readout is None:
        # Fuse readout+decoder only when the folded (mem_dim, input_dim) weight
        # costs no more FLOPs/bytes than the two factor matrices.
        fuse_readout = mem_dim * input_dim <= FEA_DIM * (mem_dim + input_dim)

    def cast(w):
        return w.astype(compute_dtype) if compute_dtype != jnp.float32 else w

    w_mem_t = w_mem.T  # one-time transpose outside the kernel
    if fuse_readout:
        w_md = jnp.dot(w_mem, w_dec, preferred_element_type=jnp.float32,
                       precision=jax.lax.Precision.HIGHEST)
        weights = [cast(w_enc), b_enc, cast(w_mem_t), cast(w_md), b_dec]
        weight_shapes = [(input_dim, FEA_DIM), (1, FEA_DIM), (FEA_DIM, mem_dim),
                         (mem_dim, input_dim), (1, input_dim)]
    else:
        weights = [cast(w_enc), b_enc, cast(w_mem_t), cast(w_mem),
                   cast(w_dec), b_dec]
        weight_shapes = [(input_dim, FEA_DIM), (1, FEA_DIM), (FEA_DIM, mem_dim),
                         (mem_dim, FEA_DIM), (FEA_DIM, input_dim), (1, input_dim)]

    # Resident (single-buffered) weight footprint and per-row activation bytes.
    weight_bytes = sum(int(w.size) * jnp.dtype(w.dtype).itemsize for w in weights)
    x_itemsize = jnp.dtype(compute_dtype).itemsize
    att_itemsize = jnp.dtype(att_dtype).itemsize
    bytes_per_row = input_dim * x_itemsize + input_dim * 4 + mem_dim * att_itemsize

    sublane = 16 if x_itemsize == 2 else 8
    tile_n = _auto_tile_n(N, tile_n, bytes_per_row, weight_bytes, sublane)

    # Cast x once in the wrapper (bf16 path) and zero-pad the batch.
    x_c = x.astype(compute_dtype) if compute_dtype != jnp.float32 else x
    pad_n = (-N) % tile_n
    x_p = jnp.pad(x_c, ((0, pad_n), (0, 0))) if pad_n else x_c
    Np = N + pad_n
    grid = (Np // tile_n,)

    vmem_budget = _vmem_budget_bytes()
    kernel = _memae_kernel(shrink_thres, fuse_readout)
    out_shape = (jax.ShapeDtypeStruct((Np, input_dim), jnp.float32),
                 jax.ShapeDtypeStruct((Np, mem_dim), att_dtype))

    def run(single_buffer_weights):
        wb = weight_bytes if single_buffer_weights else 2 * weight_bytes
        need = wb + 2 * tile_n * bytes_per_row + (4 << 20)
        vmem_limit = int(min(max(need, 32 << 20), vmem_budget))

        x_spec = pl.BlockSpec((tile_n, input_dim), lambda i: (i, 0))
        if single_buffer_weights:
            w_specs = [pl.BlockSpec(s, lambda i: (0, 0),
                                    pipeline_mode=pl.Buffered(1))
                       for s in weight_shapes]
        else:
            w_specs = [pl.BlockSpec(s, lambda i: (0, 0)) for s in weight_shapes]
        out_specs = [pl.BlockSpec((tile_n, input_dim), lambda i: (i, 0)),
                     pl.BlockSpec((tile_n, mem_dim), lambda i: (i, 0))]

        fn = pl.pallas_call(
            kernel,
            out_shape=out_shape,
            grid=grid,
            in_specs=[x_spec] + w_specs,
            out_specs=out_specs,
            compiler_params=pltpu.CompilerParams(
                dimension_semantics=("parallel",),
                vmem_limit_bytes=vmem_limit),
        )
        return jax.block_until_ready(fn(x_p, *weights))

    try:
        out, att = run(True)
    except Exception:
        # pipeline_mode=pl.Buffered(1) not supported on this jax version:
        # fall back to default double-buffered weights.
        out, att = run(False)

    if pad_n:
        out, att = out[:N], att[:N]
    return {"output": out, "att": att}


# ---------------------------------------------------------------------------
# Params / reference
# ---------------------------------------------------------------------------
def init_params(key, input_dim, mem_dim):
    """Deterministic init mirroring torch's default Linear / MemoryUnit init shapes."""
    k = jax.random.split(key, 5)
    stdv_e = 1.0 / math.sqrt(input_dim)
    w_enc = jax.random.uniform(k[0], (input_dim, FEA_DIM), jnp.float32, -stdv_e, stdv_e)
    b_enc = jax.random.uniform(k[1], (1, FEA_DIM), jnp.float32, -stdv_e, stdv_e)
    stdv_m = 1.0 / math.sqrt(FEA_DIM)
    w_mem = jax.random.uniform(k[2], (mem_dim, FEA_DIM), jnp.float32, -stdv_m, stdv_m)
    stdv_d = 1.0 / math.sqrt(FEA_DIM)
    w_dec = jax.random.uniform(k[3], (FEA_DIM, input_dim), jnp.float32, -stdv_d, stdv_d)
    b_dec = jax.random.uniform(k[4], (1, input_dim), jnp.float32, -stdv_d, stdv_d)
    return {"w_enc": w_enc, "b_enc": b_enc, "w_mem": w_mem,
            "w_dec": w_dec, "b_dec": b_dec}


def _reference_forward(x, params, shrink_thres=0.0025):
    """Plain-JAX reference matching the torch semantics."""
    hp = jax.lax.Precision.HIGHEST
    f = jnp.maximum(jnp.dot(x, params["w_enc"], precision=hp) + params["b_enc"], 0.0)
    a = jnp.dot(f, params["w_mem"].T, precision=hp)
    a = jax.nn.softmax(a, axis=1)
    if shrink_thres > 0:
        eps = 1e-12
        a = jnp.maximum(a - shrink_thres, 0.0) * a / (jnp.abs(a - shrink_thres) + eps)
        a = a / jnp.maximum(jnp.sum(jnp.abs(a), axis=1, keepdims=True), 1e-12)
    f2 = jnp.dot(a, params["w_mem"], precision=hp)
    out = jnp.maximum(jnp.dot(f2, params["w_dec"], precision=hp) + params["b_dec"], 0.0)
    return {"output": out, "att": a}


if __name__ == "__main__":
    key = jax.random.PRNGKey(0)
    # N deliberately not a tile multiple (exercises padding + the >=2-step
    # parallel-grid split that keeps both v7x TensorCores busy).
    N, INPUT_DIM, MEM_DIM = 250, 128, 128

    pkey, xkey = jax.random.split(key)
    params = init_params(pkey, INPUT_DIM, MEM_DIM)
    x = jax.random.normal(xkey, (N, INPUT_DIM), jnp.float32)

    ref = _reference_forward(x, params, shrink_thres=0.0025)

    # f32, auto path (fused readout at this small size) — strict check.
    res = memae_forward(x, params, shrink_thres=0.0025)
    out = jax.block_until_ready(res["output"])
    att = jax.block_until_ready(res["att"])
    assert out.shape == (N, INPUT_DIM) and att.shape == (N, MEM_DIM)
    assert jnp.allclose(out, ref["output"], atol=2e-4, rtol=1e-3)
    assert jnp.allclose(att, ref["att"], atol=2e-5, rtol=1e-3)

    # f32, unfused (two-matmul) path — the path used at real MemAE sizes.
    res_u = memae_forward(x, params, shrink_thres=0.0025, fuse_readout=False)
    out_u = jax.block_until_ready(res_u["output"])
    att_u = jax.block_until_ready(res_u["att"])
    assert jnp.allclose(out_u, ref["output"], atol=2e-4, rtol=1e-3)
    assert jnp.allclose(att_u, ref["att"], atol=2e-5, rtol=1e-3)

    # bf16 matmul operands (f32 accumulation, f32 elementwise) — loose check.
    res_bf = memae_forward(x, params, shrink_thres=0.0025,
                           compute_dtype=jnp.bfloat16)
    out_bf = jax.block_until_ready(res_bf["output"])
    att_bf = jax.block_until_ready(res_bf["att"])
    assert jnp.allclose(out_bf, ref["output"], atol=5e-2, rtol=5e-2)
    assert jnp.allclose(att_bf, ref["att"], atol=5e-2, rtol=5e-2)

    print("KERNEL_OK")
</pallas_src>

<mosaic_0001>
module attributes {stable_mosaic.version = 11 : i64} {
  func.func @kernel(%arg0: i32, %arg1: memref<128x128xf32, #tpu.memory_space<vmem>>, %arg2: memref<128x256xf32, #tpu.memory_space<vmem>>, %arg3: memref<1x256xf32, #tpu.memory_space<vmem>>, %arg4: memref<256x128xf32, #tpu.memory_space<vmem>>, %arg5: memref<128x128xf32, #tpu.memory_space<vmem>>, %arg6: memref<1x128xf32, #tpu.memory_space<vmem>>, %arg7: memref<128x128xf32, #tpu.memory_space<vmem>>, %arg8: memref<128x128xf32, #tpu.memory_space<vmem>>) attributes {dimension_semantics = [#tpu.dimension_semantics<parallel>], iteration_bounds = array<i64: 2>, scalar_prefetch = 0 : i64, scratch_operands = 0 : i64, tpu.core_type = #tpu.core_type<tc>, window_params = [{transform_indices = @transform_0, window_bounds = array<i64: 128, 128>}, {pipeline_mode = #tpu.pipeline_mode<synchronous>, transform_indices = @transform_1, window_bounds = array<i64: 128, 256>}, {pipeline_mode = #tpu.pipeline_mode<synchronous>, transform_indices = @transform_2, window_bounds = array<i64: 1, 256>}, {pipeline_mode = #tpu.pipeline_mode<synchronous>, transform_indices = @transform_3, window_bounds = array<i64: 256, 128>}, {pipeline_mode = #tpu.pipeline_mode<synchronous>, transform_indices = @transform_4, window_bounds = array<i64: 128, 128>}, {pipeline_mode = #tpu.pipeline_mode<synchronous>, transform_indices = @transform_5, window_bounds = array<i64: 1, 128>}, {transform_indices = @transform_6, window_bounds = array<i64: 128, 128>}, {transform_indices = @transform_7, window_bounds = array<i64: 128, 128>}]} {
    %c0 = arith.constant 0 : index
    %c0_0 = arith.constant 0 : index
    %0 = vector.load %arg1[%c0, %c0_0] : memref<128x128xf32, #tpu.memory_space<vmem>>, vector<128x128xf32>
    %c0_1 = arith.constant 0 : index
    %c0_2 = arith.constant 0 : index
    %1 = vector.load %arg2[%c0_1, %c0_2] : memref<128x256xf32, #tpu.memory_space<vmem>>, vector<128x256xf32>
    %c0_3 = arith.constant 0 : index
    %c0_4 = arith.constant 0 : index
    %2 = vector.load %arg3[%c0_3, %c0_4] : memref<1x256xf32, #tpu.memory_space<vmem>>, vector<1x256xf32>
    %c0_5 = arith.constant 0 : index
    %c0_6 = arith.constant 0 : index
    %3 = vector.load %arg4[%c0_5, %c0_6] : memref<256x128xf32, #tpu.memory_space<vmem>>, vector<256x128xf32>
    %cst = arith.constant dense<0.000000e+00> : vector<128x256xf32>
    %4 = tpu.matmul %0, %1, %cst {dimension_numbers = #tpu.dot_dimension_numbers<[1], [0], [0], [1], [0, 0, 1, 1], [], []>} : vector<128x128xf32>, vector<128x256xf32>, vector<128x256xf32> -> vector<128x256xf32>
    %5 = vector.broadcast %2 : vector<1x256xf32> to vector<128x256xf32>
    %6 = arith.addf %4, %5 : vector<128x256xf32>
    %cst_7 = arith.constant 0.000000e+00 : f32
    %7 = vector.broadcast %cst_7 : f32 to vector<128x256xf32>
    %8 = arith.maximumf %6, %7 : vector<128x256xf32>
    %cst_8 = arith.constant dense<0.000000e+00> : vector<128x128xf32>
    %9 = tpu.matmul %8, %3, %cst_8 {dimension_numbers = #tpu.dot_dimension_numbers<[1], [0], [0], [1], [0, 0, 1, 1], [], []>} : vector<128x256xf32>, vector<256x128xf32>, vector<128x128xf32> -> vector<128x128xf32>
    %cst_9 = arith.constant dense<0xFF800000> : vector<128xf32>
    %10 = vector.multi_reduction <maximumf>, %9, %cst_9 [1] : vector<128x128xf32> to vector<128xf32>
    %11 = vector.shape_cast %10 : vector<128xf32> to vector<128x1xf32>
    %12 = vector.broadcast %11 : vector<128x1xf32> to vector<128x128xf32>
    %13 = arith.subf %9, %12 : vector<128x128xf32>
    %14 = math.exp %13 : vector<128x128xf32>
    %cst_10 = arith.constant dense<0.000000e+00> : vector<128xf32>
    %15 = vector.multi_reduction <add>, %14, %cst_10 [1] : vector<128x128xf32> to vector<128xf32>
    %16 = vector.shape_cast %15 : vector<128xf32> to vector<128x1xf32>
    %17 = tpu.reciprocal %16 : vector<128x1xf32> -> vector<128x1xf32>
    %18 = vector.broadcast %17 : vector<128x1xf32> to vector<128x128xf32>
    %19 = arith.mulf %14, %18 : vector<128x128xf32>
    %cst_11 = arith.constant 2.500000e-03 : f32
    %20 = vector.broadcast %cst_11 : f32 to vector<128x128xf32>
    %21 = arith.cmpf ogt, %19, %20 : vector<128x128xf32>
    %cst_12 = arith.constant 0.000000e+00 : f32
    %22 = vector.broadcast %cst_12 : f32 to vector<128x128xf32>
    %23 = arith.select %21, %19, %22 : vector<128x128xi1>, vector<128x128xf32>
    %cst_13 = arith.constant dense<0.000000e+00> : vector<128xf32>
    %24 = vector.multi_reduction <add>, %23, %cst_13 [1] : vector<128x128xf32> to vector<128xf32>
    %25 = vector.shape_cast %24 : vector<128xf32> to vector<128x1xf32>
    %cst_14 = arith.constant 9.99999996E-13 : f32
    %26 = vector.broadcast %cst_14 : f32 to vector<128x1xf32>
    %27 = arith.maximumf %25, %26 : vector<128x1xf32>
    %28 = tpu.reciprocal %27 : vector<128x1xf32> -> vector<128x1xf32>
    %29 = vector.broadcast %28 : vector<128x1xf32> to vector<128x128xf32>
    %30 = arith.mulf %23, %29 : vector<128x128xf32>
    %c0_15 = arith.constant 0 : index
    %c0_16 = arith.constant 0 : index
    %31 = vector.load %arg8[%c0_15, %c0_16] : memref<128x128xf32, #tpu.memory_space<vmem>>, vector<128x128xf32>
    tpu.vector_store %arg8[%c0_15, %c0_16], %30 {strides = array<i32>} : memref<128x128xf32, #tpu.memory_space<vmem>>, vector<128x128xf32>,
    %c0_17 = arith.constant 0 : index
    %c0_18 = arith.constant 0 : index
    %32 = vector.load %arg5[%c0_17, %c0_18] : memref<128x128xf32, #tpu.memory_space<vmem>>, vector<128x128xf32>
    %cst_19 = arith.constant dense<0.000000e+00> : vector<128x128xf32>
    %33 = tpu.matmul %30, %32, %cst_19 {dimension_numbers = #tpu.dot_dimension_numbers<[1], [0], [0], [1], [0, 0, 1, 1], [], []>} : vector<128x128xf32>, vector<128x128xf32>, vector<128x128xf32> -> vector<128x128xf32>
    %c0_20 = arith.constant 0 : index
    %c0_21 = arith.constant 0 : index
    %34 = vector.load %arg6[%c0_20, %c0_21] : memref<1x128xf32, #tpu.memory_space<vmem>>, vector<1x128xf32>
    %35 = vector.broadcast %34 : vector<1x128xf32> to vector<128x128xf32>
    %36 = arith.addf %33, %35 : vector<128x128xf32>
    %cst_22 = arith.constant 0.000000e+00 : f32
    %37 = vector.broadcast %cst_22 : f32 to vector<128x128xf32>
    %38 = arith.maximumf %36, %37 : vector<128x128xf32>
    %c0_23 = arith.constant 0 : index
    %c0_24 = arith.constant 0 : index
    %39 = vector.load %arg7[%c0_23, %c0_24] : memref<128x128xf32, #tpu.memory_space<vmem>>, vector<128x128xf32>
    tpu.vector_store %arg7[%c0_23, %c0_24], %38 {strides = array<i32>} : memref<128x128xf32, #tpu.memory_space<vmem>>, vector<128x128xf32>,
    return
  }
  func.func @transform_0(%arg0: i32) -> (i32, i32) {
    %c0_i32 = arith.constant 0 : i32
    %c0_i32_0 = arith.constant 0 : i32
    return %arg0, %c0_i32 : i32, i32
  }
  func.func @transform_1(%arg0: i32) -> (i32, i32) {
    %c0_i32 = arith.constant 0 : i32
    %c0_i32_0 = arith.constant 0 : i32
    %c0_i32_1 = arith.constant 0 : i32
    return %c0_i32, %c0_i32_0 : i32, i32
  }
  func.func @transform_2(%arg0: i32) -> (i32, i32) {
    %c0_i32 = arith.constant 0 : i32
    %c0_i32_0 = arith.constant 0 : i32
    %c0_i32_1 = arith.constant 0 : i32
    return %c0_i32, %c0_i32_0 : i32, i32
  }
  func.func @transform_3(%arg0: i32) -> (i32, i32) {
    %c0_i32 = arith.constant 0 : i32
    %c0_i32_0 = arith.constant 0 : i32
    %c0_i32_1 = arith.constant 0 : i32
    return %c0_i32, %c0_i32_0 : i32, i32
  }
  func.func @transform_4(%arg0: i32) -> (i32, i32) {
    %c0_i32 = arith.constant 0 : i32
    %c0_i32_0 = arith.constant 0 : i32
    %c0_i32_1 = arith.constant 0 : i32
    return %c0_i32, %c0_i32_0 : i32, i32
  }
  func.func @transform_5(%arg0: i32) -> (i32, i32) {
    %c0_i32 = arith.constant 0 : i32
    %c0_i32_0 = arith.constant 0 : i32
    %c0_i32_1 = arith.constant 0 : i32
    return %c0_i32, %c0_i32_0 : i32, i32
  }
  func.func @transform_6(%arg0: i32) -> (i32, i32) {
    %c0_i32 = arith.constant 0 : i32
    %c0_i32_0 = arith.constant 0 : i32
    return %arg0, %c0_i32 : i32, i32
  }
  func.func @transform_7(%arg0: i32) -> (i32, i32) {
    %c0_i32 = arith.constant 0 : i32
    %c0_i32_0 = arith.constant 0 : i32
    return %arg0, %c0_i32 : i32, i32
  }
}

module attributes {stable_mosaic.version = 11 : i64} {
  func.func @kernel(%arg0: i32, %arg1: memref<128x128xf32, #tpu.memory_space<vmem>>, %arg2: memref<128x256xf32, #tpu.memory_space<vmem>>, %arg3: memref<1x256xf32, #tpu.memory_space<vmem>>, %arg4: memref<256x128xf32, #tpu.memory_space<vmem>>, %arg5: memref<128x128xf32, #tpu.memory_space<vmem>>, %arg6: memref<1x128xf32, #tpu.memory_space<vmem>>, %arg7: memref<128x128xf32, #tpu.memory_space<vmem>>, %arg8: memref<128x128xf32, #tpu.memory_space<vmem>>) attributes {dimension_semantics = [#tpu.dimension_semantics<parallel>], iteration_bounds = array<i64: 2>, scalar_prefetch = 0 : i64, scratch_operands = 0 : i64, tpu.core_type = #tpu.core_type<tc>, window_params = [{transform_indices = @transform_0, window_bounds = array<i64: 128, 128>}, {pipeline_mode = #tpu.pipeline_mode<synchronous>, transform_indices = @transform_1, window_bounds = array<i64: 128, 256>}, {pipeline_mode = #tpu.pipeline_mode<synchronous>, transform_indices = @transform_2, window_bounds = array<i64: 1, 256>}, {pipeline_mode = #tpu.pipeline_mode<synchronous>, transform_indices = @transform_3, window_bounds = array<i64: 256, 128>}, {pipeline_mode = #tpu.pipeline_mode<synchronous>, transform_indices = @transform_4, window_bounds = array<i64: 128, 128>}, {pipeline_mode = #tpu.pipeline_mode<synchronous>, transform_indices = @transform_5, window_bounds = array<i64: 1, 128>}, {transform_indices = @transform_6, window_bounds = array<i64: 128, 128>}, {transform_indices = @transform_7, window_bounds = array<i64: 128, 128>}]} {
    %c0 = arith.constant 0 : index
    %c0_0 = arith.constant 0 : index
    %0 = vector.load %arg1[%c0, %c0_0] : memref<128x128xf32, #tpu.memory_space<vmem>>, vector<128x128xf32>
    %c0_1 = arith.constant 0 : index
    %c0_2 = arith.constant 0 : index
    %1 = vector.load %arg2[%c0_1, %c0_2] : memref<128x256xf32, #tpu.memory_space<vmem>>, vector<128x256xf32>
    %c0_3 = arith.constant 0 : index
    %c0_4 = arith.constant 0 : index
    %2 = vector.load %arg3[%c0_3, %c0_4] : memref<1x256xf32, #tpu.memory_space<vmem>>, vector<1x256xf32>
    %c0_5 = arith.constant 0 : index
    %c0_6 = arith.constant 0 : index
    %3 = vector.load %arg4[%c0_5, %c0_6] : memref<256x128xf32, #tpu.memory_space<vmem>>, vector<256x128xf32>
    %cst = arith.constant dense<0.000000e+00> : vector<128x256xf32>
    %4 = tpu.matmul %0, %1, %cst {dimension_numbers = #tpu.dot_dimension_numbers<[1], [0], [0], [1], [0, 0, 1, 1], [], []>} : vector<128x128xf32>, vector<128x256xf32>, vector<128x256xf32> -> vector<128x256xf32>
    %5 = vector.broadcast %2 : vector<1x256xf32> to vector<128x256xf32>
    %6 = arith.addf %4, %5 : vector<128x256xf32>
    %cst_7 = arith.constant 0.000000e+00 : f32
    %7 = vector.broadcast %cst_7 : f32 to vector<128x256xf32>
    %8 = arith.maximumf %6, %7 : vector<128x256xf32>
    %cst_8 = arith.constant dense<0.000000e+00> : vector<128x128xf32>
    %9 = tpu.matmul %8, %3, %cst_8 {dimension_numbers = #tpu.dot_dimension_numbers<[1], [0], [0], [1], [0, 0, 1, 1], [], []>} : vector<128x256xf32>, vector<256x128xf32>, vector<128x128xf32> -> vector<128x128xf32>
    %cst_9 = arith.constant dense<0xFF800000> : vector<128xf32>
    %10 = vector.multi_reduction <maximumf>, %9, %cst_9 [1] : vector<128x128xf32> to vector<128xf32>
    %11 = vector.shape_cast %10 : vector<128xf32> to vector<128x1xf32>
    %12 = vector.broadcast %11 : vector<128x1xf32> to vector<128x128xf32>
    %13 = arith.subf %9, %12 : vector<128x128xf32>
    %14 = math.exp %13 : vector<128x128xf32>
    %cst_10 = arith.constant dense<0.000000e+00> : vector<128xf32>
    %15 = vector.multi_reduction <add>, %14, %cst_10 [1] : vector<128x128xf32> to vector<128xf32>
    %16 = vector.shape_cast %15 : vector<128xf32> to vector<128x1xf32>
    %17 = tpu.reciprocal %16 : vector<128x1xf32> -> vector<128x1xf32>
    %18 = vector.broadcast %17 : vector<128x1xf32> to vector<128x128xf32>
    %19 = arith.mulf %14, %18 : vector<128x128xf32>
    %cst_11 = arith.constant 2.500000e-03 : f32
    %20 = vector.broadcast %cst_11 : f32 to vector<128x128xf32>
    %21 = arith.cmpf ogt, %19, %20 : vector<128x128xf32>
    %cst_12 = arith.constant 0.000000e+00 : f32
    %22 = vector.broadcast %cst_12 : f32 to vector<128x128xf32>
    %23 = arith.select %21, %19, %22 : vector<128x128xi1>, vector<128x128xf32>
    %cst_13 = arith.constant dense<0.000000e+00> : vector<128xf32>
    %24 = vector.multi_reduction <add>, %23, %cst_13 [1] : vector<128x128xf32> to vector<128xf32>
    %25 = vector.shape_cast %24 : vector<128xf32> to vector<128x1xf32>
    %cst_14 = arith.constant 9.99999996E-13 : f32
    %26 = vector.broadcast %cst_14 : f32 to vector<128x1xf32>
    %27 = arith.maximumf %25, %26 : vector<128x1xf32>
    %28 = tpu.reciprocal %27 : vector<128x1xf32> -> vector<128x1xf32>
    %29 = vector.broadcast %28 : vector<128x1xf32> to vector<128x128xf32>
    %30 = arith.mulf %23, %29 : vector<128x128xf32>
    %c0_15 = arith.constant 0 : index
    %c0_16 = arith.constant 0 : index
    %31 = vector.load %arg8[%c0_15, %c0_16] : memref<128x128xf32, #tpu.memory_space<vmem>>, vector<128x128xf32>
    tpu.vector_store %arg8[%c0_15, %c0_16], %30 {strides = array<i32>} : memref<128x128xf32, #tpu.memory_space<vmem>>, vector<128x128xf32>,
    %c0_17 = arith.constant 0 : index
    %c0_18 = arith.constant 0 : index
    %32 = vector.load %arg5[%c0_17, %c0_18] : memref<128x128xf32, #tpu.memory_space<vmem>>, vector<128x128xf32>
    %cst_19 = arith.constant dense<0.000000e+00> : vector<128x128xf32>
    %33 = tpu.matmul %30, %32, %cst_19 {dimension_numbers = #tpu.dot_dimension_numbers<[1], [0], [0], [1], [0, 0, 1, 1], [], []>} : vector<128x128xf32>, vector<128x128xf32>, vector<128x128xf32> -> vector<128x128xf32>
    %c0_20 = arith.constant 0 : index
    %c0_21 = arith.constant 0 : index
    %34 = vector.load %arg6[%c0_20, %c0_21] : memref<1x128xf32, #tpu.memory_space<vmem>>, vector<1x128xf32>
    %35 = vector.broadcast %34 : vector<1x128xf32> to vector<128x128xf32>
    %36 = arith.addf %33, %35 : vector<128x128xf32>
    %cst_22 = arith.constant 0.000000e+00 : f32
    %37 = vector.broadcast %cst_22 : f32 to vector<128x128xf32>
    %38 = arith.maximumf %36, %37 : vector<128x128xf32>
    %c0_23 = arith.constant 0 : index
    %c0_24 = arith.constant 0 : index
    %39 = vector.load %arg7[%c0_23, %c0_24] : memref<128x128xf32, #tpu.memory_space<vmem>>, vector<128x128xf32>
    tpu.vector_store %arg7[%c0_23, %c0_24], %38 {strides = array<i32>} : memref<128x128xf32, #tpu.memory_space<vmem>>, vector<128x128xf32>,
    return
  }
  func.func @transform_0(%arg0: i32) -> (i32, i32) {
    %c0_i32 = arith.constant 0 : i32
    %c0_i32_0 = arith.constant 0 : i32
    return %arg0, %c0_i32 : i32, i32
  }
  func.func @transform_1(%arg0: i32) -> (i32, i32) {
    %c0_i32 = arith.constant 0 : i32
    %c0_i32_0 = arith.constant 0 : i32
    %c0_i32_1 = arith.constant 0 : i32
    return %c0_i32, %c0_i32_0 : i32, i32
  }
  func.func @transform_2(%arg0: i32) -> (i32, i32) {
    %c0_i32 = arith.constant 0 : i32
    %c0_i32_0 = arith.constant 0 : i32
    %c0_i32_1 = arith.constant 0 : i32
    return %c0_i32, %c0_i32_0 : i32, i32
  }
  func.func @transform_3(%arg0: i32) -> (i32, i32) {
    %c0_i32 = arith.constant 0 : i32
    %c0_i32_0 = arith.constant 0 : i32
    %c0_i32_1 = arith.constant 0 : i32
    return %c0_i32, %c0_i32_0 : i32, i32
  }
  func.func @transform_4(%arg0: i32) -> (i32, i32) {
    %c0_i32 = arith.constant 0 : i32
    %c0_i32_0 = arith.constant 0 : i32
    %c0_i32_1 = arith.constant 0 : i32
    return %c0_i32, %c0_i32_0 : i32, i32
  }
  func.func @transform_5(%arg0: i32) -> (i32, i32) {
    %c0_i32 = arith.constant 0 : i32
    %c0_i32_0 = arith.constant 0 : i32
    %c0_i32_1 = arith.constant 0 : i32
    return %c0_i32, %c0_i32_0 : i32, i32
  }
  func.func @transform_6(%arg0: i32) -> (i32, i32) {
    %c0_i32 = arith.constant 0 : i32
    %c0_i32_0 = arith.constant 0 : i32
    return %arg0, %c0_i32 : i32, i32
  }
  func.func @transform_7(%arg0: i32) -> (i32, i32) {
    %c0_i32 = arith.constant 0 : i32
    %c0_i32_0 = arith.constant 0 : i32
    return %arg0, %c0_i32 : i32, i32
  }
}

</mosaic_0001>

<bundles_post_ra>
// kernel: tpu_custom_call.1
= control target key start
LH: loop header
LB: loop body
LE: loop exit
PB: predicated region body
PF: predicated region fallthrough
CT: control target
= control target key end

     0   :  { %s2803_s0 = inlined_call_operand.hbm [shape: f32[256,128], index: 0, kind: input, shape index: {}]   ;;  %s2804_s1 = inlined_call_operand.hbm [shape: f32[128,256], index: 1, kind: input, shape index: {}]   ;;  %s2805_s2 = inlined_call_operand.vmem [shape: f32[1,256], index: 2, kind: input, shape index: {}]   ;;  %s2806_s3 = inlined_call_operand.hbm [shape: f32[256,128], index: 3, kind: input, shape index: {}]   ;;  %s2807_s4 = inlined_call_operand.hbm [shape: f32[128,128], index: 4, kind: input, shape index: {}]   ;;  %s2808_s5 = inlined_call_operand.vmem [shape: f32[1,128], index: 5, kind: input, shape index: {}]   ;;  %s2809_s6 = inlined_call_operand.hbm [shape: f32[256,128], index: 6, kind: output, shape index: {0}]   ;;  %s2810_s7 = inlined_call_operand.hbm [shape: f32[256,128], index: 7, kind: output, shape index: {1}]  }
   0x1   :  { %2815 = sst [smem:[#allocation19_spill]] %s2804_s1 }
   0x2   :  { %13 = vsyncpa [#allocation3], 0 }
   0x3   :  { %15 = vsyncpa [#allocation3 + $0x1], 0 }
   0x4   :  { %16 = vsyncpa [#allocation6], 0 }
   0x5   :  { %17 = vsyncpa [#allocation9], 0 }
   0x6   :  { %18 = vsyncpa [#allocation4], 0 }
   0x7   :  { %20 = vsyncpa [#allocation4 + $0x1], 0 }
   0x8   :  { %21 = vsyncpa [#allocation12], 0 }
   0x9   :  { %23 = vsyncpa [#allocation12 + $0x1], 0  ;;  %s2194_s24 = smov 0   ;;  %s2196_s25 = smov 0  }
   0xa   :  { %s2198_s26 = smov 0   ;;  %s2200_s27 = smov 0  }
   0xb LB: > { %s2215_s28 = sadd.s32 4294967295, %s2139_s27   ;;  %s1426_s29 = sadd.s32 4294967294, %s2139_s27   ;;  %s2139_s27 = sphi %s2200_s27, %s2838_s27   ;;  %s2135_s26 = sphi %s2198_s26, %s2837_s26   ;;  %s2131_s25 = sphi %s2196_s25, %s2836_s25   ;;  %s2127_s24 = sphi %s2194_s24, %s2835_s24  }
   0xc   : > { %p49_p0 = scmp.ne.s32.totalorder %s2131_s25, %s2127_s24  ;;  %p2811_p1 = scmp.eq.s32.totalorder %s2215_s28, 0 }
   0xd   : > { %p184_p3 = scmp.eq.s32.totalorder %s1426_s29, 1  ;;  %p1427_p5 = scmp.ge.s32.totalorder %s2139_s27, 1 }
   0xe   : > { %p2224_p4 = por %p2811_p1, %p49_p0  ;;  %p217_p7 = scmp.lt.s32.totalorder %s2139_s27, 3 }
   0xf   : > { %p2229_p6 = por %p184_p3, %p49_p0  ;;  %s2141_s10 = smov [#allocation5]  }
  0x10   : > { %s2816_s30 = scalar_select %p2224_p4, 1, 0 }
  0x11   : > { %s2817_s8 = scalar_select %p2229_p6, 1, 0 }
  0x12   : > { %p2234_p8 = pnand %p1427_p5, %p217_p7  ;;  %s229_s11 = sshll.u32 %s2141_s10, 4  ;;  %s2238_s11 = int_to_ptr.vmem [resolvable:$true] %s229_s11 }
  0x13   : > { %2818 = sst [smem:[#allocation18_spill]] %s2817_s8  ;;  %s2142_s13 = smov [#allocation7]  }
  0x14   : > { %s2819_s9 = scalar_select %p2234_p8, 1, 0 }
  0x15   : > { %p1752_p9 = pneg %p2234_p8  ;;  %s245_s14 = sshll.u32 %s2142_s13, 4  ;;  %s2249_s14 = int_to_ptr.vmem [resolvable:$true] %s245_s14 }
  0x16   : > { %s2821_s1 = sld [smem:[#allocation19_spill]] }
  0x17   : > { %p2245_p11 = pnand %p1752_p9, %p2811_p1 }
  0x19   : > { %p2259_p13 = pneg %p2245_p11 }
  0x1c   : > { %s1919_s17 = scalar_lea.hbm %s2821_s1, 4096 }
  0x1d   : > { %p1920_p12 = scmp.ne.s32.totalorder %s2821_s1, %s1919_s17  ;;  %p1926_p5 = scmp.lt.u32.totalorder %s1919_s17, %s2821_s1 }
  0x1f   : > { %p1922_p0 = pnand %p2259_p13, %p1920_p12 }
  0x21   : > { %p1923_p3 = pneg %p1922_p0 }
  0x23   : > { %p1928_p7 = pnand %p1926_p5, %p1923_p3 }
  0x25   : > { %1931 = shalt.err (!%p1928_p7)
}
  0x26   : > { %s1932_s23 = scalar_lea.vmem %s2238_s11, 4096  ;;  %p1940_p2 = scmp.lt.s32.totalorder %s2238_s11, %s2238_s11 }
  0x27   : > { %p1933_p9 = scmp.ne.s32.totalorder %s2238_s11, %s1932_s23  ;;  %p1941_p6 = scmp.lt.s32.totalorder %s1932_s23, %s1932_s23 }
  0x29   : > { %p1935_p10 = pnand %p1933_p9, %p2259_p13  ;;  %p1942_p12 = por %p1941_p6, %p1940_p2 }
  0x2b   : > { %p1936_p1 = pneg %p1935_p10 }
  0x2d   : > { %p1943_p0 = pnand %p1942_p12, %p1936_p1 }
  0x2f   : > { %1946 = shalt.err (!%p1943_p0)
}
  0x30   : > { %s2143_s29 = smov 256   ;;  %s2144_s10 = smov 16  }
  0x31   : > { %1755 = dma.hbm_to_vmem [thread:$0]  (!%p2245_p11), %s2821_s1, 4096, %s2238_s11, [#allocation6], %s2143_s29, %s2143_s29, %s2144_s10  }
  0x32   : > { %s1947_s18 = scalar_lea.hbm %s2806_s3, 4096 }
  0x33   : > { %p1948_p2 = scmp.ne.s32.totalorder %s2806_s3, %s1947_s18  ;;  %p1954_p10 = scmp.lt.u32.totalorder %s1947_s18, %s2806_s3 }
  0x35   : > { %p1950_p1 = pnand %p1948_p2, %p2259_p13 }
  0x37   : > { %p1951_p6 = pneg %p1950_p1 }
  0x39   : > { %p1956_p3 = pnand %p1954_p10, %p1951_p6 }
  0x3b   : > { %1959 = shalt.err (!%p1956_p3)
}
  0x3c   : > { %s1960_s11 = scalar_lea.vmem %s2249_s14, 4096  ;;  %p1968_p12 = scmp.lt.s32.totalorder %s2249_s14, %s2249_s14 }
  0x3d   : > { %p1961_p5 = scmp.ne.s32.totalorder %s2249_s14, %s1960_s11  ;;  %p1969_p0 = scmp.lt.s32.totalorder %s1960_s11, %s1960_s11 }
  0x3f   : > { %p1963_p7 = pnand %p1961_p5, %p2259_p13  ;;  %p1970_p2 = por %p1969_p0, %p1968_p12 }
  0x41   : > { %p1964_p9 = pneg %p1963_p7 }
  0x43   : > { %p1971_p1 = pnand %p1970_p2, %p1964_p9 }
  0x45   : > { %1974 = shalt.err (!%p1971_p1)
}
  0x46   : > { %s2145_s29 = smov 128   ;;  %s2146_s10 = smov 8  }
  0x47   : > { %1758 = dma.hbm_to_vmem [thread:$0]  (!%p2245_p11), %s2806_s3, 4096, %s2249_s14, [#allocation6], %s2145_s29, %s2145_s29, %s2146_s10  }
  0x48   : > { %s2147_s16 = smov [#allocation8]   ;;  %s2307_s18 = sadd.s32 1, %s2139_s27  }
  0x49   : > { %s258_s17 = sshll.u32 %s2147_s16, 4  ;;  %s1975_s22 = scalar_lea.hbm %s2807_s4, 2048  ;;  %s259_s17 = int_to_ptr.vmem [resolvable:$true] %s258_s17 }
  0x4a   : > { %p1976_p6 = scmp.ne.s32.totalorder %s2807_s4, %s1975_s22  ;;  %p1982_p5 = scmp.lt.u32.totalorder %s1975_s22, %s2807_s4 }
  0x4c   : > { %p1978_p10 = pnand %p1976_p6, %p2259_p13 }
  0x4e   : > { %p1979_p3 = pneg %p1978_p10 }
  0x50   : > { %p1984_p7 = pnand %p1982_p5, %p1979_p3 }
  0x52   : > { %1987 = shalt.err (!%p1984_p7)
}
  0x53   : > { %s1988_s14 = scalar_lea.vmem %s259_s17, 2048  ;;  %p1996_p2 = scmp.lt.s32.totalorder %s259_s17, %s259_s17 }
  0x54   : > { %p1989_p9 = scmp.ne.s32.totalorder %s259_s17, %s1988_s14  ;;  %p1997_p1 = scmp.lt.s32.totalorder %s1988_s14, %s1988_s14 }
  0x56   : > { %p1991_p12 = pnand %p1989_p9, %p2259_p13  ;;  %p1998_p4 = por %p1997_p1, %p1996_p2 }
  0x58   : > { %p1992_p0 = pneg %p1991_p12 }
  0x5a   : > { %p1999_p8 = pnand %p1998_p4, %p1992_p0 }
  0x5c   : > { %2002 = shalt.err (!%p1999_p8)
}
  0x5d   : > { %1761 = dma.hbm_to_vmem [thread:$0]  (!%p2245_p11), %s2807_s4, 2048, %s259_s17, [#allocation9], %s2145_s29, %s2145_s29, %s2146_s10  }
  0x5e   : > { %s33_s20 = ssub.s32 %s2139_s27, %s2307_s18  ;;  %s36_s12 = sadd.s32 1, %s2135_s26 }
  0x5f   : > { %p34_p4 = scmp.eq.s32.totalorder %s33_s20, 0  ;;  %p43_p8 = scmp.ne.s32.totalorder %s2135_s26, %s2131_s25 }
  0x60   : > { %p44_p13 = scmp.eq.s32.totalorder %s2139_s27, 0  ;;  %p1776_p6 = scmp.lt.s32.totalorder %s2139_s27, 2 }
  0x61   : > { %s2338_s13 = scalar_select %p34_p4, %s2135_s26, %s36_s12  }
  0x62   : > { %p45_p10 = por %p44_p13, %p43_p8  ;;  %p2823_p3 = scmp.eq.s32.totalorder %s2215_s28, 1 }
  0x63   : > { %s275_s16 = sand.u32 1, %s2135_s26   ;;  %s1451_s19 = sshll.u32 %s2139_s27, 11 }
  0x64   : > { %p2342_p5 = por %p2823_p3, %p43_p8  ;;  %s1432_s21 = sshll.u32 %s275_s16, 7 }
  0x65   : > { %s2351_s17 = scalar_lea.hbm %s2803_s0, %s1451_s19  ;;  %s279_s11 = scalar_lea.vmem [#allocation2], %s1432_s21 }
  0x66   : > { %s286_s14 = sshll.u32 %s279_s11, 4  ;;  %p2353_p11 = pnand %p1776_p6, %p45_p10  ;;  %s2357_s14 = int_to_ptr.vmem [resolvable:$true] %s286_s14 }
  0x67   : > { %s2359_s8 = scalar_lea.sflag [#allocation3], %s275_s16  ;;  %s2003_s20 = scalar_lea.hbm %s2351_s17, 2048 }
  0x68   : > { %p2004_p7 = scmp.ne.s32.totalorder %s2351_s17, %s2003_s20  ;;  %p2005_p9 = pneg %p2353_p11 }
  0x69   : > { %s2008_s21 = scalar_lea.hbm %s2803_s0, 4096  ;;  %p2009_p2 = scmp.lt.u32.totalorder %s2351_s17, %s2803_s0 }
  0x6a   : > { %p2006_p12 = pnand %p2005_p9, %p2004_p7  ;;  %p2010_p1 = scmp.lt.u32.totalorder %s2008_s21, %s2003_s20 }
  0x6b   : > { %p2012_p8 = scmp.lt.u32.totalorder %s2003_s20, %s2351_s17 }
  0x6c   : > { %p2007_p0 = pneg %p2006_p12  ;;  %p2011_p4 = por %p2010_p1, %p2009_p2 }
  0x6e   : > { %p2013_p13 = por %p2012_p8, %p2011_p4 }
  0x70   : > { %p2014_p6 = pnand %p2013_p13, %p2007_p0 }
  0x72   : > { %2017 = shalt.err (!%p2014_p6)
}
  0x73   : > { %s2018_s16 = scalar_lea.vmem %s2357_s14, 2048  ;;  %s2148_s11 = smov [#allocation2]  }
  0x74   : > { %p2019_p10 = scmp.ne.s32.totalorder %s2357_s14, %s2018_s16  ;;  %s2023_s12 = sshll.u32 %s2148_s11, 4  ;;  %s2024_s12 = int_to_ptr.vmem [resolvable:$false] %s2023_s12 }
  0x75   : > { %s2025_s19 = scalar_lea.vmem %s2024_s12, 4096  ;;  %p2026_p12 = scmp.lt.s32.totalorder %s2357_s14, %s2024_s12 }
  0x76   : > { %p2021_p3 = pnand %p2019_p10, %p2005_p9  ;;  %p2027_p2 = scmp.lt.s32.totalorder %s2025_s19, %s2018_s16 }
  0x78   : > { %p2022_p7 = pneg %p2021_p3  ;;  %p2028_p1 = por %p2027_p2, %p2026_p12 }
  0x7a   : > { %p2029_p4 = pnand %p2028_p1, %p2022_p7 }
  0x7c   : > { %2032 = shalt.err (!%p2029_p4)
}
  0x7d   : > { %1765 = dma.hbm_to_vmem [thread:$0]  (!%p2353_p11), %s2351_s17, 2048, %s2357_s14, %s2359_s8, %s2145_s29, %s2145_s29, %s2146_s10  }
  0x7e   : > { %p2826_p9 = scmp.ne.s32.totalorder %s2819_s9, 0 }
  0x7f   : > { %s2393_s20 = sand.u32 (!%p2826_p9), 1, %s2131_s25   ;;  %p2827_p0 = scmp.ne.s32.totalorder (!%p2826_p9), %s2816_s30, 0 }
  0x80   : > { %298 = sbr.rel (%p2826_p9) target bundleno = 1373 (0x55d), region = 44  ;;  %s2396_s21 = sshll.u32 (!%p2826_p9), %s2393_s20, 7 }
  0x81   : > { %s301_s1 = scalar_lea.sflag (!%p2826_p9), [#allocation3], %s2393_s20  ;;  %s2400_s22 = scalar_lea.vmem (!%p2826_p9), [#allocation2], %s2396_s21 }
  0x87   : > { %2106 = dma.done.wait (%p2827_p0), %s301_s1, 2048  }
  0x88   : > { %2108 = vsyncadd (%p2827_p0), %s301_s1, 4294965248  ;;  %p2828_p11 = scmp.eq.s32.totalorder %s2215_s28, 0 }
  0x8a   : > { %2110 = dma.done.wait (%p2828_p11), [#allocation6], 8192   ;;  %p2829_p8 = pmov %p2828_p11 }
  0x8c   : > { %2112 = vsyncadd (%p2829_p8), [#allocation6], 4294959104  ;;  %p2830_p13 = pmov %p2829_p8 }
  0x8d   : > { %p2831_p6 = pmov %p2829_p8 }
  0x8e   : > { %2114 = dma.done.wait (%p2830_p13), [#allocation9], 2048  }
  0x8f   : > { %2116 = vsyncadd (%p2831_p6), [#allocation9], 4294965248  ;;  %v2149_v0 = vmov 0.0   ;;  %v372_v1 = vld [vmem:[#allocation5 + $0x8] sm:$0xff]  ;;  %v374_v2 = vld [vmem:[#allocation5 + $0x18] sm:$0xff]  ;;  %s2655_s29 = scalar_lea.vmem [#allocation11], %s2396_s21 }
  0x90   : > { %511 = vmatprep.mubr.f32.mxu0 %v2149_v0  ;;  %v371_v3 = vld [vmem:[#allocation5] sm:$0xff]  ;;  %v1622_v4 = vpack.c.bf16 %v374_v2, %v372_v1  ;;  %v373_v5 = vld [vmem:[#allocation5 + $0x10] sm:$0xff]  ;;  %v376_v6 = vld [vmem:[#allocation5 + $0x28] sm:$0xff]  ;;  %s1452_s10 = sshll.u32 %s2215_s28, 11  ;;  %s1292_s23 = sshll.u32 %s2655_s29, 4  ;;  %s2697_s23 = int_to_ptr.vmem [resolvable:$true] %s1292_s23 }
  0x91   : > { %v378_v7 = vld [vmem:[#allocation5 + $0x38] sm:$0xff]  ;;  %v1624_v8 = vpack.c.bf16 %v373_v5, %v371_v3  ;;  %v375_v10 = vld [vmem:[#allocation5 + $0x20] sm:$0xff]  ;;  %v377_v11 = vld [vmem:[#allocation5 + $0x30] sm:$0xff]  ;;  %s2694_s8 = scalar_lea.hbm %s2810_s7, %s1452_s10  ;;  %s1263_s16 = scalar_lea.sflag [#allocation12], %s2393_s20 }
  0x92   : > { %v1626_v9 = vpack.c.bf16 %v378_v7, %v376_v6  ;;  %v380_v12 = vld [vmem:[#allocation5 + $0x48] sm:$0xff]  ;;  %1623 = vmatprep.subr.bf16.mxu0 %v1622_v4  ;;  %v382_v13 = vld [vmem:[#allocation5 + $0x58] sm:$0xff]  ;;  %v1628_v14 = vpack.c.bf16 %v377_v11, %v375_v10  ;;  %v379_v16 = vld [vmem:[#allocation5 + $0x40] sm:$0xff]  ;;  %s2033_s11 = scalar_lea.vmem %s2697_s23, 2048  ;;  %s2150_s12 = smov [#allocation11]  }
  0x93   : > { %1625 = vmatpush1.bf16.msra.mxu0 %v1624_v8  ;;  %v1630_v15 = vpack.c.bf16 %v382_v13, %v380_v12  ;;  %v381_v17 = vld [vmem:[#allocation5 + $0x50] sm:$0xff]  ;;  %v384_v18 = vld [vmem:[#allocation5 + $0x68] sm:$0xff]  ;;  %v386_v19 = vld [vmem:[#allocation5 + $0x78] sm:$0xff]  ;;  %p2034_p10 = scmp.ne.s32.totalorder %s2697_s23, %s2033_s11  ;;  %s2037_s19 = sshll.u32 %s2150_s12, 4  ;;  %s2038_s19 = int_to_ptr.vmem [resolvable:$false] %s2037_s19 }
  0x94   : > { %1627 = vmatprep.subr.bf16.mxu0 %v1626_v9  ;;  %v1632_v20 = vpack.c.bf16 %v381_v17, %v379_v16  ;;  %v1634_v21 = vpack.c.bf16 %v386_v19, %v384_v18  ;;  %v383_v22 = vld [vmem:[#allocation5 + $0x60] sm:$0xff]  ;;  %v385_v23 = vld [vmem:[#allocation5 + $0x70] sm:$0xff]  ;;  %v388_v24 = vld [vmem:[#allocation5 + $0x88] sm:$0xff]  ;;  %s2039_s1 = scalar_lea.vmem %s2038_s19, 4096  ;;  %p2040_p12 = scmp.lt.s32.totalorder %s2697_s23, %s2038_s19 }
  0x95   : > { %v390_v25 = vld [vmem:[#allocation5 + $0x98] sm:$0xff]  ;;  %v1636_v26 = vpack.c.bf16 %v385_v23, %v383_v22  ;;  %v387_v28 = vld [vmem:[#allocation5 + $0x80] sm:$0xff]  ;;  %v389_v29 = vld [vmem:[#allocation5 + $0x90] sm:$0xff]  ;;  %p2035_p3 = pnand %p2034_p10, %p2342_p5  ;;  %p2041_p2 = scmp.lt.s32.totalorder %s2039_s1, %s2033_s11 }
  0x96   : > { %v1638_v27 = vpack.c.bf16 %v390_v25, %v388_v24  ;;  %v392_v30 = vld [vmem:[#allocation5 + $0xa8] sm:$0xff]  ;;  %v394_v31 = vld [vmem:[#allocation5 + $0xb8] sm:$0xff]  ;;  %v391_v32 = vld [vmem:[#allocation5 + $0xa0] sm:$0xff]  ;;  %v1640_v34 = vpack.c.bf16 %v389_v29, %v387_v28 }
  0x97   : > { %1629 = vmatpush1.bf16.msra.mxu0 %v1628_v14  ;;  %v393_v33 = vld [vmem:[#allocation5 + $0xb0] sm:$0xff]  ;;  %v396_v35 = vld [vmem:[#allocation5 + $0xc8] sm:$0xff]  ;;  %v398_v36 = vld [vmem:[#allocation5 + $0xd8] sm:$0xff]  ;;  %v1642_v40 = vpack.c.bf16 %v394_v31, %v392_v30  ;;  %p2036_p7 = pneg %p2035_p3  ;;  %p2042_p1 = por %p2041_p2, %p2040_p12 }
  0x98   : > { %1631 = vmatprep.subr.bf16.mxu0 %v1630_v15  ;;  %v420_v37 = vld [vmem:[#allocation7 + $0x80] sm:$0xff]  ;;  %v421_v38 = vld [vmem:[#allocation7 + $0x88] sm:$0xff]  ;;  %v422_v43 = vld [vmem:[#allocation7 + $0x90] sm:$0xff]  ;;  %v1644_v51 = vpack.c.bf16 %v393_v33, %v391_v32  ;;  %v1646_v55 = vpack.c.bf16 %v398_v36, %v396_v35 }
  0x99   : > { %v404_v39 = vld [vmem:[#allocation7] sm:$0xff]  ;;  %v1654_v41 = vpack.c.bf16 %v421_v38, %v420_v37  ;;  %v405_v42 = vld [vmem:[#allocation7 + $0x8] sm:$0xff]  ;;  %v423_v44 = vld [vmem:[#allocation7 + $0x98] sm:$0xff]  ;;  %p2043_p4 = pnand %p2042_p1, %p2036_p7 }
  0x9a   : > { %v1656_v45 = vpack.c.bf16 %v405_v42, %v404_v39  ;;  %v1658_v46 = vpack.c.bf16 %v423_v44, %v422_v43  ;;  %v406_v47 = vld [vmem:[#allocation7 + $0x10] sm:$0xff]  ;;  %v407_v48 = vld [vmem:[#allocation7 + $0x18] sm:$0xff]  ;;  %v424_v49 = vld [vmem:[#allocation7 + $0xa0] sm:$0xff] }
  0x9b   : > { %1633 = vmatpush1.bf16.msra.mxu0 %v1632_v20  ;;  %1655 = vmatprep.subr.bf16.mxu1 %v1654_v41  ;;  %v425_v50 = vld [vmem:[#allocation7 + $0xa8] sm:$0xff]  ;;  %v395_v52 = vld [vmem:[#allocation5 + $0xc0] sm:$0xff]  ;;  %v397_v53 = vld [vmem:[#allocation5 + $0xd0] sm:$0xff]  ;;  %v1660_v54 = vpack.c.bf16 %v407_v48, %v406_v47 }
  0x9c   : > { %1635 = vmatprep.subr.bf16.mxu0 %v1634_v21  ;;  %1657 = vmatpush3.bf16.msra.mxu1 %v1656_v45  ;;  %v400_v56 = vld [vmem:[#allocation5 + $0xe8] sm:$0xff]  ;;  %v1662_v57 = vpack.c.bf16 %v425_v50, %v424_v49  ;;  %v408_v58 = vld [vmem:[#allocation7 + $0x20] sm:$0xff]  ;;  %v402_v60 = vld [vmem:[#allocation5 + $0xf8] sm:$0xff]  ;;  %v1648_v63 = vpack.c.bf16 %v397_v53, %v395_v52  ;;  %v437_v50 = vlaneseq }
  0x9d   : > { %1659 = vmatprep.subr.bf16.mxu1 %v1658_v46  ;;  %v409_v59 = vld [vmem:[#allocation7 + $0x28] sm:$0xff]  ;;  %v426_v61 = vld [vmem:[#allocation7 + $0xb0] sm:$0xff]  ;;  %v427_v62 = vld [vmem:[#allocation7 + $0xb8] sm:$0xff]  ;;  %v1650_v3 = vpack.c.bf16 %v402_v60, %v400_v56 }
  0x9e   : > { %v399_v1 = vld [vmem:[#allocation5 + $0xe0] sm:$0xff]  ;;  %v1664_v2 = vpack.c.bf16 %v409_v59, %v408_v58  ;;  %v401_v4 = vld [vmem:[#allocation5 + $0xf0] sm:$0xff]  ;;  %v1666_v5 = vpack.c.bf16 %v427_v62, %v426_v61  ;;  %v411_v7 = vld [vmem:[#allocation7 + $0x38] sm:$0xff] }
  0x9f   : > { %1637 = vmatpush1.bf16.msra.mxu0 %v1636_v26  ;;  %v410_v6 = vld [vmem:[#allocation7 + $0x30] sm:$0xff]  ;;  %v428_v8 = vld [vmem:[#allocation7 + $0xc0] sm:$0xff]  ;;  %v429_v9 = vld [vmem:[#allocation7 + $0xc8] sm:$0xff]  ;;  %v1652_v10 = vpack.c.bf16 %v401_v4, %v399_v1 }
  0xa0   : > { %1639 = vmatprep.subr.bf16.mxu0 %v1638_v27  ;;  %1661 = vmatpush3.bf16.msra.mxu1 %v1660_v54  ;;  %v1668_v11 = vpack.c.bf16 %v411_v7, %v410_v6  ;;  %v1670_v12 = vpack.c.bf16 %v429_v9, %v428_v8  ;;  %v412_v13 = vld [vmem:[#allocation7 + $0x40] sm:$0xff]  ;;  %v413_v14 = vld [vmem:[#allocation7 + $0x48] sm:$0xff]  ;;  %v430_v15 = vld [vmem:[#allocation7 + $0xd0] sm:$0xff] }
  0xa1   : > { %1663 = vmatprep.subr.bf16.mxu1 %v1662_v57  ;;  %v431_v16 = vld [vmem:[#allocation7 + $0xd8] sm:$0xff]  ;;  %v355_v17 = vld [vmem:[%s2400_s22] sm:$0xff]  ;;  %v1672_v18 = vpack.c.bf16 %v413_v14, %v412_v13  ;;  %v414_v20 = vld [vmem:[#allocation7 + $0x50] sm:$0xff] }
  0xa2   : > { %v1674_v19 = vpack.c.bf16 %v431_v16, %v430_v15  ;;  %v415_v21 = vld [vmem:[#allocation7 + $0x58] sm:$0xff]  ;;  %v432_v22 = vld [vmem:[#allocation7 + $0xe0] sm:$0xff]  ;;  %v433_v23 = vld [vmem:[#allocation7 + $0xe8] sm:$0xff] }
  0xa3   : > { %1641 = vmatpush1.bf16.msra.mxu0 %v1640_v34  ;;  %v356_v24 = vld [vmem:[%s2400_s22 + $0x8] sm:$0xff]  ;;  %v1676_v25 = vpack.c.bf16 %v415_v21, %v414_v20  ;;  %v1678_v26 = vpack.c.bf16 %v433_v23, %v432_v22  ;;  %v357_v27 = vld [vmem:[%s2400_s22 + $0x10] sm:$0xff]  ;;  %v358_v28 = vld [vmem:[%s2400_s22 + $0x18] sm:$0xff] }
  0xa4   : > { %1643 = vmatprep.subr.bf16.mxu0 %v1642_v40  ;;  %1665 = vmatpush3.bf16.msra.mxu1 %v1664_v2  ;;  %v359_v29 = vld [vmem:[%s2400_s22 + $0x20] sm:$0xff]  ;;  %v360_v30 = vld [vmem:[%s2400_s22 + $0x28] sm:$0xff]  ;;  %v361_v31 = vld [vmem:[%s2400_s22 + $0x30] sm:$0xff] }
  0xa5   : > { %1667 = vmatprep.subr.bf16.mxu1 %v1666_v5  ;;  %v362_v32 = vld [vmem:[%s2400_s22 + $0x38] sm:$0xff]  ;;  %v363_v33 = vld [vmem:[%s2400_s22 + $0x40] sm:$0xff]  ;;  %v364_v34 = vld [vmem:[%s2400_s22 + $0x48] sm:$0xff] }
  0xa6   : > { %v365_v35 = vld [vmem:[%s2400_s22 + $0x50] sm:$0xff]  ;;  %v366_v36 = vld [vmem:[%s2400_s22 + $0x58] sm:$0xff]  ;;  %v367_v37 = vld [vmem:[%s2400_s22 + $0x60] sm:$0xff] }
  0xa7   : > { %1645 = vmatpush1.bf16.msra.mxu0 %v1644_v51  ;;  %v368_v38 = vld [vmem:[%s2400_s22 + $0x68] sm:$0xff]  ;;  %v369_v39 = vld [vmem:[%s2400_s22 + $0x70] sm:$0xff]  ;;  %v370_v40 = vld [vmem:[%s2400_s22 + $0x78] sm:$0xff]  ;;  %v438_v51 = vshrl.u32 %v437_v50, 7 }
  0xa8   : > { %1647 = vmatprep.subr.bf16.mxu0 %v1646_v55  ;;  %1669 = vmatpush3.bf16.msra.mxu1 %v1668_v11  ;;  %v416_v41 = vld [vmem:[#allocation7 + $0x60] sm:$0xff]  ;;  %v417_v42 = vld [vmem:[#allocation7 + $0x68] sm:$0xff]  ;;  %v434_v44 = vld [vmem:[#allocation7 + $0xf0] sm:$0xff] }
  0xa9   : > { %1671 = vmatprep.subr.bf16.mxu1 %v1670_v12  ;;  %v1680_v43 = vpack.c.bf16 %v417_v42, %v416_v41  ;;  %v435_v45 = vld [vmem:[#allocation7 + $0xf8] sm:$0xff]  ;;  %v418_v47 = vld [vmem:[#allocation7 + $0x70] sm:$0xff]  ;;  %v439_v52 = vsub.s32 0, %v438_v51  ;;  %v443_v53 = vsub.s32 1, %v438_v51 }
  0xaa   : > { %v1682_v46 = vpack.c.bf16 %v435_v45, %v434_v44  ;;  %v419_v48 = vld [vmem:[#allocation7 + $0x78] sm:$0xff] }
  0xab   : > { %1649 = vmatpush1.bf16.msra.mxu0 %v1648_v63  ;;  %v1684_v49 = vpack.c.bf16 %v419_v48, %v418_v47 }
  0xac   : > { %1651 = vmatprep.subr.bf16.mxu0 %v1650_v3  ;;  %1673 = vmatpush3.bf16.msra.mxu1 %v1672_v18 }
  0xad   : > { %1675 = vmatprep.subr.bf16.mxu1 %v1674_v19 }
  0xaf   : > { %1653 = vmatpush1.bf16.msra.mxu0 %v1652_v10 }
  0xb0   : > { %1677 = vmatpush3.bf16.msra.mxu1 %v1676_v25 }
  0xb1   : > { %1679 = vmatprep.subr.bf16.mxu1 %v1678_v26 }
  0xb2   : > { %512 = vmatmul.mubr.f32.vlgmr.msra.gmra.mrb[0].mxu0 %v355_v17 }
  0xb3   : > { %517 = vmatprep.mubr.f32.mxu0 %v2149_v0 }
  0xb4   : > { %1681 = vmatpush3.bf16.msra.mxu1 %v1680_v43 }
  0xb5   : > { %1683 = vmatprep.subr.bf16.mxu1 %v1682_v46 }
  0xb6   : > { %518 = vmatmul.mubr.f32.gmra.mrb[2].mxu0 %v356_v24 }
  0xb7   : > { %523 = vmatprep.mubr.f32.mxu0 %v2149_v0 }
  0xb8   : > { %1685 = vmatpush3.bf16.msra.mxu1 %v1684_v49 }
  0xba   : > { %524 = vmatmul.mubr.f32.gmra.mrb[4].mxu0 %v357_v27 }
  0xbb   : > { %529 = vmatprep.mubr.f32.mxu0 %v2149_v0 }
  0xbe   : > { %530 = vmatmul.mubr.f32.gmra.mrb[6].mxu0 %v358_v28 }
  0xbf   : > { %535 = vmatprep.mubr.f32.mxu0 %v2149_v0 }
  0xc2   : > { %536 = vmatmul.mubr.f32.gmra.mrb[8].mxu0 %v359_v29 }
  0xc3   : > { %541 = vmatprep.mubr.f32.mxu0 %v2149_v0 }
  0xc6   : > { %542 = vmatmul.mubr.f32.gmra.mrb[10].mxu0 %v360_v30 }
  0xc7   : > { %547 = vmatprep.mubr.f32.mxu0 %v2149_v0 }
  0xca   : > { %548 = vmatmul.mubr.f32.gmra.mrb[12].mxu0 %v361_v31 }
  0xcb   : > { %553 = vmatprep.mubr.f32.mxu0 %v2149_v0 }
  0xce   : > { %554 = vmatmul.mubr.f32.gmra.mrb[14].mxu0 %v362_v32 }
  0xcf   : > { %559 = vmatprep.mubr.f32.mxu0 %v2149_v0 }
  0xd2   : > { %560 = vmatmul.mubr.f32.gmra.mrb[16].mxu0 %v363_v33 }
  0xd3   : > { %565 = vmatprep.mubr.f32.mxu0 %v2149_v0 }
  0xd6   : > { %566 = vmatmul.mubr.f32.gmra.mrb[18].mxu0 %v364_v34 }
  0xd7   : > { %571 = vmatprep.mubr.f32.mxu0 %v2149_v0 }
  0xda   : > { %572 = vmatmul.mubr.f32.gmra.mrb[20].mxu0 %v365_v35 }
  0xdb   : > { %577 = vmatprep.mubr.f32.mxu0 %v2149_v0 }
  0xde   : > { %578 = vmatmul.mubr.f32.gmra.mrb[22].mxu0 %v366_v36 }
  0xdf   : > { %583 = vmatprep.mubr.f32.mxu0 %v2149_v0 }
  0xe2   : > { %584 = vmatmul.mubr.f32.gmra.mrb[24].mxu0 %v367_v37 }
  0xe3   : > { %589 = vmatprep.mubr.f32.mxu0 %v2149_v0 }
  0xe6   : > { %590 = vmatmul.mubr.f32.gmra.mrb[26].mxu0 %v368_v38 }
  0xe7   : > { %595 = vmatprep.mubr.f32.mxu0 %v2149_v0 }
  0xea   : > { %596 = vmatmul.mubr.f32.gmra.mrb[28].mxu0 %v369_v39 }
  0xeb   : > { %601 = vmatprep.mubr.f32.mxu0 %v2149_v0  ;;  %v403_v0 = vld [vmem:[%s2805_s2] sm:$0x3] }
  0xec   : > { %v2449_v54 = vrot.slane %v403_v0, %v439_v52  ;;  %v2451_v55 = vrot.slane %v403_v0, %v443_v53 }
  0xee   : > { %602 = vmatmul.mubr.f32.gmra.mrb[30].mxu0 %v370_v40 }
 0x185   : > { %v513_v56 = vpop.f32.mrb[0].mxu0 }
 0x186   : > { %v514_v57 = vadd.f32 %v513_v56, %v2449_v54  ;;  %v515_v58 = vpop.f32.mrb[1].mxu0 }
 0x187   : > { %v516_v59 = vadd.f32 %v515_v58, %v2451_v55 }
 0x188   : > { %v608_v62 = vmax.f32 %v514_v57, 0.0 }
 0x189   : > { %v519_v60 = vpop.f32.mrb[2].mxu0  ;;  %v609_v61 = vmax.f32 %v516_v59, 0.0 }
 0x18a   : > { %v520_v63 = vadd.f32 %v519_v60, %v2449_v54  ;;  %v521_v1 = vpop.f32.mrb[3].mxu0 }
 0x18b   : > { %v522_v2 = vadd.f32 %v521_v1, %v2451_v55  ;;  %704 = vmatprep.mubr.f32.mxu1 %v609_v61 }
 0x18c   : > { %705 = vmatmul.mubr.f32.vlgmr.msra.gmra.mrb[0].mxu1 %v608_v62  ;;  %v610_v5 = vmax.f32 %v520_v63, 0.0 }
 0x18d   : > { %v611_v3 = vmax.f32 %v522_v2, 0.0  ;;  %v525_v4 = vpop.f32.mrb[4].mxu0 }
 0x18e   : > { %v526_v6 = vadd.f32 %v525_v4, %v2449_v54  ;;  %v527_v7 = vpop.f32.mrb[5].mxu0 }
 0x18f   : > { %v528_v8 = vadd.f32 %v527_v7, %v2451_v55  ;;  %709 = vmatprep.mubr.f32.mxu1 %v611_v3 }
 0x190   : > { %710 = vmatmul.mubr.f32.gmra.mrb[2].mxu1 %v610_v5  ;;  %v612_v11 = vmax.f32 %v526_v6, 0.0 }
 0x191   : > { %v613_v9 = vmax.f32 %v528_v8, 0.0  ;;  %v531_v10 = vpop.f32.mrb[6].mxu0 }
 0x192   : > { %v532_v12 = vadd.f32 %v531_v10, %v2449_v54  ;;  %v533_v13 = vpop.f32.mrb[7].mxu0 }
 0x193   : > { %v534_v14 = vadd.f32 %v533_v13, %v2451_v55  ;;  %714 = vmatprep.mubr.f32.mxu1 %v613_v9 }
 0x194   : > { %715 = vmatmul.mubr.f32.gmra.mrb[4].mxu1 %v612_v11  ;;  %v614_v17 = vmax.f32 %v532_v12, 0.0 }
 0x195   : > { %v615_v15 = vmax.f32 %v534_v14, 0.0  ;;  %v537_v16 = vpop.f32.mrb[8].mxu0 }
 0x196   : > { %v538_v18 = vadd.f32 %v537_v16, %v2449_v54  ;;  %v539_v19 = vpop.f32.mrb[9].mxu0 }
 0x197   : > { %v540_v20 = vadd.f32 %v539_v19, %v2451_v55  ;;  %719 = vmatprep.mubr.f32.mxu1 %v615_v15 }
 0x198   : > { %720 = vmatmul.mubr.f32.gmra.mrb[6].mxu1 %v614_v17  ;;  %v616_v23 = vmax.f32 %v538_v18, 0.0 }
 0x199   : > { %v617_v21 = vmax.f32 %v540_v20, 0.0  ;;  %v543_v22 = vpop.f32.mrb[10].mxu0 }
 0x19a   : > { %v544_v24 = vadd.f32 %v543_v22, %v2449_v54  ;;  %v545_v25 = vpop.f32.mrb[11].mxu0 }
 0x19b   : > { %v546_v26 = vadd.f32 %v545_v25, %v2451_v55  ;;  %724 = vmatprep.mubr.f32.mxu1 %v617_v21 }
 0x19c   : > { %725 = vmatmul.mubr.f32.gmra.mrb[8].mxu1 %v616_v23  ;;  %v618_v29 = vmax.f32 %v544_v24, 0.0 }
 0x19d   : > { %v619_v27 = vmax.f32 %v546_v26, 0.0  ;;  %v549_v28 = vpop.f32.mrb[12].mxu0 }
 0x19e   : > { %v550_v30 = vadd.f32 %v549_v28, %v2449_v54  ;;  %v551_v31 = vpop.f32.mrb[13].mxu0 }
 0x19f   : > { %v552_v32 = vadd.f32 %v551_v31, %v2451_v55  ;;  %729 = vmatprep.mubr.f32.mxu1 %v619_v27 }
 0x1a0   : > { %730 = vmatmul.mubr.f32.gmra.mrb[10].mxu1 %v618_v29  ;;  %v620_v35 = vmax.f32 %v550_v30, 0.0 }
 0x1a1   : > { %v621_v33 = vmax.f32 %v552_v32, 0.0  ;;  %v555_v34 = vpop.f32.mrb[14].mxu0 }
 0x1a2   : > { %v556_v36 = vadd.f32 %v555_v34, %v2449_v54  ;;  %v557_v37 = vpop.f32.mrb[15].mxu0 }
 0x1a3   : > { %v558_v38 = vadd.f32 %v557_v37, %v2451_v55  ;;  %734 = vmatprep.mubr.f32.mxu1 %v621_v33 }
 0x1a4   : > { %735 = vmatmul.mubr.f32.gmra.mrb[12].mxu1 %v620_v35  ;;  %v622_v41 = vmax.f32 %v556_v36, 0.0 }
 0x1a5   : > { %v623_v39 = vmax.f32 %v558_v38, 0.0  ;;  %v561_v40 = vpop.f32.mrb[16].mxu0 }
 0x1a6   : > { %v562_v42 = vadd.f32 %v561_v40, %v2449_v54  ;;  %v563_v43 = vpop.f32.mrb[17].mxu0 }
 0x1a7   : > { %v564_v44 = vadd.f32 %v563_v43, %v2451_v55  ;;  %739 = vmatprep.mubr.f32.mxu1 %v623_v39 }
 0x1a8   : > { %740 = vmatmul.mubr.f32.gmra.mrb[14].mxu1 %v622_v41  ;;  %v624_v47 = vmax.f32 %v562_v42, 0.0 }
 0x1a9   : > { %v625_v45 = vmax.f32 %v564_v44, 0.0  ;;  %v567_v46 = vpop.f32.mrb[18].mxu0 }
 0x1aa   : > { %v568_v48 = vadd.f32 %v567_v46, %v2449_v54  ;;  %v569_v49 = vpop.f32.mrb[19].mxu0 }
 0x1ab   : > { %v570_v50 = vadd.f32 %v569_v49, %v2451_v55  ;;  %744 = vmatprep.mubr.f32.mxu1 %v625_v45 }
 0x1ac   : > { %745 = vmatmul.mubr.f32.gmra.mrb[16].mxu1 %v624_v47  ;;  %v626_v0 = vmax.f32 %v568_v48, 0.0 }
 0x1ad   : > { %v627_v51 = vmax.f32 %v570_v50, 0.0  ;;  %v573_v52 = vpop.f32.mrb[20].mxu0 }
 0x1ae   : > { %v574_v53 = vadd.f32 %v573_v52, %v2449_v54  ;;  %v575_v56 = vpop.f32.mrb[21].mxu0 }
 0x1af   : > { %v576_v57 = vadd.f32 %v575_v56, %v2451_v55  ;;  %749 = vmatprep.mubr.f32.mxu1 %v627_v51 }
 0x1b0   : > { %750 = vmatmul.mubr.f32.gmra.mrb[18].mxu1 %v626_v0  ;;  %v628_v60 = vmax.f32 %v574_v53, 0.0 }
 0x1b1   : > { %v629_v58 = vmax.f32 %v576_v57, 0.0  ;;  %v579_v59 = vpop.f32.mrb[22].mxu0 }
 0x1b2   : > { %v580_v61 = vadd.f32 %v579_v59, %v2449_v54  ;;  %v581_v62 = vpop.f32.mrb[23].mxu0 }
 0x1b3   : > { %v582_v63 = vadd.f32 %v581_v62, %v2451_v55  ;;  %754 = vmatprep.mubr.f32.mxu1 %v629_v58 }
 0x1b4   : > { %755 = vmatmul.mubr.f32.gmra.mrb[20].mxu1 %v628_v60  ;;  %v630_v3 = vmax.f32 %v580_v61, 0.0 }
 0x1b5   : > { %v631_v1 = vmax.f32 %v582_v63, 0.0  ;;  %v585_v2 = vpop.f32.mrb[24].mxu0 }
 0x1b6   : > { %v586_v4 = vadd.f32 %v585_v2, %v2449_v54  ;;  %v587_v5 = vpop.f32.mrb[25].mxu0 }
 0x1b7   : > { %v588_v6 = vadd.f32 %v587_v5, %v2451_v55  ;;  %759 = vmatprep.mubr.f32.mxu1 %v631_v1 }
 0x1b8   : > { %760 = vmatmul.mubr.f32.gmra.mrb[22].mxu1 %v630_v3  ;;  %v632_v9 = vmax.f32 %v586_v4, 0.0 }
 0x1b9   : > { %v633_v7 = vmax.f32 %v588_v6, 0.0  ;;  %v591_v8 = vpop.f32.mrb[26].mxu0 }
 0x1ba   : > { %v592_v10 = vadd.f32 %v591_v8, %v2449_v54  ;;  %v593_v11 = vpop.f32.mrb[27].mxu0 }
 0x1bb   : > { %v594_v12 = vadd.f32 %v593_v11, %v2451_v55  ;;  %764 = vmatprep.mubr.f32.mxu1 %v633_v7 }
 0x1bc   : > { %765 = vmatmul.mubr.f32.gmra.mrb[24].mxu1 %v632_v9  ;;  %v634_v15 = vmax.f32 %v592_v10, 0.0 }
 0x1bd   : > { %v635_v13 = vmax.f32 %v594_v12, 0.0  ;;  %v597_v14 = vpop.f32.mrb[28].mxu0 }
 0x1be   : > { %v598_v16 = vadd.f32 %v597_v14, %v2449_v54  ;;  %v599_v17 = vpop.f32.mrb[29].mxu0 }
 0x1bf   : > { %v600_v18 = vadd.f32 %v599_v17, %v2451_v55  ;;  %769 = vmatprep.mubr.f32.mxu1 %v635_v13 }
 0x1c0   : > { %770 = vmatmul.mubr.f32.gmra.mrb[26].mxu1 %v634_v15  ;;  %v636_v21 = vmax.f32 %v598_v16, 0.0 }
 0x1c1   : > { %v637_v19 = vmax.f32 %v600_v18, 0.0  ;;  %v603_v20 = vpop.f32.mrb[30].mxu0 }
 0x1c2   : > { %v604_v22 = vadd.f32 %v603_v20, %v2449_v54  ;;  %v605_v23 = vpop.f32.mrb[31].mxu0 }
 0x1c3   : > { %v606_v24 = vadd.f32 %v605_v23, %v2451_v55  ;;  %774 = vmatprep.mubr.f32.mxu1 %v637_v19 }
 0x1c4   : > { %775 = vmatmul.mubr.f32.gmra.mrb[28].mxu1 %v636_v21  ;;  %v638_v26 = vmax.f32 %v604_v22, 0.0 }
 0x1c5   : > { %v639_v25 = vmax.f32 %v606_v24, 0.0 }
 0x1c7   : > { %779 = vmatprep.mubr.f32.mxu1 %v639_v25 }
 0x1c8   : > { %780 = vmatmul.mubr.f32.gmra.mrb[30].mxu1 %v638_v26 }
 0x25f   : > { %v1486_v27 = vpop.f32.mrb[0].mxu1 }
 0x260   : > { %v1487_v28 = vpop.f32.mrb[1].mxu1 }
 0x261   : > { %v2485_v29 = vadd.f32 %v1487_v28, %v1486_v27 }
 0x263   : > { %v1489_v30 = vpop.f32.mrb[2].mxu1  ;;  %785 = vmax.xlane.f32.xlu0 %v2485_v29 }
 0x264   : > { %v1490_v31 = vpop.f32.mrb[3].mxu1 }
 0x265   : > { %v2488_v32 = vadd.f32 %v1490_v31, %v1489_v30 }
 0x267   : > { %v1492_v54 = vpop.f32.mrb[4].mxu1  ;;  %787 = vmax.xlane.f32.xlu1 %v2488_v32 }
 0x268   : > { %v1493_v55 = vpop.f32.mrb[5].mxu1 }
 0x269   : > { %v2491_v33 = vadd.f32 %v1493_v55, %v1492_v54 }
 0x26b   : > { %v1495_v34 = vpop.f32.mrb[6].mxu1  ;;  %789 = vmax.xlane.f32.xlu0 %v2491_v33 }
 0x26c   : > { %v1496_v35 = vpop.f32.mrb[7].mxu1 }
 0x26d   : > { %v2494_v36 = vadd.f32 %v1496_v35, %v1495_v34 }
 0x26f   : > { %v1498_v37 = vpop.f32.mrb[8].mxu1  ;;  %791 = vmax.xlane.f32.xlu0 %v2494_v36 }
 0x270   : > { %v1499_v38 = vpop.f32.mrb[9].mxu1 }
 0x271   : > { %v2497_v39 = vadd.f32 %v1499_v38, %v1498_v37 }
 0x273   : > { %v1501_v40 = vpop.f32.mrb[10].mxu1 }
 0x274   : > { %v1502_v41 = vpop.f32.mrb[11].mxu1 }
 0x275   : > { %v2499_v42 = vadd.f32 %v1502_v41, %v1501_v40 }
 0x277   : > { %v1504_v43 = vpop.f32.mrb[12].mxu1 }
 0x278   : > { %v1505_v44 = vpop.f32.mrb[13].mxu1 }
 0x279   : > { %v2501_v45 = vadd.f32 %v1505_v44, %v1504_v43 }
 0x27b   : > { %v1507_v46 = vpop.f32.mrb[14].mxu1 }
 0x27c   : > { %v1508_v47 = vpop.f32.mrb[15].mxu1 }
 0x27d   : > { %v2503_v48 = vadd.f32 %v1508_v47, %v1507_v46 }
 0x27f   : > { %v1510_v49 = vpop.f32.mrb[16].mxu1 }
 0x280   : > { %v1511_v50 = vpop.f32.mrb[17].mxu1 }
 0x281   : > { %v1512_v51 = vadd.f32 %v1511_v50, %v1510_v49 }
 0x283   : > { %v1513_v52 = vpop.f32.mrb[18].mxu1  ;;  %801 = vmax.xlane.f32.xlu0 %v1512_v51 }
 0x284   : > { %v1514_v0 = vpop.f32.mrb[19].mxu1 }
 0x285   : > { %v1515_v53 = vadd.f32 %v1514_v0, %v1513_v52 }
 0x287   : > { %v1516_v56 = vpop.f32.mrb[20].mxu1  ;;  %803 = vmax.xlane.f32.xlu1 %v1515_v53  ;;  %793 = vmax.xlane.f32.xlu0 %v2497_v39 }
 0x288   : > { %v1517_v57 = vpop.f32.mrb[21].mxu1 }
 0x289   : > { %v2506_v58 = vadd.f32 %v1517_v57, %v1516_v56 }
 0x28b   : > { %v1519_v59 = vpop.f32.mrb[22].mxu1  ;;  %805 = vmax.xlane.f32.xlu1 %v2506_v58  ;;  %795 = vmax.xlane.f32.xlu0 %v2499_v42 }
 0x28c   : > { %v1520_v60 = vpop.f32.mrb[23].mxu1 }
 0x28d   : > { %v2510_v61 = vadd.f32 %v1520_v60, %v1519_v59 }
 0x28f   : > { %v1522_v62 = vpop.f32.mrb[24].mxu1  ;;  %807 = vmax.xlane.f32.xlu1 %v2510_v61  ;;  %797 = vmax.xlane.f32.xlu0 %v2501_v45 }
 0x290   : > { %v1523_v63 = vpop.f32.mrb[25].mxu1 }
 0x291   : > { %v2514_v1 = vadd.f32 %v1523_v63, %v1522_v62 }
 0x293   : > { %v1525_v2 = vpop.f32.mrb[26].mxu1  ;;  %809 = vmax.xlane.f32.xlu1 %v2514_v1  ;;  %799 = vmax.xlane.f32.xlu0 %v2503_v48 }
 0x294   : > { %v1526_v3 = vpop.f32.mrb[27].mxu1 }
 0x295   : > { %v2518_v4 = vadd.f32 %v1526_v3, %v1525_v2 }
 0x297   : > { %v1528_v5 = vpop.f32.mrb[28].mxu1  ;;  %811 = vmax.xlane.f32.xlu1 %v2518_v4 }
 0x298   : > { %v1529_v6 = vpop.f32.mrb[29].mxu1 }
 0x299   : > { %v2521_v7 = vadd.f32 %v1529_v6, %v1528_v5 }
 0x29b   : > { %v1531_v8 = vpop.f32.mrb[30].mxu1  ;;  %813 = vmax.xlane.f32.xlu1 %v2521_v7 }
 0x29c   : > { %v1532_v9 = vpop.f32.mrb[31].mxu1 }
 0x29d   : > { %v2524_v10 = vadd.f32 %v1532_v9, %v1531_v8 }
 0x29f   : > { %815 = vmax.xlane.f32.xlu1 %v2524_v10 }
 0x2f0   : > { %v786_v11 = vpop.xlane.xlu0 %785 }
 0x2f1   : > { %v817_v12 = vsub.f32 %v2485_v29, %v786_v11  ;;  %v1057_v11 = vld [vmem:[#allocation8] sm:$0xff] }
 0x2f3   : > { %v833_v13 = vmul.f32 1.442695, %v817_v12  ;;  %v1058_v12 = vld [vmem:[#allocation8 + $0x8] sm:$0xff] }
 0x2f4   : > { %v788_v14 = vpop.xlane.xlu1 %787 }
 0x2f5   : > { %1823 = vpow2.f32 %v833_v13  ;;  %v818_v15 = vsub.f32 %v2488_v32, %v788_v14  ;;  %v1059_v13 = vld [vmem:[#allocation8 + $0x10] sm:$0xff]  ;;  %v1686_v14 = vpack.c.bf16 %v1058_v12, %v1057_v11 }
 0x2f7   : > { %v835_v16 = vmul.f32 1.442695, %v818_v15  ;;  %v1060_v15 = vld [vmem:[#allocation8 + $0x18] sm:$0xff]  ;;  %1687 = vmatprep.subr.bf16.mxu0 %v1686_v14  ;;  %1718 = vmatprep.subr.bf16.mxu1 %v1686_v14 }
 0x2f8   : > { %v790_v17 = vpop.xlane.xlu0 %789  ;;  %1689 = vmatpush3.bf16.msra.mxu0 %v1686_v14  ;;  %1726 = vmatpush3.bf16.msra.mxu1 %v1686_v14 }
 0x2f9   : > { %1825 = vpow2.f32 %v835_v16  ;;  %v819_v18 = vsub.f32 %v2491_v33, %v790_v17  ;;  %v1690_v16 = vpack.c.bf16 %v1060_v15, %v1059_v13  ;;  %v1061_v17 = vld [vmem:[#allocation8 + $0x20] sm:$0xff] }
 0x2fb   : > { %v837_v19 = vmul.f32 1.442695, %v819_v18  ;;  %v1062_v18 = vld [vmem:[#allocation8 + $0x28] sm:$0xff]  ;;  %1691 = vmatprep.subr.bf16.mxu0 %v1690_v16  ;;  %1719 = vmatprep.subr.bf16.mxu1 %v1690_v16 }
 0x2fc   : > { %v792_v20 = vpop.xlane.xlu0 %791  ;;  %1693 = vmatpush3.bf16.msra.mxu0 %v1690_v16  ;;  %1727 = vmatpush3.bf16.msra.mxu1 %v1690_v16 }
 0x2fd   : > { %1827 = vpow2.f32 %v837_v19  ;;  %v820_v21 = vsub.f32 %v2494_v36, %v792_v20  ;;  %v1694_v19 = vpack.c.bf16 %v1062_v18, %v1061_v17  ;;  %v1063_v20 = vld [vmem:[#allocation8 + $0x30] sm:$0xff] }
 0x2ff   : > { %v2531_v22 = vpop.eup %1823  ;;  %v839_v23 = vmul.f32 1.442695, %v820_v21  ;;  %v1064_v21 = vld [vmem:[#allocation8 + $0x38] sm:$0xff]  ;;  %1695 = vmatprep.subr.bf16.mxu0 %v1694_v19  ;;  %1720 = vmatprep.subr.bf16.mxu1 %v1694_v19 }
 0x300   : > { %865 = vadd.xlane.f32.xlu0 %v2531_v22  ;;  %1697 = vmatpush3.bf16.msra.mxu0 %v1694_v19 }
 0x301   : > { %1829 = vpow2.f32 %v839_v23  ;;  %v1698_v23 = vpack.c.bf16 %v1064_v21, %v1063_v20  ;;  %1728 = vmatpush3.bf16.msra.mxu1 %v1694_v19 }
 0x303   : > { %v2534_v24 = vpop.eup %1825  ;;  %1699 = vmatprep.subr.bf16.mxu0 %v1698_v23  ;;  %1721 = vmatprep.subr.bf16.mxu1 %v1698_v23 }
 0x304   : > { %867 = vadd.xlane.f32.xlu0 %v2534_v24  ;;  %1701 = vmatpush3.bf16.msra.mxu0 %v1698_v23 }
 0x305   : > { %1729 = vmatpush3.bf16.msra.mxu1 %v1698_v23 }
 0x307   : > { %v2537_v25 = vpop.eup %1827 }
 0x308   : > { %869 = vadd.xlane.f32.xlu0 %v2537_v25 }
 0x30b   : > { %v2540_v26 = vpop.eup %1829 }
 0x30c   : > { %871 = vadd.xlane.f32.xlu0 %v2540_v26 }
 0x310   : > { %v802_v27 = vpop.xlane.xlu0 %801 }
 0x311   : > { %v825_v28 = vsub.f32 %v1512_v51, %v802_v27 }
 0x313   : > { %v849_v29 = vmul.f32 1.442695, %v825_v28 }
 0x314   : > { %v804_v30 = vpop.xlane.xlu1 %803  ;;  %v794_v31 = vpop.xlane.xlu0 %793 }
 0x315   : > { %1831 = vpow2.f32 %v849_v29  ;;  %v826_v32 = vsub.f32 %v1515_v53, %v804_v30  ;;  %v821_v54 = vsub.f32 %v2497_v39, %v794_v31 }
 0x317   : > { %v851_v55 = vmul.f32 1.442695, %v826_v32  ;;  %v841_v33 = vmul.f32 1.442695, %v821_v54 }
 0x318   : > { %v806_v34 = vpop.xlane.xlu1 %805  ;;  %v796_v35 = vpop.xlane.xlu0 %795 }
 0x319   : > { %1833 = vpow2.f32 %v851_v55  ;;  %v827_v36 = vsub.f32 %v2506_v58, %v806_v34  ;;  %v822_v37 = vsub.f32 %v2499_v42, %v796_v35 }
 0x31a   : > { %1835 = vpow2.f32 %v841_v33 }
 0x31b   : > { %v853_v38 = vmul.f32 1.442695, %v827_v36  ;;  %v843_v40 = vmul.f32 1.442695, %v822_v37 }
 0x31c   : > { %v808_v41 = vpop.xlane.xlu1 %807  ;;  %v798_v43 = vpop.xlane.xlu0 %797 }
 0x31d   : > { %1837 = vpow2.f32 %v853_v38  ;;  %v828_v44 = vsub.f32 %v2510_v61, %v808_v41  ;;  %v823_v46 = vsub.f32 %v2501_v45, %v798_v43  ;;  %v1066_v41 = vld [vmem:[#allocation8 + $0x48] sm:$0xff] }
 0x31e   : > { %1839 = vpow2.f32 %v843_v40 }
 0x31f   : > { %v2548_v39 = vpop.eup %1831  ;;  %v855_v47 = vmul.f32 1.442695, %v828_v44  ;;  %v845_v49 = vmul.f32 1.442695, %v823_v46  ;;  %v1068_v46 = vld [vmem:[#allocation8 + $0x58] sm:$0xff] }
 0x320   : > { %v810_v50 = vpop.xlane.xlu1 %809  ;;  %881 = vadd.xlane.f32.xlu1 %v2548_v39  ;;  %v800_v51 = vpop.xlane.xlu0 %799 }
 0x321   : > { %1841 = vpow2.f32 %v855_v47  ;;  %v829_v42 = vsub.f32 %v2514_v1, %v810_v50  ;;  %v824_v52 = vsub.f32 %v2503_v48, %v800_v51  ;;  %v1069_v50 = vld [vmem:[#allocation8 + $0x60] sm:$0xff]  ;;  %v1070_v51 = vld [vmem:[#allocation8 + $0x68] sm:$0xff] }
 0x322   : > { %1843 = vpow2.f32 %v845_v49 }
 0x323   : > { %v2553_v0 = vpop.eup %1833  ;;  %v857_v53 = vmul.f32 1.442695, %v829_v42  ;;  %v847_v56 = vmul.f32 1.442695, %v824_v52  ;;  %v1710_v52 = vpack.c.bf16 %v1070_v51, %v1069_v50 }
 0x324   : > { %v2555_v45 = vpop.eup %1835  ;;  %v812_v57 = vpop.xlane.xlu1 %811  ;;  %883 = vadd.xlane.f32.xlu1 %v2553_v0 }
 0x325   : > { %1845 = vpow2.f32 %v857_v53  ;;  %v830_v58 = vsub.f32 %v2518_v4, %v812_v57  ;;  %873 = vadd.xlane.f32.xlu0 %v2555_v45  ;;  %v1071_v57 = vld [vmem:[#allocation8 + $0x70] sm:$0xff] }
 0x326   : > { %1847 = vpow2.f32 %v847_v56 }
 0x327   : > { %v2560_v59 = vpop.eup %1837  ;;  %v859_v60 = vmul.f32 1.442695, %v830_v58  ;;  %v1072_v58 = vld [vmem:[#allocation8 + $0x78] sm:$0xff] }
 0x328   : > { %v2562_v48 = vpop.eup %1839  ;;  %v814_v61 = vpop.xlane.xlu1 %813  ;;  %885 = vadd.xlane.f32.xlu1 %v2560_v59 }
 0x329   : > { %1849 = vpow2.f32 %v859_v60  ;;  %v831_v62 = vsub.f32 %v2521_v7, %v814_v61  ;;  %875 = vadd.xlane.f32.xlu0 %v2562_v48 }
 0x32b   : > { %v2567_v63 = vpop.eup %1841  ;;  %v861_v1 = vmul.f32 1.442695, %v831_v62  ;;  %v1714_v62 = vpack.c.bf16 %v1072_v58, %v1071_v57 }
 0x32c   : > { %v2569_v2 = vpop.eup %1843  ;;  %v816_v3 = vpop.xlane.xlu1 %815  ;;  %887 = vadd.xlane.f32.xlu1 %v2567_v63 }
 0x32d   : > { %1851 = vpow2.f32 %v861_v1  ;;  %v832_v4 = vsub.f32 %v2524_v10, %v816_v3  ;;  %877 = vadd.xlane.f32.xlu0 %v2569_v2 }
 0x32f   : > { %v2574_v5 = vpop.eup %1845  ;;  %v863_v6 = vmul.f32 1.442695, %v832_v4 }
 0x330   : > { %v2576_v8 = vpop.eup %1847  ;;  %889 = vadd.xlane.f32.xlu1 %v2574_v5 }
 0x331   : > { %1853 = vpow2.f32 %v863_v6  ;;  %879 = vadd.xlane.f32.xlu0 %v2576_v8 }
 0x333   : > { %v2580_v7 = vpop.eup %1849 }
 0x334   : > { %891 = vadd.xlane.f32.xlu1 %v2580_v7 }
 0x337   : > { %v2583_v9 = vpop.eup %1851 }
 0x338   : > { %893 = vadd.xlane.f32.xlu1 %v2583_v9 }
 0x33b   : > { %v2586_v10 = vpop.eup %1853 }
 0x33c   : > { %895 = vadd.xlane.f32.xlu1 %v2586_v10 }
 0x38d   : > { %v866_v27 = vpop.xlane.xlu0 %865 }
 0x38e   : > { %1855 = vrcp.f32 %v866_v27 }
 0x391   : > { %v868_v28 = vpop.xlane.xlu0 %867 }
 0x392   : > { %1857 = vrcp.f32 %v868_v28 }
 0x395   : > { %v870_v29 = vpop.xlane.xlu0 %869 }
 0x396   : > { %1859 = vrcp.f32 %v870_v29 }
 0x398   : > { %v1856_v30 = vpop.eup %1855 }
 0x399   : > { %v872_v31 = vpop.xlane.xlu0 %871  ;;  %v913_v32 = vmul.f32 %v1856_v30, %v2531_v22 }
 0x39a   : > { %1861 = vrcp.f32 %v872_v31 }
 0x39b   : > { %vm929_vm0 = vcmp.gt.f32.partialorder %v913_v32, 0.0025 }
 0x39c   : > { %v1858_v54 = vpop.eup %1857  ;;  %v2590_v55 = vsel %vm929_vm0, %v913_v32, 0.0 }
 0x39d   : > { %961 = vadd.xlane.f32.xlu0 %v2590_v55  ;;  %v914_v33 = vmul.f32 %v1858_v54, %v2534_v24  ;;  %v1065_v24 = vld [vmem:[#allocation8 + $0x40] sm:$0xff] }
 0x39e   : > { %v1702_v44 = vpack.c.bf16 %v1066_v41, %v1065_v24 }
 0x39f   : > { %vm930_vm1 = vcmp.gt.f32.partialorder %v914_v33, 0.0025 }
 0x3a0   : > { %v1860_v34 = vpop.eup %1859  ;;  %v2594_v35 = vsel %vm930_vm1, %v914_v33, 0.0  ;;  %1703 = vmatprep.subr.bf16.mxu0 %v1702_v44  ;;  %1722 = vmatprep.subr.bf16.mxu1 %v1702_v44 }
 0x3a1   : > { %963 = vadd.xlane.f32.xlu0 %v2594_v35  ;;  %v915_v36 = vmul.f32 %v1860_v34, %v2537_v25  ;;  %1705 = vmatpush3.bf16.msra.mxu0 %v1702_v44  ;;  %v1067_v25 = vld [vmem:[#allocation8 + $0x50] sm:$0xff] }
 0x3a2   : > { %1730 = vmatpush3.bf16.msra.mxu1 %v1702_v44  ;;  %v1706_v49 = vpack.c.bf16 %v1068_v46, %v1067_v25 }
 0x3a3   : > { %vm931_vm2 = vcmp.gt.f32.partialorder %v915_v36, 0.0025 }
 0x3a4   : > { %v1862_v37 = vpop.eup %1861  ;;  %v2598_v22 = vsel %vm931_vm2, %v915_v36, 0.0  ;;  %1707 = vmatprep.subr.bf16.mxu0 %v1706_v49  ;;  %1723 = vmatprep.subr.bf16.mxu1 %v1706_v49 }
 0x3a5   : > { %965 = vadd.xlane.f32.xlu0 %v2598_v22  ;;  %v916_v38 = vmul.f32 %v1862_v37, %v2540_v26  ;;  %1709 = vmatpush3.bf16.msra.mxu0 %v1706_v49 }
 0x3a6   : > { %1731 = vmatpush3.bf16.msra.mxu1 %v1706_v49  ;;  %1711 = vmatprep.subr.bf16.mxu0 %v1710_v52 }
 0x3a7   : > { %vm932_vm3 = vcmp.gt.f32.partialorder %v916_v38, 0.0025  ;;  %1724 = vmatprep.subr.bf16.mxu1 %v1710_v52 }
 0x3a8   : > { %v2602_v40 = vsel %vm932_vm3, %v916_v38, 0.0 }
 0x3a9   : > { %967 = vadd.xlane.f32.xlu0 %v2602_v40  ;;  %1713 = vmatpush3.bf16.msra.mxu0 %v1710_v52 }
 0x3aa   : > { %1732 = vmatpush3.bf16.msra.mxu1 %v1710_v52  ;;  %1715 = vmatprep.subr.bf16.mxu0 %v1714_v62 }
 0x3ab   : > { %1725 = vmatprep.subr.bf16.mxu1 %v1714_v62 }
 0x3ad   : > { %v882_v43 = vpop.xlane.xlu1 %881  ;;  %1717 = vmatpush3.bf16.msra.mxu0 %v1714_v62 }
 0x3ae   : > { %1863 = vrcp.f32 %v882_v43  ;;  %1733 = vmatpush3.bf16.msra.mxu1 %v1714_v62 }
 0x3b1   : > { %v884_v47 = vpop.xlane.xlu1 %883 }
 0x3b2   : > { %1865 = vrcp.f32 %v884_v47  ;;  %v874_v26 = vpop.xlane.xlu0 %873 }
 0x3b3   : > { %1867 = vrcp.f32 %v874_v26 }
 0x3b5   : > { %v886_v42 = vpop.xlane.xlu1 %885 }
 0x3b6   : > { %1869 = vrcp.f32 %v886_v42  ;;  %v876_v53 = vpop.xlane.xlu0 %875 }
 0x3b7   : > { %1871 = vrcp.f32 %v876_v53 }
 0x3b8   : > { %v1864_v56 = vpop.eup %1863 }
 0x3b9   : > { %v888_v60 = vpop.xlane.xlu1 %887  ;;  %v921_v61 = vmul.f32 %v1864_v56, %v2548_v39 }
 0x3ba   : > { %1873 = vrcp.f32 %v888_v60  ;;  %v878_v1 = vpop.xlane.xlu0 %877 }
 0x3bb   : > { %1875 = vrcp.f32 %v878_v1  ;;  %vm937_vm4 = vcmp.gt.f32.partialorder %v921_v61, 0.0025 }
 0x3bc   : > { %v1866_v3 = vpop.eup %1865  ;;  %v2606_v4 = vsel %vm937_vm4, %v921_v61, 0.0 }
 0x3bd   : > { %v1868_v6 = vpop.eup %1867  ;;  %977 = vadd.xlane.f32.xlu1 %v2606_v4  ;;  %v890_v11 = vpop.xlane.xlu1 %889  ;;  %v922_v12 = vmul.f32 %v1866_v3, %v2553_v0 }
 0x3be   : > { %1877 = vrcp.f32 %v890_v11  ;;  %v880_v39 = vpop.xlane.xlu0 %879  ;;  %v917_v13 = vmul.f32 %v1868_v6, %v2555_v45 }
 0x3bf   : > { %1879 = vrcp.f32 %v880_v39  ;;  %vm938_vm5 = vcmp.gt.f32.partialorder %v922_v12, 0.0025 }
 0x3c0   : > { %v1870_v14 = vpop.eup %1869  ;;  %v2611_v15 = vsel %vm938_vm5, %v922_v12, 0.0  ;;  %vm933_vm6 = vcmp.gt.f32.partialorder %v917_v13, 0.0025 }
 0x3c1   : > { %v1872_v16 = vpop.eup %1871  ;;  %979 = vadd.xlane.f32.xlu1 %v2611_v15  ;;  %v892_v17 = vpop.xlane.xlu1 %891  ;;  %v2614_v18 = vsel %vm933_vm6, %v917_v13, 0.0  ;;  %v923_v19 = vmul.f32 %v1870_v14, %v2560_v59 }
 0x3c2   : > { %1881 = vrcp.f32 %v892_v17  ;;  %969 = vadd.xlane.f32.xlu0 %v2614_v18  ;;  %v918_v0 = vmul.f32 %v1872_v16, %v2562_v48 }
 0x3c3   : > { %vm939_vm7 = vcmp.gt.f32.partialorder %v923_v19, 0.0025 }
 0x3c4   : > { %v1874_v45 = vpop.eup %1873  ;;  %v2619_v20 = vsel %vm939_vm7, %v923_v19, 0.0  ;;  %vm934_vm8 = vcmp.gt.f32.partialorder %v918_v0, 0.0025 }
 0x3c5   : > { %v1876_v21 = vpop.eup %1875  ;;  %981 = vadd.xlane.f32.xlu1 %v2619_v20  ;;  %v894_v23 = vpop.xlane.xlu1 %893  ;;  %v2622_v27 = vsel %vm934_vm8, %v918_v0, 0.0  ;;  %v924_v28 = vmul.f32 %v1874_v45, %v2567_v63 }
 0x3c6   : > { %1883 = vrcp.f32 %v894_v23  ;;  %971 = vadd.xlane.f32.xlu0 %v2622_v27  ;;  %v919_v59 = vmul.f32 %v1876_v21, %v2569_v2 }
 0x3c7   : > { %vm940_vm9 = vcmp.gt.f32.partialorder %v924_v28, 0.0025 }
 0x3c8   : > { %v1878_v48 = vpop.eup %1877  ;;  %v2627_v29 = vsel %vm940_vm9, %v924_v28, 0.0  ;;  %vm935_vm10 = vcmp.gt.f32.partialorder %v919_v59, 0.0025 }
 0x3c9   : > { %v1880_v30 = vpop.eup %1879  ;;  %983 = vadd.xlane.f32.xlu1 %v2627_v29  ;;  %v896_v31 = vpop.xlane.xlu1 %895  ;;  %v2630_v32 = vsel %vm935_vm10, %v919_v59, 0.0  ;;  %v925_v54 = vmul.f32 %v1878_v48, %v2574_v5 }
 0x3ca   : > { %1885 = vrcp.f32 %v896_v31  ;;  %973 = vadd.xlane.f32.xlu0 %v2630_v32  ;;  %v920_v63 = vmul.f32 %v1880_v30, %v2576_v8 }
 0x3cb   : > { %vm941_vm11 = vcmp.gt.f32.partialorder %v925_v54, 0.0025 }
 0x3cc   : > { %v1882_v2 = vpop.eup %1881  ;;  %v2635_v33 = vsel %vm941_vm11, %v925_v54, 0.0  ;;  %vm936_vm12 = vcmp.gt.f32.partialorder %v920_v63, 0.0025 }
 0x3cd   : > { %985 = vadd.xlane.f32.xlu1 %v2635_v33  ;;  %v2638_v34 = vsel %vm936_vm12, %v920_v63, 0.0  ;;  %v926_v36 = vmul.f32 %v1882_v2, %v2580_v7 }
 0x3ce   : > { %975 = vadd.xlane.f32.xlu0 %v2638_v34 }
 0x3cf   : > { %vm942_vm13 = vcmp.gt.f32.partialorder %v926_v36, 0.0025 }
 0x3d0   : > { %v1884_v5 = vpop.eup %1883  ;;  %v2642_v37 = vsel %vm942_vm13, %v926_v36, 0.0 }
 0x3d1   : > { %987 = vadd.xlane.f32.xlu1 %v2642_v37  ;;  %v927_v8 = vmul.f32 %v1884_v5, %v2583_v9 }
 0x3d3   : > { %vm943_vm14 = vcmp.gt.f32.partialorder %v927_v8, 0.0025 }
 0x3d4   : > { %v1886_v38 = vpop.eup %1885  ;;  %v2646_v24 = vsel %vm943_vm14, %v927_v8, 0.0 }
 0x3d5   : > { %989 = vadd.xlane.f32.xlu1 %v2646_v24  ;;  %v928_v41 = vmul.f32 %v1886_v38, %v2586_v10 }
 0x3d7   : > { %vm944_vm15 = vcmp.gt.f32.partialorder %v928_v41, 0.0025 }
 0x3d8   : > { %v2650_v7 = vsel %vm944_vm15, %v928_v41, 0.0 }
 0x3d9   : > { %991 = vadd.xlane.f32.xlu1 %v2650_v7 }
 0x42a   : > { %v962_v43 = vpop.xlane.xlu0 %961 }
 0x42b   : > { %v993_v44 = vmax.f32 %v962_v43, 1e-12 }
 0x42d   : > { %1887 = vrcp.f32 %v993_v44 }
 0x42e   : > { %v964_v25 = vpop.xlane.xlu0 %963 }
 0x42f   : > { %v994_v46 = vmax.f32 %v964_v25, 1e-12 }
 0x431   : > { %1889 = vrcp.f32 %v994_v46 }
 0x432   : > { %v966_v9 = vpop.xlane.xlu0 %965 }
 0x433   : > { %v995_v47 = vmax.f32 %v966_v9, 1e-12 }
 0x435   : > { %1891 = vrcp.f32 %v995_v47 }
 0x436   : > { %v968_v49 = vpop.xlane.xlu0 %967 }
 0x437   : > { %v1888_v26 = vpop.eup %1887  ;;  %v996_v50 = vmax.f32 %v968_v49, 1e-12 }
 0x438   : > { %v1025_v10 = vmul.f32 %v1888_v26, %v2590_v55 }
 0x439   : > { %1893 = vrcp.f32 %v996_v50 }
 0x43a   : > { %1041 = vst [vmem:[%s2655_s29] sm:$0xff] %v1025_v10  ;;  %1598 = vmatprep.mubr.f32.mxu0 %v1025_v10 }
 0x43b   : > { %v1890_v51 = vpop.eup %1889 }
 0x43c   : > { %v1026_v42 = vmul.f32 %v1890_v51, %v2594_v35 }
 0x43e   : > { %1042 = vst [vmem:[%s2655_s29 + $0x8] sm:$0xff] %v1026_v42  ;;  %1599 = vmatmul.mubr.f32.vlgmr.msra.gmra.mrb[32].mxu0 %v1026_v42 }
 0x43f   : > { %v1892_v52 = vpop.eup %1891 }
 0x440   : > { %v1027_v53 = vmul.f32 %v1892_v52, %v2598_v22 }
 0x442   : > { %1043 = vst [vmem:[%s2655_s29 + $0x10] sm:$0xff] %v1027_v53  ;;  %1601 = vmatprep.mubr.f32.mxu0 %v1027_v53 }
 0x443   : > { %v1894_v55 = vpop.eup %1893 }
 0x444   : > { %v1028_v56 = vmul.f32 %v1894_v55, %v2602_v40 }
 0x446   : > { %1044 = vst [vmem:[%s2655_s29 + $0x18] sm:$0xff] %v1028_v56  ;;  %1602 = vmatmul.mubr.f32.gmra.mrb[34].mxu0 %v1028_v56 }
 0x44a   : > { %v978_v57 = vpop.xlane.xlu1 %977 }
 0x44b   : > { %v1001_v58 = vmax.f32 %v978_v57, 1e-12 }
 0x44d   : > { %1895 = vrcp.f32 %v1001_v58 }
 0x44e   : > { %v980_v60 = vpop.xlane.xlu1 %979 }
 0x44f   : > { %v1002_v61 = vmax.f32 %v980_v60, 1e-12  ;;  %v970_v62 = vpop.xlane.xlu0 %969 }
 0x450   : > { %v997_v1 = vmax.f32 %v970_v62, 1e-12 }
 0x451   : > { %1897 = vrcp.f32 %v1002_v61 }
 0x452   : > { %1899 = vrcp.f32 %v997_v1  ;;  %v982_v35 = vpop.xlane.xlu1 %981 }
 0x453   : > { %v1003_v3 = vmax.f32 %v982_v35, 1e-12  ;;  %v972_v22 = vpop.xlane.xlu0 %971 }
 0x454   : > { %v998_v6 = vmax.f32 %v972_v22, 1e-12 }
 0x455   : > { %1901 = vrcp.f32 %v1003_v3 }
 0x456   : > { %1903 = vrcp.f32 %v998_v6  ;;  %v984_v11 = vpop.xlane.xlu1 %983 }
 0x457   : > { %v1896_v40 = vpop.eup %1895  ;;  %v1004_v12 = vmax.f32 %v984_v11, 1e-12  ;;  %v974_v39 = vpop.xlane.xlu0 %973 }
 0x458   : > { %v999_v13 = vmax.f32 %v974_v39, 1e-12  ;;  %v1033_v14 = vmul.f32 %v1896_v40, %v2606_v4 }
 0x459   : > { %1905 = vrcp.f32 %v1004_v12 }
 0x45a   : > { %1907 = vrcp.f32 %v999_v13  ;;  %1049 = vst [vmem:[%s2655_s29 + $0x40] sm:$0xff] %v1033_v14  ;;  %1610 = vmatprep.mubr.f32.mxu1 %v1033_v14  ;;  %v986_v16 = vpop.xlane.xlu1 %985 }
 0x45b   : > { %v1898_v17 = vpop.eup %1897  ;;  %v1005_v19 = vmax.f32 %v986_v16, 1e-12  ;;  %v976_v0 = vpop.xlane.xlu0 %975 }
 0x45c   : > { %v1900_v45 = vpop.eup %1899  ;;  %v1000_v21 = vmax.f32 %v976_v0, 1e-12  ;;  %v1034_v23 = vmul.f32 %v1898_v17, %v2611_v15 }
 0x45d   : > { %1909 = vrcp.f32 %v1005_v19  ;;  %v1029_v28 = vmul.f32 %v1900_v45, %v2614_v18 }
 0x45e   : > { %1911 = vrcp.f32 %v1000_v21  ;;  %1050 = vst [vmem:[%s2655_s29 + $0x48] sm:$0xff] %v1034_v23  ;;  %1611 = vmatmul.mubr.f32.vlgmr.msra.gmra.mrb[32].mxu1 %v1034_v23  ;;  %v988_v4 = vpop.xlane.xlu1 %987 }
 0x45f   : > { %v1902_v59 = vpop.eup %1901  ;;  %v1006_v48 = vmax.f32 %v988_v4, 1e-12  ;;  %1045 = vst [vmem:[%s2655_s29 + $0x20] sm:$0xff] %v1029_v28  ;;  %1604 = vmatprep.mubr.f32.mxu0 %v1029_v28 }
 0x460   : > { %v1904_v30 = vpop.eup %1903  ;;  %v1035_v31 = vmul.f32 %v1902_v59, %v2619_v20 }
 0x461   : > { %1913 = vrcp.f32 %v1006_v48  ;;  %v1030_v54 = vmul.f32 %v1904_v30, %v2622_v27 }
 0x462   : > { %1051 = vst [vmem:[%s2655_s29 + $0x50] sm:$0xff] %v1035_v31  ;;  %1613 = vmatprep.mubr.f32.mxu1 %v1035_v31  ;;  %v990_v15 = vpop.xlane.xlu1 %989 }
 0x463   : > { %v1906_v18 = vpop.eup %1905  ;;  %v1007_v63 = vmax.f32 %v990_v15, 1e-12  ;;  %1046 = vst [vmem:[%s2655_s29 + $0x28] sm:$0xff] %v1030_v54  ;;  %1605 = vmatmul.mubr.f32.gmra.mrb[36].mxu0 %v1030_v54 }
 0x464   : > { %v1908_v2 = vpop.eup %1907  ;;  %v1036_v36 = vmul.f32 %v1906_v18, %v2627_v29 }
 0x465   : > { %1915 = vrcp.f32 %v1007_v63  ;;  %v1031_v5 = vmul.f32 %v1908_v2, %v2630_v32 }
 0x466   : > { %1052 = vst [vmem:[%s2655_s29 + $0x58] sm:$0xff] %v1036_v36  ;;  %1614 = vmatmul.mubr.f32.gmra.mrb[34].mxu1 %v1036_v36  ;;  %v992_v20 = vpop.xlane.xlu1 %991 }
 0x467   : > { %v1910_v27 = vpop.eup %1909  ;;  %v1008_v8 = vmax.f32 %v992_v20, 1e-12  ;;  %1047 = vst [vmem:[%s2655_s29 + $0x30] sm:$0xff] %v1031_v5  ;;  %1607 = vmatprep.mubr.f32.mxu0 %v1031_v5 }
 0x468   : > { %v1912_v38 = vpop.eup %1911  ;;  %v1037_v41 = vmul.f32 %v1910_v27, %v2635_v33 }
 0x469   : > { %1917 = vrcp.f32 %v1008_v8  ;;  %v1032_v29 = vmul.f32 %v1912_v38, %v2638_v34 }
 0x46a   : > { %1053 = vst [vmem:[%s2655_s29 + $0x60] sm:$0xff] %v1037_v41  ;;  %1616 = vmatprep.mubr.f32.mxu1 %v1037_v41 }
 0x46b   : > { %v1914_v32 = vpop.eup %1913  ;;  %1048 = vst [vmem:[%s2655_s29 + $0x38] sm:$0xff] %v1032_v29  ;;  %1608 = vmatmul.mubr.f32.gmra.mrb[38].mxu0 %v1032_v29 }
 0x46c   : > { %v1038_v43 = vmul.f32 %v1914_v32, %v2642_v37 }
 0x46e   : > { %1054 = vst [vmem:[%s2655_s29 + $0x68] sm:$0xff] %v1038_v43  ;;  %1617 = vmatmul.mubr.f32.gmra.mrb[36].mxu1 %v1038_v43 }
 0x46f   : > { %v1916_v44 = vpop.eup %1915 }
 0x470   : > { %v1039_v33 = vmul.f32 %v1916_v44, %v2646_v24 }
 0x472   : > { %1055 = vst [vmem:[%s2655_s29 + $0x70] sm:$0xff] %v1039_v33  ;;  %1619 = vmatprep.mubr.f32.mxu1 %v1039_v33 }
 0x473   : > { %v1918_v34 = vpop.eup %1917 }
 0x474   : > { %v1040_v25 = vmul.f32 %v1918_v34, %v2650_v7 }
 0x476   : > { %1056 = vst [vmem:[%s2655_s29 + $0x78] sm:$0xff] %v1040_v25  ;;  %1620 = vmatmul.mubr.f32.gmra.mrb[38].mxu1 %v1040_v25 }
 0x477   : > { %2046 = shalt.err (!%p2043_p4)
}
 0x478   : > { %s2047_s22 = scalar_lea.hbm %s2694_s8, 2048  ;;  %s2051_s29 = scalar_lea.hbm %s2810_s7, 4096 }
 0x479   : > { %p2048_p9 = scmp.ne.s32.totalorder %s2694_s8, %s2047_s22  ;;  %p2052_p8 = scmp.lt.u32.totalorder %s2694_s8, %s2810_s7 }
 0x47a   : > { %p2053_p13 = scmp.lt.u32.totalorder %s2051_s29, %s2047_s22  ;;  %p2055_p10 = scmp.lt.u32.totalorder %s2047_s22, %s2694_s8 }
 0x47b   : > { %p2049_p0 = pnand %p2048_p9, %p2342_p5 }
 0x47c   : > { %p2054_p6 = por %p2053_p13, %p2052_p8 }
 0x47d   : > { %p2050_p11 = pneg %p2049_p0 }
 0x47e   : > { %p2056_p3 = por %p2055_p10, %p2054_p6 }
 0x480   : > { %p2057_p7 = pnand %p2056_p3, %p2050_p11 }
 0x482   : > { %2060 = shalt.err (!%p2057_p7)
}
 0x483   : > { %s2151_s11 = smov 128   ;;  %s2152_s12 = smov 8   ;;  %v1442_v37 = vld [vmem:[%s2808_s5] ss:$0 sm:$0xff] }
 0x484   : > { %1749 = dma.vmem_to_hbm [thread:$0]  (%p2342_p5), %s2697_s23, 2048, %s2694_s8, %s1263_s16, %s2151_s11, %s2151_s11, %s2152_s12  }
 0x485   : > { %s2730_s22 = scalar_lea.vmem [#allocation10], %s2396_s21  ;;  %s2752_s16 = scalar_lea.hbm %s2809_s6, %s1452_s10 }
 0x486   : > { %s1276_s21 = sshll.u32 %s2730_s22, 4  ;;  %s1258_s30 = scalar_lea.sflag [#allocation4], %s2393_s20  ;;  %s2754_s21 = int_to_ptr.vmem [resolvable:$true] %s1276_s21 }
 0x487   : > { %s2061_s9 = scalar_lea.vmem %s2754_s21, 2048  ;;  %s2153_s29 = smov [#allocation10]  }
 0x488   : > { %p2062_p12 = scmp.ne.s32.totalorder %s2754_s21, %s2061_s9  ;;  %s2065_s28 = sshll.u32 %s2153_s29, 4  ;;  %s2066_s28 = int_to_ptr.vmem [resolvable:$false] %s2065_s28 }
 0x489   : > { %s2067_s17 = scalar_lea.vmem %s2066_s28, 4096  ;;  %p2068_p4 = scmp.lt.s32.totalorder %s2754_s21, %s2066_s28 }
 0x48a   : > { %p2063_p2 = pnand %p2062_p12, %p2342_p5  ;;  %p2069_p9 = scmp.lt.s32.totalorder %s2067_s17, %s2061_s9 }
 0x48c   : > { %p2064_p1 = pneg %p2063_p2  ;;  %p2070_p0 = por %p2069_p9, %p2068_p4 }
 0x48e   : > { %p2071_p11 = pnand %p2070_p0, %p2064_p1 }
 0x511   : > { %v1600_v24 = vpop.f32.mrb[32].mxu0 }
 0x512   : > { %v1152_v7 = vadd.f32 %v1600_v24, %v1442_v37  ;;  %v1146_v46 = vpop.f32.mrb[33].mxu0 }
 0x513   : > { %v1147_v9 = vadd.f32 %v1442_v37, %v1146_v46 }
 0x514   : > { %v1226_v47 = vmax.f32 %v1152_v7, 0.0 }
 0x515   : > { %v1225_v49 = vmax.f32 %v1147_v9, 0.0 }
 0x516   : > { %1242 = vst [vmem:[%s2730_s22 + $0x8] sm:$0xff] %v1226_v47 }
 0x517   : > { %1241 = vst [vmem:[%s2730_s22] sm:$0xff] %v1225_v49 }
 0x519   : > { %v1603_v26 = vpop.f32.mrb[34].mxu0 }
 0x51a   : > { %v1162_v50 = vadd.f32 %v1603_v26, %v1442_v37  ;;  %v1156_v10 = vpop.f32.mrb[35].mxu0 }
 0x51b   : > { %v1157_v51 = vadd.f32 %v1442_v37, %v1156_v10 }
 0x51c   : > { %v1228_v42 = vmax.f32 %v1162_v50, 0.0 }
 0x51d   : > { %v1227_v52 = vmax.f32 %v1157_v51, 0.0 }
 0x51e   : > { %1244 = vst [vmem:[%s2730_s22 + $0x18] sm:$0xff] %v1228_v42 }
 0x51f   : > { %1243 = vst [vmem:[%s2730_s22 + $0x10] sm:$0xff] %v1227_v52 }
 0x531   : > { %v1612_v53 = vpop.f32.mrb[32].mxu1 }
 0x532   : > { %v1192_v55 = vadd.f32 %v1612_v53, %v1442_v37  ;;  %v1186_v56 = vpop.f32.mrb[33].mxu1 }
 0x533   : > { %v1187_v57 = vadd.f32 %v1442_v37, %v1186_v56 }
 0x534   : > { %v1234_v58 = vmax.f32 %v1192_v55, 0.0 }
 0x535   : > { %v1233_v60 = vmax.f32 %v1187_v57, 0.0 }
 0x536   : > { %1250 = vst [vmem:[%s2730_s22 + $0x48] sm:$0xff] %v1234_v58  ;;  %v1606_v61 = vpop.f32.mrb[36].mxu0 }
 0x537   : > { %1249 = vst [vmem:[%s2730_s22 + $0x40] sm:$0xff] %v1233_v60  ;;  %v1172_v62 = vadd.f32 %v1606_v61, %v1442_v37  ;;  %v1166_v1 = vpop.f32.mrb[37].mxu0 }
 0x538   : > { %v1167_v35 = vadd.f32 %v1442_v37, %v1166_v1 }
 0x539   : > { %v1230_v3 = vmax.f32 %v1172_v62, 0.0  ;;  %v1615_v22 = vpop.f32.mrb[34].mxu1 }
 0x53a   : > { %v1229_v6 = vmax.f32 %v1167_v35, 0.0  ;;  %v1202_v11 = vadd.f32 %v1615_v22, %v1442_v37  ;;  %v1196_v40 = vpop.f32.mrb[35].mxu1 }
 0x53b   : > { %1246 = vst [vmem:[%s2730_s22 + $0x28] sm:$0xff] %v1230_v3  ;;  %v1197_v12 = vadd.f32 %v1442_v37, %v1196_v40 }
 0x53c   : > { %1245 = vst [vmem:[%s2730_s22 + $0x20] sm:$0xff] %v1229_v6  ;;  %v1236_v39 = vmax.f32 %v1202_v11, 0.0 }
 0x53d   : > { %v1235_v13 = vmax.f32 %v1197_v12, 0.0 }
 0x53e   : > { %1252 = vst [vmem:[%s2730_s22 + $0x58] sm:$0xff] %v1236_v39  ;;  %v1609_v14 = vpop.f32.mrb[38].mxu0 }
 0x53f   : > { %1251 = vst [vmem:[%s2730_s22 + $0x50] sm:$0xff] %v1235_v13  ;;  %v1182_v16 = vadd.f32 %v1609_v14, %v1442_v37  ;;  %v1176_v17 = vpop.f32.mrb[39].mxu0 }
 0x540   : > { %v1177_v19 = vadd.f32 %v1442_v37, %v1176_v17 }
 0x541   : > { %v1232_v0 = vmax.f32 %v1182_v16, 0.0  ;;  %v1618_v45 = vpop.f32.mrb[36].mxu1 }
 0x542   : > { %v1231_v21 = vmax.f32 %v1177_v19, 0.0  ;;  %v1212_v23 = vadd.f32 %v1618_v45, %v1442_v37  ;;  %v1206_v28 = vpop.f32.mrb[37].mxu1 }
 0x543   : > { %1248 = vst [vmem:[%s2730_s22 + $0x38] sm:$0xff] %v1232_v0  ;;  %v1207_v4 = vadd.f32 %v1442_v37, %v1206_v28 }
 0x544   : > { %1247 = vst [vmem:[%s2730_s22 + $0x30] sm:$0xff] %v1231_v21  ;;  %v1238_v59 = vmax.f32 %v1212_v23, 0.0 }
 0x545   : > { %v1237_v48 = vmax.f32 %v1207_v4, 0.0 }
 0x546   : > { %1254 = vst [vmem:[%s2730_s22 + $0x68] sm:$0xff] %v1238_v59 }
 0x547   : > { %1253 = vst [vmem:[%s2730_s22 + $0x60] sm:$0xff] %v1237_v48 }
 0x549   : > { %v1621_v30 = vpop.f32.mrb[38].mxu1 }
 0x54a   : > { %v1222_v31 = vadd.f32 %v1621_v30, %v1442_v37  ;;  %v1216_v54 = vpop.f32.mrb[39].mxu1 }
 0x54b   : > { %v1217_v15 = vadd.f32 %v1442_v37, %v1216_v54 }
 0x54c   : > { %v1240_v18 = vmax.f32 %v1222_v31, 0.0 }
 0x54d   : > { %v1239_v63 = vmax.f32 %v1217_v15, 0.0 }
 0x54e   : > { %1256 = vst [vmem:[%s2730_s22 + $0x78] sm:$0xff] %v1240_v18 }
 0x54f   : > { %1255 = vst [vmem:[%s2730_s22 + $0x70] sm:$0xff] %v1239_v63 }
 0x550   : > { %2074 = shalt.err (!%p2071_p11)
}
 0x551   : > { %s2075_s10 = scalar_lea.hbm %s2752_s16, 2048  ;;  %s2079_s1 = scalar_lea.hbm %s2809_s6, 4096 }
 0x552   : > { %p2076_p8 = scmp.ne.s32.totalorder %s2752_s16, %s2075_s10  ;;  %p2080_p10 = scmp.lt.u32.totalorder %s2752_s16, %s2809_s6 }
 0x553   : > { %p2081_p3 = scmp.lt.u32.totalorder %s2079_s1, %s2075_s10  ;;  %p2083_p12 = scmp.lt.u32.totalorder %s2075_s10, %s2752_s16 }
 0x554   : > { %p2077_p13 = pnand %p2076_p8, %p2342_p5 }
 0x555   : > { %p2082_p7 = por %p2081_p3, %p2080_p10 }
 0x556   : > { %p2078_p6 = pneg %p2077_p13 }
 0x557   : > { %p2084_p2 = por %p2083_p12, %p2082_p7 }
 0x559   : > { %p2085_p1 = pnand %p2084_p2, %p2078_p6 }
 0x55b   : > { %2088 = shalt.err (!%p2085_p1)
}
 0x55c   : > { %1748 = dma.vmem_to_hbm [thread:$0]  (%p2342_p5), %s2754_s21, 2048, %s2752_s16, %s1258_s30, %s2151_s11, %s2151_s11, %s2152_s12  }
 0x55d PF: > { %s2832_s23 = sld [smem:[#allocation18_spill]]  ;;  %s1307_s9 = sand.u32 1, %s2127_s24  }
 0x55e   : > { %p2834_p9 = scmp.ge.s32.totalorder %s2139_s27, 2  ;;  %s1308_s29 = scalar_lea.sflag [#allocation4], %s1307_s9 }
 0x563   : > { %p2833_p4 = scmp.ne.s32.totalorder %s2832_s23, 0 }
 0x565   : > { %p1767_p0 = pnand %p2834_p9, %p2833_p4 }
 0x567   : > { %2118 = dma.done.wait (!%p1767_p0), %s1308_s29, 2048  }
 0x568   : > { %2120 = vsyncadd (!%p1767_p0), %s1308_s29, 4294965248  ;;  %s1317_s15 = scalar_lea.sflag [#allocation12], %s1307_s9 }
 0x569   : > { %2122 = dma.done.wait (!%p1767_p0), %s1317_s15, 2048  }
 0x56a   : > { %2124 = vsyncadd (!%p1767_p0), %s1317_s15, 4294965248  ;;  %p26_p5 = scmp.ge.s32.totalorder %s2307_s18, 4   ;;  %s2835_s24 = smov %s2131_s25 }
 0x56b   : > { %s2836_s25 = smov %s2135_s26  ;;  %s2837_s26 = smov %s2338_s13 }
 0x56c   : > { %s2838_s27 = smov %s2307_s18  ;;  %28 = sbr.rel (!%p26_p5) target bundleno = 11 (0xb), region = 118 }
 0x573   :  { %1322 = vsyncpa [#allocation3], 1 }
 0x574   :  { %1324 = vsyncpa [#allocation3 + $0x1], 1 }
 0x575   :  { %1325 = vsyncpa [#allocation6], 1 }
 0x576   :  { %1326 = vsyncpa [#allocation9], 1 }
 0x577   :  { %1327 = vsyncpa [#allocation4], 1 }
 0x578   :  { %1329 = vsyncpa [#allocation4 + $0x1], 1 }
 0x579   :  { %1330 = vsyncpa [#allocation12], 1 }
 0x57a   :  { %1332 = vsyncpa [#allocation12 + $0x1], 1 }

// kernel: tpu_custom_call.1
= control target key start
LH: loop header
LB: loop body
LE: loop exit
PB: predicated region body
PF: predicated region fallthrough
CT: control target
= control target key end

     0   :  { %s2803_s0 = inlined_call_operand.hbm [shape: f32[256,128], index: 0, kind: input, shape index: {}]   ;;  %s2804_s1 = inlined_call_operand.hbm [shape: f32[128,256], index: 1, kind: input, shape index: {}]   ;;  %s2805_s2 = inlined_call_operand.vmem [shape: f32[1,256], index: 2, kind: input, shape index: {}]   ;;  %s2806_s3 = inlined_call_operand.hbm [shape: f32[256,128], index: 3, kind: input, shape index: {}]   ;;  %s2807_s4 = inlined_call_operand.hbm [shape: f32[128,128], index: 4, kind: input, shape index: {}]   ;;  %s2808_s5 = inlined_call_operand.vmem [shape: f32[1,128], index: 5, kind: input, shape index: {}]   ;;  %s2809_s6 = inlined_call_operand.hbm [shape: f32[256,128], index: 6, kind: output, shape index: {0}]   ;;  %s2810_s7 = inlined_call_operand.hbm [shape: f32[256,128], index: 7, kind: output, shape index: {1}]  }
   0x1   :  { %2815 = sst [smem:[#allocation19_spill]] %s2804_s1 }
   0x2   :  { %13 = vsyncpa [#allocation3], 0 }
   0x3   :  { %15 = vsyncpa [#allocation3 + $0x1], 0 }
   0x4   :  { %16 = vsyncpa [#allocation6], 0 }
   0x5   :  { %17 = vsyncpa [#allocation9], 0 }
   0x6   :  { %18 = vsyncpa [#allocation4], 0 }
   0x7   :  { %20 = vsyncpa [#allocation4 + $0x1], 0 }
   0x8   :  { %21 = vsyncpa [#allocation12], 0 }
   0x9   :  { %23 = vsyncpa [#allocation12 + $0x1], 0  ;;  %s2194_s24 = smov 0   ;;  %s2196_s25 = smov 0  }
   0xa   :  { %s2198_s26 = smov 0   ;;  %s2200_s27 = smov 0  }
   0xb LB: > { %s2215_s28 = sadd.s32 4294967295, %s2139_s27   ;;  %s1426_s29 = sadd.s32 4294967294, %s2139_s27   ;;  %s2139_s27 = sphi %s2200_s27, %s2838_s27   ;;  %s2135_s26 = sphi %s2198_s26, %s2837_s26   ;;  %s2131_s25 = sphi %s2196_s25, %s2836_s25   ;;  %s2127_s24 = sphi %s2194_s24, %s2835_s24  }
   0xc   : > { %p49_p0 = scmp.ne.s32.totalorder %s2131_s25, %s2127_s24  ;;  %p2811_p1 = scmp.eq.s32.totalorder %s2215_s28, 0 }
   0xd   : > { %p184_p3 = scmp.eq.s32.totalorder %s1426_s29, 1  ;;  %p1427_p5 = scmp.ge.s32.totalorder %s2139_s27, 1 }
   0xe   : > { %p2224_p4 = por %p2811_p1, %p49_p0  ;;  %p217_p7 = scmp.lt.s32.totalorder %s2139_s27, 3 }
   0xf   : > { %p2229_p6 = por %p184_p3, %p49_p0  ;;  %s2141_s10 = smov [#allocation5]  }
  0x10   : > { %s2816_s30 = scalar_select %p2224_p4, 1, 0 }
  0x11   : > { %s2817_s8 = scalar_select %p2229_p6, 1, 0 }
  0x12   : > { %p2234_p8 = pnand %p1427_p5, %p217_p7  ;;  %s229_s11 = sshll.u32 %s2141_s10, 4  ;;  %s2238_s11 = int_to_ptr.vmem [resolvable:$true] %s229_s11 }
  0x13   : > { %2818 = sst [smem:[#allocation18_spill]] %s2817_s8  ;;  %s2142_s13 = smov [#allocation7]  }
  0x14   : > { %s2819_s9 = scalar_select %p2234_p8, 1, 0 }
  0x15   : > { %p1752_p9 = pneg %p2234_p8  ;;  %s245_s14 = sshll.u32 %s2142_s13, 4  ;;  %s2249_s14 = int_to_ptr.vmem [resolvable:$true] %s245_s14 }
  0x16   : > { %s2821_s1 = sld [smem:[#allocation19_spill]] }
  0x17   : > { %p2245_p11 = pnand %p1752_p9, %p2811_p1 }
  0x19   : > { %p2259_p13 = pneg %p2245_p11 }
  0x1c   : > { %s1919_s17 = scalar_lea.hbm %s2821_s1, 4096 }
  0x1d   : > { %p1920_p12 = scmp.ne.s32.totalorder %s2821_s1, %s1919_s17  ;;  %p1926_p5 = scmp.lt.u32.totalorder %s1919_s17, %s2821_s1 }
  0x1f   : > { %p1922_p0 = pnand %p2259_p13, %p1920_p12 }
  0x21   : > { %p1923_p3 = pneg %p1922_p0 }
  0x23   : > { %p1928_p7 = pnand %p1926_p5, %p1923_p3 }
  0x25   : > { %1931 = shalt.err (!%p1928_p7)
}
  0x26   : > { %s1932_s23 = scalar_lea.vmem %s2238_s11, 4096  ;;  %p1940_p2 = scmp.lt.s32.totalorder %s2238_s11, %s2238_s11 }
  0x27   : > { %p1933_p9 = scmp.ne.s32.totalorder %s2238_s11, %s1932_s23  ;;  %p1941_p6 = scmp.lt.s32.totalorder %s1932_s23, %s1932_s23 }
  0x29   : > { %p1935_p10 = pnand %p1933_p9, %p2259_p13  ;;  %p1942_p12 = por %p1941_p6, %p1940_p2 }
  0x2b   : > { %p1936_p1 = pneg %p1935_p10 }
  0x2d   : > { %p1943_p0 = pnand %p1942_p12, %p1936_p1 }
  0x2f   : > { %1946 = shalt.err (!%p1943_p0)
}
  0x30   : > { %s2143_s29 = smov 256   ;;  %s2144_s10 = smov 16  }
  0x31   : > { %1755 = dma.hbm_to_vmem [thread:$0]  (!%p2245_p11), %s2821_s1, 4096, %s2238_s11, [#allocation6], %s2143_s29, %s2143_s29, %s2144_s10  }
  0x32   : > { %s1947_s18 = scalar_lea.hbm %s2806_s3, 4096 }
  0x33   : > { %p1948_p2 = scmp.ne.s32.totalorder %s2806_s3, %s1947_s18  ;;  %p1954_p10 = scmp.lt.u32.totalorder %s1947_s18, %s2806_s3 }
  0x35   : > { %p1950_p1 = pnand %p1948_p2, %p2259_p13 }
  0x37   : > { %p1951_p6 = pneg %p1950_p1 }
  0x39   : > { %p1956_p3 = pnand %p1954_p10, %p1951_p6 }
  0x3b   : > { %1959 = shalt.err (!%p1956_p3)
}
  0x3c   : > { %s1960_s11 = scalar_lea.vmem %s2249_s14, 4096  ;;  %p1968_p12 = scmp.lt.s32.totalorder %s2249_s14, %s2249_s14 }
  0x3d   : > { %p1961_p5 = scmp.ne.s32.totalorder %s2249_s14, %s1960_s11  ;;  %p1969_p0 = scmp.lt.s32.totalorder %s1960_s11, %s1960_s11 }
  0x3f   : > { %p1963_p7 = pnand %p1961_p5, %p2259_p13  ;;  %p1970_p2 = por %p1969_p0, %p1968_p12 }
  0x41   : > { %p1964_p9 = pneg %p1963_p7 }
  0x43   : > { %p1971_p1 = pnand %p1970_p2, %p1964_p9 }
  0x45   : > { %1974 = shalt.err (!%p1971_p1)
}
  0x46   : > { %s2145_s29 = smov 128   ;;  %s2146_s10 = smov 8  }
  0x47   : > { %1758 = dma.hbm_to_vmem [thread:$0]  (!%p2245_p11), %s2806_s3, 4096, %s2249_s14, [#allocation6], %s2145_s29, %s2145_s29, %s2146_s10  }
  0x48   : > { %s2147_s16 = smov [#allocation8]   ;;  %s2307_s18 = sadd.s32 1, %s2139_s27  }
  0x49   : > { %s258_s17 = sshll.u32 %s2147_s16, 4  ;;  %s1975_s22 = scalar_lea.hbm %s2807_s4, 2048  ;;  %s259_s17 = int_to_ptr.vmem [resolvable:$true] %s258_s17 }
  0x4a   : > { %p1976_p6 = scmp.ne.s32.totalorder %s2807_s4, %s1975_s22  ;;  %p1982_p5 = scmp.lt.u32.totalorder %s1975_s22, %s2807_s4 }
  0x4c   : > { %p1978_p10 = pnand %p1976_p6, %p2259_p13 }
  0x4e   : > { %p1979_p3 = pneg %p1978_p10 }
  0x50   : > { %p1984_p7 = pnand %p1982_p5, %p1979_p3 }
  0x52   : > { %1987 = shalt.err (!%p1984_p7)
}
  0x53   : > { %s1988_s14 = scalar_lea.vmem %s259_s17, 2048  ;;  %p1996_p2 = scmp.lt.s32.totalorder %s259_s17, %s259_s17 }
  0x54   : > { %p1989_p9 = scmp.ne.s32.totalorder %s259_s17, %s1988_s14  ;;  %p1997_p1 = scmp.lt.s32.totalorder %s1988_s14, %s1988_s14 }
  0x56   : > { %p1991_p12 = pnand %p1989_p9, %p2259_p13  ;;  %p1998_p4 = por %p1997_p1, %p1996_p2 }
  0x58   : > { %p1992_p0 = pneg %p1991_p12 }
  0x5a   : > { %p1999_p8 = pnand %p1998_p4, %p1992_p0 }
  0x5c   : > { %2002 = shalt.err (!%p1999_p8)
}
  0x5d   : > { %1761 = dma.hbm_to_vmem [thread:$0]  (!%p2245_p11), %s2807_s4, 2048, %s259_s17, [#allocation9], %s2145_s29, %s2145_s29, %s2146_s10  }
  0x5e   : > { %s33_s20 = ssub.s32 %s2139_s27, %s2307_s18  ;;  %s36_s12 = sadd.s32 1, %s2135_s26 }
  0x5f   : > { %p34_p4 = scmp.eq.s32.totalorder %s33_s20, 0  ;;  %p43_p8 = scmp.ne.s32.totalorder %s2135_s26, %s2131_s25 }
  0x60   : > { %p44_p13 = scmp.eq.s32.totalorder %s2139_s27, 0  ;;  %p1776_p6 = scmp.lt.s32.totalorder %s2139_s27, 2 }
  0x61   : > { %s2338_s13 = scalar_select %p34_p4, %s2135_s26, %s36_s12  }
  0x62   : > { %p45_p10 = por %p44_p13, %p43_p8  ;;  %p2823_p3 = scmp.eq.s32.totalorder %s2215_s28, 1 }
  0x63   : > { %s275_s16 = sand.u32 1, %s2135_s26   ;;  %s1451_s19 = sshll.u32 %s2139_s27, 11 }
  0x64   : > { %p2342_p5 = por %p2823_p3, %p43_p8  ;;  %s1432_s21 = sshll.u32 %s275_s16, 7 }
  0x65   : > { %s2351_s17 = scalar_lea.hbm %s2803_s0, %s1451_s19  ;;  %s279_s11 = scalar_lea.vmem [#allocation2], %s1432_s21 }
  0x66   : > { %s286_s14 = sshll.u32 %s279_s11, 4  ;;  %p2353_p11 = pnand %p1776_p6, %p45_p10  ;;  %s2357_s14 = int_to_ptr.vmem [resolvable:$true] %s286_s14 }
  0x67   : > { %s2359_s8 = scalar_lea.sflag [#allocation3], %s275_s16  ;;  %s2003_s20 = scalar_lea.hbm %s2351_s17, 2048 }
  0x68   : > { %p2004_p7 = scmp.ne.s32.totalorder %s2351_s17, %s2003_s20  ;;  %p2005_p9 = pneg %p2353_p11 }
  0x69   : > { %s2008_s21 = scalar_lea.hbm %s2803_s0, 4096  ;;  %p2009_p2 = scmp.lt.u32.totalorder %s2351_s17, %s2803_s0 }
  0x6a   : > { %p2006_p12 = pnand %p2005_p9, %p2004_p7  ;;  %p2010_p1 = scmp.lt.u32.totalorder %s2008_s21, %s2003_s20 }
  0x6b   : > { %p2012_p8 = scmp.lt.u32.totalorder %s2003_s20, %s2351_s17 }
  0x6c   : > { %p2007_p0 = pneg %p2006_p12  ;;  %p2011_p4 = por %p2010_p1, %p2009_p2 }
  0x6e   : > { %p2013_p13 = por %p2012_p8, %p2011_p4 }
  0x70   : > { %p2014_p6 = pnand %p2013_p13, %p2007_p0 }
  0x72   : > { %2017 = shalt.err (!%p2014_p6)
}
  0x73   : > { %s2018_s16 = scalar_lea.vmem %s2357_s14, 2048  ;;  %s2148_s11 = smov [#allocation2]  }
  0x74   : > { %p2019_p10 = scmp.ne.s32.totalorder %s2357_s14, %s2018_s16  ;;  %s2023_s12 = sshll.u32 %s2148_s11, 4  ;;  %s2024_s12 = int_to_ptr.vmem [resolvable:$false] %s2023_s12 }
  0x75   : > { %s2025_s19 = scalar_lea.vmem %s2024_s12, 4096  ;;  %p2026_p12 = scmp.lt.s32.totalorder %s2357_s14, %s2024_s12 }
  0x76   : > { %p2021_p3 = pnand %p2019_p10, %p2005_p9  ;;  %p2027_p2 = scmp.lt.s32.totalorder %s2025_s19, %s2018_s16 }
  0x78   : > { %p2022_p7 = pneg %p2021_p3  ;;  %p2028_p1 = por %p2027_p2, %p2026_p12 }
  0x7a   : > { %p2029_p4 = pnand %p2028_p1, %p2022_p7 }
  0x7c   : > { %2032 = shalt.err (!%p2029_p4)
}
  0x7d   : > { %1765 = dma.hbm_to_vmem [thread:$0]  (!%p2353_p11), %s2351_s17, 2048, %s2357_s14, %s2359_s8, %s2145_s29, %s2145_s29, %s2146_s10  }
  0x7e   : > { %p2826_p9 = scmp.ne.s32.totalorder %s2819_s9, 0 }
  0x7f   : > { %s2393_s20 = sand.u32 (!%p2826_p9), 1, %s2131_s25   ;;  %p2827_p0 = scmp.ne.s32.totalorder (!%p2826_p9), %s2816_s30, 0 }
  0x80   : > { %298 = sbr.rel (%p2826_p9) target bundleno = 1373 (0x55d), region = 44  ;;  %s2396_s21 = sshll.u32 (!%p2826_p9), %s2393_s20, 7 }
  0x81   : > { %s301_s1 = scalar_lea.sflag (!%p2826_p9), [#allocation3], %s2393_s20  ;;  %s2400_s22 = scalar_lea.vmem (!%p2826_p9), [#allocation2], %s2396_s21 }
  0x87   : > { %2106 = dma.done.wait (%p2827_p0), %s301_s1, 2048  }
  0x88   : > { %2108 = vsyncadd (%p2827_p0), %s301_s1, 4294965248  ;;  %p2828_p11 = scmp.eq.s32.totalorder %s2215_s28, 0 }
  0x8a   : > { %2110 = dma.done.wait (%p2828_p11), [#allocation6], 8192   ;;  %p2829_p8 = pmov %p2828_p11 }
  0x8c   : > { %2112 = vsyncadd (%p2829_p8), [#allocation6], 4294959104  ;;  %p2830_p13 = pmov %p2829_p8 }
  0x8d   : > { %p2831_p6 = pmov %p2829_p8 }
  0x8e   : > { %2114 = dma.done.wait (%p2830_p13), [#allocation9], 2048  }
  0x8f   : > { %2116 = vsyncadd (%p2831_p6), [#allocation9], 4294965248  ;;  %v2149_v0 = vmov 0.0   ;;  %v372_v1 = vld [vmem:[#allocation5 + $0x8] sm:$0xff]  ;;  %v374_v2 = vld [vmem:[#allocation5 + $0x18] sm:$0xff]  ;;  %s2655_s29 = scalar_lea.vmem [#allocation11], %s2396_s21 }
  0x90   : > { %511 = vmatprep.mubr.f32.mxu0 %v2149_v0  ;;  %v371_v3 = vld [vmem:[#allocation5] sm:$0xff]  ;;  %v1622_v4 = vpack.c.bf16 %v374_v2, %v372_v1  ;;  %v373_v5 = vld [vmem:[#allocation5 + $0x10] sm:$0xff]  ;;  %v376_v6 = vld [vmem:[#allocation5 + $0x28] sm:$0xff]  ;;  %s1452_s10 = sshll.u32 %s2215_s28, 11  ;;  %s1292_s23 = sshll.u32 %s2655_s29, 4  ;;  %s2697_s23 = int_to_ptr.vmem [resolvable:$true] %s1292_s23 }
  0x91   : > { %v378_v7 = vld [vmem:[#allocation5 + $0x38] sm:$0xff]  ;;  %v1624_v8 = vpack.c.bf16 %v373_v5, %v371_v3  ;;  %v375_v10 = vld [vmem:[#allocation5 + $0x20] sm:$0xff]  ;;  %v377_v11 = vld [vmem:[#allocation5 + $0x30] sm:$0xff]  ;;  %s2694_s8 = scalar_lea.hbm %s2810_s7, %s1452_s10  ;;  %s1263_s16 = scalar_lea.sflag [#allocation12], %s2393_s20 }
  0x92   : > { %v1626_v9 = vpack.c.bf16 %v378_v7, %v376_v6  ;;  %v380_v12 = vld [vmem:[#allocation5 + $0x48] sm:$0xff]  ;;  %1623 = vmatprep.subr.bf16.mxu0 %v1622_v4  ;;  %v382_v13 = vld [vmem:[#allocation5 + $0x58] sm:$0xff]  ;;  %v1628_v14 = vpack.c.bf16 %v377_v11, %v375_v10  ;;  %v379_v16 = vld [vmem:[#allocation5 + $0x40] sm:$0xff]  ;;  %s2033_s11 = scalar_lea.vmem %s2697_s23, 2048  ;;  %s2150_s12 = smov [#allocation11]  }
  0x93   : > { %1625 = vmatpush1.bf16.msra.mxu0 %v1624_v8  ;;  %v1630_v15 = vpack.c.bf16 %v382_v13, %v380_v12  ;;  %v381_v17 = vld [vmem:[#allocation5 + $0x50] sm:$0xff]  ;;  %v384_v18 = vld [vmem:[#allocation5 + $0x68] sm:$0xff]  ;;  %v386_v19 = vld [vmem:[#allocation5 + $0x78] sm:$0xff]  ;;  %p2034_p10 = scmp.ne.s32.totalorder %s2697_s23, %s2033_s11  ;;  %s2037_s19 = sshll.u32 %s2150_s12, 4  ;;  %s2038_s19 = int_to_ptr.vmem [resolvable:$false] %s2037_s19 }
  0x94   : > { %1627 = vmatprep.subr.bf16.mxu0 %v1626_v9  ;;  %v1632_v20 = vpack.c.bf16 %v381_v17, %v379_v16  ;;  %v1634_v21 = vpack.c.bf16 %v386_v19, %v384_v18  ;;  %v383_v22 = vld [vmem:[#allocation5 + $0x60] sm:$0xff]  ;;  %v385_v23 = vld [vmem:[#allocation5 + $0x70] sm:$0xff]  ;;  %v388_v24 = vld [vmem:[#allocation5 + $0x88] sm:$0xff]  ;;  %s2039_s1 = scalar_lea.vmem %s2038_s19, 4096  ;;  %p2040_p12 = scmp.lt.s32.totalorder %s2697_s23, %s2038_s19 }
  0x95   : > { %v390_v25 = vld [vmem:[#allocation5 + $0x98] sm:$0xff]  ;;  %v1636_v26 = vpack.c.bf16 %v385_v23, %v383_v22  ;;  %v387_v28 = vld [vmem:[#allocation5 + $0x80] sm:$0xff]  ;;  %v389_v29 = vld [vmem:[#allocation5 + $0x90] sm:$0xff]  ;;  %p2035_p3 = pnand %p2034_p10, %p2342_p5  ;;  %p2041_p2 = scmp.lt.s32.totalorder %s2039_s1, %s2033_s11 }
  0x96   : > { %v1638_v27 = vpack.c.bf16 %v390_v25, %v388_v24  ;;  %v392_v30 = vld [vmem:[#allocation5 + $0xa8] sm:$0xff]  ;;  %v394_v31 = vld [vmem:[#allocation5 + $0xb8] sm:$0xff]  ;;  %v391_v32 = vld [vmem:[#allocation5 + $0xa0] sm:$0xff]  ;;  %v1640_v34 = vpack.c.bf16 %v389_v29, %v387_v28 }
  0x97   : > { %1629 = vmatpush1.bf16.msra.mxu0 %v1628_v14  ;;  %v393_v33 = vld [vmem:[#allocation5 + $0xb0] sm:$0xff]  ;;  %v396_v35 = vld [vmem:[#allocation5 + $0xc8] sm:$0xff]  ;;  %v398_v36 = vld [vmem:[#allocation5 + $0xd8] sm:$0xff]  ;;  %v1642_v40 = vpack.c.bf16 %v394_v31, %v392_v30  ;;  %p2036_p7 = pneg %p2035_p3  ;;  %p2042_p1 = por %p2041_p2, %p2040_p12 }
  0x98   : > { %1631 = vmatprep.subr.bf16.mxu0 %v1630_v15  ;;  %v420_v37 = vld [vmem:[#allocation7 + $0x80] sm:$0xff]  ;;  %v421_v38 = vld [vmem:[#allocation7 + $0x88] sm:$0xff]  ;;  %v422_v43 = vld [vmem:[#allocation7 + $0x90] sm:$0xff]  ;;  %v1644_v51 = vpack.c.bf16 %v393_v33, %v391_v32  ;;  %v1646_v55 = vpack.c.bf16 %v398_v36, %v396_v35 }
  0x99   : > { %v404_v39 = vld [vmem:[#allocation7] sm:$0xff]  ;;  %v1654_v41 = vpack.c.bf16 %v421_v38, %v420_v37  ;;  %v405_v42 = vld [vmem:[#allocation7 + $0x8] sm:$0xff]  ;;  %v423_v44 = vld [vmem:[#allocation7 + $0x98] sm:$0xff]  ;;  %p2043_p4 = pnand %p2042_p1, %p2036_p7 }
  0x9a   : > { %v1656_v45 = vpack.c.bf16 %v405_v42, %v404_v39  ;;  %v1658_v46 = vpack.c.bf16 %v423_v44, %v422_v43  ;;  %v406_v47 = vld [vmem:[#allocation7 + $0x10] sm:$0xff]  ;;  %v407_v48 = vld [vmem:[#allocation7 + $0x18] sm:$0xff]  ;;  %v424_v49 = vld [vmem:[#allocation7 + $0xa0] sm:$0xff] }
  0x9b   : > { %1633 = vmatpush1.bf16.msra.mxu0 %v1632_v20  ;;  %1655 = vmatprep.subr.bf16.mxu1 %v1654_v41  ;;  %v425_v50 = vld [vmem:[#allocation7 + $0xa8] sm:$0xff]  ;;  %v395_v52 = vld [vmem:[#allocation5 + $0xc0] sm:$0xff]  ;;  %v397_v53 = vld [vmem:[#allocation5 + $0xd0] sm:$0xff]  ;;  %v1660_v54 = vpack.c.bf16 %v407_v48, %v406_v47 }
  0x9c   : > { %1635 = vmatprep.subr.bf16.mxu0 %v1634_v21  ;;  %1657 = vmatpush3.bf16.msra.mxu1 %v1656_v45  ;;  %v400_v56 = vld [vmem:[#allocation5 + $0xe8] sm:$0xff]  ;;  %v1662_v57 = vpack.c.bf16 %v425_v50, %v424_v49  ;;  %v408_v58 = vld [vmem:[#allocation7 + $0x20] sm:$0xff]  ;;  %v402_v60 = vld [vmem:[#allocation5 + $0xf8] sm:$0xff]  ;;  %v1648_v63 = vpack.c.bf16 %v397_v53, %v395_v52  ;;  %v437_v50 = vlaneseq }
  0x9d   : > { %1659 = vmatprep.subr.bf16.mxu1 %v1658_v46  ;;  %v409_v59 = vld [vmem:[#allocation7 + $0x28] sm:$0xff]  ;;  %v426_v61 = vld [vmem:[#allocation7 + $0xb0] sm:$0xff]  ;;  %v427_v62 = vld [vmem:[#allocation7 + $0xb8] sm:$0xff]  ;;  %v1650_v3 = vpack.c.bf16 %v402_v60, %v400_v56 }
  0x9e   : > { %v399_v1 = vld [vmem:[#allocation5 + $0xe0] sm:$0xff]  ;;  %v1664_v2 = vpack.c.bf16 %v409_v59, %v408_v58  ;;  %v401_v4 = vld [vmem:[#allocation5 + $0xf0] sm:$0xff]  ;;  %v1666_v5 = vpack.c.bf16 %v427_v62, %v426_v61  ;;  %v411_v7 = vld [vmem:[#allocation7 + $0x38] sm:$0xff] }
  0x9f   : > { %1637 = vmatpush1.bf16.msra.mxu0 %v1636_v26  ;;  %v410_v6 = vld [vmem:[#allocation7 + $0x30] sm:$0xff]  ;;  %v428_v8 = vld [vmem:[#allocation7 + $0xc0] sm:$0xff]  ;;  %v429_v9 = vld [vmem:[#allocation7 + $0xc8] sm:$0xff]  ;;  %v1652_v10 = vpack.c.bf16 %v401_v4, %v399_v1 }
  0xa0   : > { %1639 = vmatprep.subr.bf16.mxu0 %v1638_v27  ;;  %1661 = vmatpush3.bf16.msra.mxu1 %v1660_v54  ;;  %v1668_v11 = vpack.c.bf16 %v411_v7, %v410_v6  ;;  %v1670_v12 = vpack.c.bf16 %v429_v9, %v428_v8  ;;  %v412_v13 = vld [vmem:[#allocation7 + $0x40] sm:$0xff]  ;;  %v413_v14 = vld [vmem:[#allocation7 + $0x48] sm:$0xff]  ;;  %v430_v15 = vld [vmem:[#allocation7 + $0xd0] sm:$0xff] }
  0xa1   : > { %1663 = vmatprep.subr.bf16.mxu1 %v1662_v57  ;;  %v431_v16 = vld [vmem:[#allocation7 + $0xd8] sm:$0xff]  ;;  %v355_v17 = vld [vmem:[%s2400_s22] sm:$0xff]  ;;  %v1672_v18 = vpack.c.bf16 %v413_v14, %v412_v13  ;;  %v414_v20 = vld [vmem:[#allocation7 + $0x50] sm:$0xff] }
  0xa2   : > { %v1674_v19 = vpack.c.bf16 %v431_v16, %v430_v15  ;;  %v415_v21 = vld [vmem:[#allocation7 + $0x58] sm:$0xff]  ;;  %v432_v22 = vld [vmem:[#allocation7 + $0xe0] sm:$0xff]  ;;  %v433_v23 = vld [vmem:[#allocation7 + $0xe8] sm:$0xff] }
  0xa3   : > { %1641 = vmatpush1.bf16.msra.mxu0 %v1640_v34  ;;  %v356_v24 = vld [vmem:[%s2400_s22 + $0x8] sm:$0xff]  ;;  %v1676_v25 = vpack.c.bf16 %v415_v21, %v414_v20  ;;  %v1678_v26 = vpack.c.bf16 %v433_v23, %v432_v22  ;;  %v357_v27 = vld [vmem:[%s2400_s22 + $0x10] sm:$0xff]  ;;  %v358_v28 = vld [vmem:[%s2400_s22 + $0x18] sm:$0xff] }
  0xa4   : > { %1643 = vmatprep.subr.bf16.mxu0 %v1642_v40  ;;  %1665 = vmatpush3.bf16.msra.mxu1 %v1664_v2  ;;  %v359_v29 = vld [vmem:[%s2400_s22 + $0x20] sm:$0xff]  ;;  %v360_v30 = vld [vmem:[%s2400_s22 + $0x28] sm:$0xff]  ;;  %v361_v31 = vld [vmem:[%s2400_s22 + $0x30] sm:$0xff] }
  0xa5   : > { %1667 = vmatprep.subr.bf16.mxu1 %v1666_v5  ;;  %v362_v32 = vld [vmem:[%s2400_s22 + $0x38] sm:$0xff]  ;;  %v363_v33 = vld [vmem:[%s2400_s22 + $0x40] sm:$0xff]  ;;  %v364_v34 = vld [vmem:[%s2400_s22 + $0x48] sm:$0xff] }
  0xa6   : > { %v365_v35 = vld [vmem:[%s2400_s22 + $0x50] sm:$0xff]  ;;  %v366_v36 = vld [vmem:[%s2400_s22 + $0x58] sm:$0xff]  ;;  %v367_v37 = vld [vmem:[%s2400_s22 + $0x60] sm:$0xff] }
  0xa7   : > { %1645 = vmatpush1.bf16.msra.mxu0 %v1644_v51  ;;  %v368_v38 = vld [vmem:[%s2400_s22 + $0x68] sm:$0xff]  ;;  %v369_v39 = vld [vmem:[%s2400_s22 + $0x70] sm:$0xff]  ;;  %v370_v40 = vld [vmem:[%s2400_s22 + $0x78] sm:$0xff]  ;;  %v438_v51 = vshrl.u32 %v437_v50, 7 }
  0xa8   : > { %1647 = vmatprep.subr.bf16.mxu0 %v1646_v55  ;;  %1669 = vmatpush3.bf16.msra.mxu1 %v1668_v11  ;;  %v416_v41 = vld [vmem:[#allocation7 + $0x60] sm:$0xff]  ;;  %v417_v42 = vld [vmem:[#allocation7 + $0x68] sm:$0xff]  ;;  %v434_v44 = vld [vmem:[#allocation7 + $0xf0] sm:$0xff] }
  0xa9   : > { %1671 = vmatprep.subr.bf16.mxu1 %v1670_v12  ;;  %v1680_v43 = vpack.c.bf16 %v417_v42, %v416_v41  ;;  %v435_v45 = vld [vmem:[#allocation7 + $0xf8] sm:$0xff]  ;;  %v418_v47 = vld [vmem:[#allocation7 + $0x70] sm:$0xff]  ;;  %v439_v52 = vsub.s32 0, %v438_v51  ;;  %v443_v53 = vsub.s32 1, %v438_v51 }
  0xaa   : > { %v1682_v46 = vpack.c.bf16 %v435_v45, %v434_v44  ;;  %v419_v48 = vld [vmem:[#allocation7 + $0x78] sm:$0xff] }
  0xab   : > { %1649 = vmatpush1.bf16.msra.mxu0 %v1648_v63  ;;  %v1684_v49 = vpack.c.bf16 %v419_v48, %v418_v47 }
  0xac   : > { %1651 = vmatprep.subr.bf16.mxu0 %v1650_v3  ;;  %1673 = vmatpush3.bf16.msra.mxu1 %v1672_v18 }
  0xad   : > { %1675 = vmatprep.subr.bf16.mxu1 %v1674_v19 }
  0xaf   : > { %1653 = vmatpush1.bf16.msra.mxu0 %v1652_v10 }
  0xb0   : > { %1677 = vmatpush3.bf16.msra.mxu1 %v1676_v25 }
  0xb1   : > { %1679 = vmatprep.subr.bf16.mxu1 %v1678_v26 }
  0xb2   : > { %512 = vmatmul.mubr.f32.vlgmr.msra.gmra.mrb[0].mxu0 %v355_v17 }
  0xb3   : > { %517 = vmatprep.mubr.f32.mxu0 %v2149_v0 }
  0xb4   : > { %1681 = vmatpush3.bf16.msra.mxu1 %v1680_v43 }
  0xb5   : > { %1683 = vmatprep.subr.bf16.mxu1 %v1682_v46 }
  0xb6   : > { %518 = vmatmul.mubr.f32.gmra.mrb[2].mxu0 %v356_v24 }
  0xb7   : > { %523 = vmatprep.mubr.f32.mxu0 %v2149_v0 }
  0xb8   : > { %1685 = vmatpush3.bf16.msra.mxu1 %v1684_v49 }
  0xba   : > { %524 = vmatmul.mubr.f32.gmra.mrb[4].mxu0 %v357_v27 }
  0xbb   : > { %529 = vmatprep.mubr.f32.mxu0 %v2149_v0 }
  0xbe   : > { %530 = vmatmul.mubr.f32.gmra.mrb[6].mxu0 %v358_v28 }
  0xbf   : > { %535 = vmatprep.mubr.f32.mxu0 %v2149_v0 }
  0xc2   : > { %536 = vmatmul.mubr.f32.gmra.mrb[8].mxu0 %v359_v29 }
  0xc3   : > { %541 = vmatprep.mubr.f32.mxu0 %v2149_v0 }
  0xc6   : > { %542 = vmatmul.mubr.f32.gmra.mrb[10].mxu0 %v360_v30 }
  0xc7   : > { %547 = vmatprep.mubr.f32.mxu0 %v2149_v0 }
  0xca   : > { %548 = vmatmul.mubr.f32.gmra.mrb[12].mxu0 %v361_v31 }
  0xcb   : > { %553 = vmatprep.mubr.f32.mxu0 %v2149_v0 }
  0xce   : > { %554 = vmatmul.mubr.f32.gmra.mrb[14].mxu0 %v362_v32 }
  0xcf   : > { %559 = vmatprep.mubr.f32.mxu0 %v2149_v0 }
  0xd2   : > { %560 = vmatmul.mubr.f32.gmra.mrb[16].mxu0 %v363_v33 }
  0xd3   : > { %565 = vmatprep.mubr.f32.mxu0 %v2149_v0 }
  0xd6   : > { %566 = vmatmul.mubr.f32.gmra.mrb[18].mxu0 %v364_v34 }
  0xd7   : > { %571 = vmatprep.mubr.f32.mxu0 %v2149_v0 }
  0xda   : > { %572 = vmatmul.mubr.f32.gmra.mrb[20].mxu0 %v365_v35 }
  0xdb   : > { %577 = vmatprep.mubr.f32.mxu0 %v2149_v0 }
  0xde   : > { %578 = vmatmul.mubr.f32.gmra.mrb[22].mxu0 %v366_v36 }
  0xdf   : > { %583 = vmatprep.mubr.f32.mxu0 %v2149_v0 }
  0xe2   : > { %584 = vmatmul.mubr.f32.gmra.mrb[24].mxu0 %v367_v37 }
  0xe3   : > { %589 = vmatprep.mubr.f32.mxu0 %v2149_v0 }
  0xe6   : > { %590 = vmatmul.mubr.f32.gmra.mrb[26].mxu0 %v368_v38 }
  0xe7   : > { %595 = vmatprep.mubr.f32.mxu0 %v2149_v0 }
  0xea   : > { %596 = vmatmul.mubr.f32.gmra.mrb[28].mxu0 %v369_v39 }
  0xeb   : > { %601 = vmatprep.mubr.f32.mxu0 %v2149_v0  ;;  %v403_v0 = vld [vmem:[%s2805_s2] sm:$0x3] }
  0xec   : > { %v2449_v54 = vrot.slane %v403_v0, %v439_v52  ;;  %v2451_v55 = vrot.slane %v403_v0, %v443_v53 }
  0xee   : > { %602 = vmatmul.mubr.f32.gmra.mrb[30].mxu0 %v370_v40 }
 0x185   : > { %v513_v56 = vpop.f32.mrb[0].mxu0 }
 0x186   : > { %v514_v57 = vadd.f32 %v513_v56, %v2449_v54  ;;  %v515_v58 = vpop.f32.mrb[1].mxu0 }
 0x187   : > { %v516_v59 = vadd.f32 %v515_v58, %v2451_v55 }
 0x188   : > { %v608_v62 = vmax.f32 %v514_v57, 0.0 }
 0x189   : > { %v519_v60 = vpop.f32.mrb[2].mxu0  ;;  %v609_v61 = vmax.f32 %v516_v59, 0.0 }
 0x18a   : > { %v520_v63 = vadd.f32 %v519_v60, %v2449_v54  ;;  %v521_v1 = vpop.f32.mrb[3].mxu0 }
 0x18b   : > { %v522_v2 = vadd.f32 %v521_v1, %v2451_v55  ;;  %704 = vmatprep.mubr.f32.mxu1 %v609_v61 }
 0x18c   : > { %705 = vmatmul.mubr.f32.vlgmr.msra.gmra.mrb[0].mxu1 %v608_v62  ;;  %v610_v5 = vmax.f32 %v520_v63, 0.0 }
 0x18d   : > { %v611_v3 = vmax.f32 %v522_v2, 0.0  ;;  %v525_v4 = vpop.f32.mrb[4].mxu0 }
 0x18e   : > { %v526_v6 = vadd.f32 %v525_v4, %v2449_v54  ;;  %v527_v7 = vpop.f32.mrb[5].mxu0 }
 0x18f   : > { %v528_v8 = vadd.f32 %v527_v7, %v2451_v55  ;;  %709 = vmatprep.mubr.f32.mxu1 %v611_v3 }
 0x190   : > { %710 = vmatmul.mubr.f32.gmra.mrb[2].mxu1 %v610_v5  ;;  %v612_v11 = vmax.f32 %v526_v6, 0.0 }
 0x191   : > { %v613_v9 = vmax.f32 %v528_v8, 0.0  ;;  %v531_v10 = vpop.f32.mrb[6].mxu0 }
 0x192   : > { %v532_v12 = vadd.f32 %v531_v10, %v2449_v54  ;;  %v533_v13 = vpop.f32.mrb[7].mxu0 }
 0x193   : > { %v534_v14 = vadd.f32 %v533_v13, %v2451_v55  ;;  %714 = vmatprep.mubr.f32.mxu1 %v613_v9 }
 0x194   : > { %715 = vmatmul.mubr.f32.gmra.mrb[4].mxu1 %v612_v11  ;;  %v614_v17 = vmax.f32 %v532_v12, 0.0 }
 0x195   : > { %v615_v15 = vmax.f32 %v534_v14, 0.0  ;;  %v537_v16 = vpop.f32.mrb[8].mxu0 }
 0x196   : > { %v538_v18 = vadd.f32 %v537_v16, %v2449_v54  ;;  %v539_v19 = vpop.f32.mrb[9].mxu0 }
 0x197   : > { %v540_v20 = vadd.f32 %v539_v19, %v2451_v55  ;;  %719 = vmatprep.mubr.f32.mxu1 %v615_v15 }
 0x198   : > { %720 = vmatmul.mubr.f32.gmra.mrb[6].mxu1 %v614_v17  ;;  %v616_v23 = vmax.f32 %v538_v18, 0.0 }
 0x199   : > { %v617_v21 = vmax.f32 %v540_v20, 0.0  ;;  %v543_v22 = vpop.f32.mrb[10].mxu0 }
 0x19a   : > { %v544_v24 = vadd.f32 %v543_v22, %v2449_v54  ;;  %v545_v25 = vpop.f32.mrb[11].mxu0 }
 0x19b   : > { %v546_v26 = vadd.f32 %v545_v25, %v2451_v55  ;;  %724 = vmatprep.mubr.f32.mxu1 %v617_v21 }
 0x19c   : > { %725 = vmatmul.mubr.f32.gmra.mrb[8].mxu1 %v616_v23  ;;  %v618_v29 = vmax.f32 %v544_v24, 0.0 }
 0x19d   : > { %v619_v27 = vmax.f32 %v546_v26, 0.0  ;;  %v549_v28 = vpop.f32.mrb[12].mxu0 }
 0x19e   : > { %v550_v30 = vadd.f32 %v549_v28, %v2449_v54  ;;  %v551_v31 = vpop.f32.mrb[13].mxu0 }
 0x19f   : > { %v552_v32 = vadd.f32 %v551_v31, %v2451_v55  ;;  %729 = vmatprep.mubr.f32.mxu1 %v619_v27 }
 0x1a0   : > { %730 = vmatmul.mubr.f32.gmra.mrb[10].mxu1 %v618_v29  ;;  %v620_v35 = vmax.f32 %v550_v30, 0.0 }
 0x1a1   : > { %v621_v33 = vmax.f32 %v552_v32, 0.0  ;;  %v555_v34 = vpop.f32.mrb[14].mxu0 }
 0x1a2   : > { %v556_v36 = vadd.f32 %v555_v34, %v2449_v54  ;;  %v557_v37 = vpop.f32.mrb[15].mxu0 }
 0x1a3   : > { %v558_v38 = vadd.f32 %v557_v37, %v2451_v55  ;;  %734 = vmatprep.mubr.f32.mxu1 %v621_v33 }
 0x1a4   : > { %735 = vmatmul.mubr.f32.gmra.mrb[12].mxu1 %v620_v35  ;;  %v622_v41 = vmax.f32 %v556_v36, 0.0 }
 0x1a5   : > { %v623_v39 = vmax.f32 %v558_v38, 0.0  ;;  %v561_v40 = vpop.f32.mrb[16].mxu0 }
 0x1a6   : > { %v562_v42 = vadd.f32 %v561_v40, %v2449_v54  ;;  %v563_v43 = vpop.f32.mrb[17].mxu0 }
 0x1a7   : > { %v564_v44 = vadd.f32 %v563_v43, %v2451_v55  ;;  %739 = vmatprep.mubr.f32.mxu1 %v623_v39 }
 0x1a8   : > { %740 = vmatmul.mubr.f32.gmra.mrb[14].mxu1 %v622_v41  ;;  %v624_v47 = vmax.f32 %v562_v42, 0.0 }
 0x1a9   : > { %v625_v45 = vmax.f32 %v564_v44, 0.0  ;;  %v567_v46 = vpop.f32.mrb[18].mxu0 }
 0x1aa   : > { %v568_v48 = vadd.f32 %v567_v46, %v2449_v54  ;;  %v569_v49 = vpop.f32.mrb[19].mxu0 }
 0x1ab   : > { %v570_v50 = vadd.f32 %v569_v49, %v2451_v55  ;;  %744 = vmatprep.mubr.f32.mxu1 %v625_v45 }
 0x1ac   : > { %745 = vmatmul.mubr.f32.gmra.mrb[16].mxu1 %v624_v47  ;;  %v626_v0 = vmax.f32 %v568_v48, 0.0 }
 0x1ad   : > { %v627_v51 = vmax.f32 %v570_v50, 0.0  ;;  %v573_v52 = vpop.f32.mrb[20].mxu0 }
 0x1ae   : > { %v574_v53 = vadd.f32 %v573_v52, %v2449_v54  ;;  %v575_v56 = vpop.f32.mrb[21].mxu0 }
 0x1af   : > { %v576_v57 = vadd.f32 %v575_v56, %v2451_v55  ;;  %749 = vmatprep.mubr.f32.mxu1 %v627_v51 }
 0x1b0   : > { %750 = vmatmul.mubr.f32.gmra.mrb[18].mxu1 %v626_v0  ;;  %v628_v60 = vmax.f32 %v574_v53, 0.0 }
 0x1b1   : > { %v629_v58 = vmax.f32 %v576_v57, 0.0  ;;  %v579_v59 = vpop.f32.mrb[22].mxu0 }
 0x1b2   : > { %v580_v61 = vadd.f32 %v579_v59, %v2449_v54  ;;  %v581_v62 = vpop.f32.mrb[23].mxu0 }
 0x1b3   : > { %v582_v63 = vadd.f32 %v581_v62, %v2451_v55  ;;  %754 = vmatprep.mubr.f32.mxu1 %v629_v58 }
 0x1b4   : > { %755 = vmatmul.mubr.f32.gmra.mrb[20].mxu1 %v628_v60  ;;  %v630_v3 = vmax.f32 %v580_v61, 0.0 }
 0x1b5   : > { %v631_v1 = vmax.f32 %v582_v63, 0.0  ;;  %v585_v2 = vpop.f32.mrb[24].mxu0 }
 0x1b6   : > { %v586_v4 = vadd.f32 %v585_v2, %v2449_v54  ;;  %v587_v5 = vpop.f32.mrb[25].mxu0 }
 0x1b7   : > { %v588_v6 = vadd.f32 %v587_v5, %v2451_v55  ;;  %759 = vmatprep.mubr.f32.mxu1 %v631_v1 }
 0x1b8   : > { %760 = vmatmul.mubr.f32.gmra.mrb[22].mxu1 %v630_v3  ;;  %v632_v9 = vmax.f32 %v586_v4, 0.0 }
 0x1b9   : > { %v633_v7 = vmax.f32 %v588_v6, 0.0  ;;  %v591_v8 = vpop.f32.mrb[26].mxu0 }
 0x1ba   : > { %v592_v10 = vadd.f32 %v591_v8, %v2449_v54  ;;  %v593_v11 = vpop.f32.mrb[27].mxu0 }
 0x1bb   : > { %v594_v12 = vadd.f32 %v593_v11, %v2451_v55  ;;  %764 = vmatprep.mubr.f32.mxu1 %v633_v7 }
 0x1bc   : > { %765 = vmatmul.mubr.f32.gmra.mrb[24].mxu1 %v632_v9  ;;  %v634_v15 = vmax.f32 %v592_v10, 0.0 }
 0x1bd   : > { %v635_v13 = vmax.f32 %v594_v12, 0.0  ;;  %v597_v14 = vpop.f32.mrb[28].mxu0 }
 0x1be   : > { %v598_v16 = vadd.f32 %v597_v14, %v2449_v54  ;;  %v599_v17 = vpop.f32.mrb[29].mxu0 }
 0x1bf   : > { %v600_v18 = vadd.f32 %v599_v17, %v2451_v55  ;;  %769 = vmatprep.mubr.f32.mxu1 %v635_v13 }
 0x1c0   : > { %770 = vmatmul.mubr.f32.gmra.mrb[26].mxu1 %v634_v15  ;;  %v636_v21 = vmax.f32 %v598_v16, 0.0 }
 0x1c1   : > { %v637_v19 = vmax.f32 %v600_v18, 0.0  ;;  %v603_v20 = vpop.f32.mrb[30].mxu0 }
 0x1c2   : > { %v604_v22 = vadd.f32 %v603_v20, %v2449_v54  ;;  %v605_v23 = vpop.f32.mrb[31].mxu0 }
 0x1c3   : > { %v606_v24 = vadd.f32 %v605_v23, %v2451_v55  ;;  %774 = vmatprep.mubr.f32.mxu1 %v637_v19 }
 0x1c4   : > { %775 = vmatmul.mubr.f32.gmra.mrb[28].mxu1 %v636_v21  ;;  %v638_v26 = vmax.f32 %v604_v22, 0.0 }
 0x1c5   : > { %v639_v25 = vmax.f32 %v606_v24, 0.0 }
 0x1c7   : > { %779 = vmatprep.mubr.f32.mxu1 %v639_v25 }
 0x1c8   : > { %780 = vmatmul.mubr.f32.gmra.mrb[30].mxu1 %v638_v26 }
 0x25f   : > { %v1486_v27 = vpop.f32.mrb[0].mxu1 }
 0x260   : > { %v1487_v28 = vpop.f32.mrb[1].mxu1 }
 0x261   : > { %v2485_v29 = vadd.f32 %v1487_v28, %v1486_v27 }
 0x263   : > { %v1489_v30 = vpop.f32.mrb[2].mxu1  ;;  %785 = vmax.xlane.f32.xlu0 %v2485_v29 }
 0x264   : > { %v1490_v31 = vpop.f32.mrb[3].mxu1 }
 0x265   : > { %v2488_v32 = vadd.f32 %v1490_v31, %v1489_v30 }
 0x267   : > { %v1492_v54 = vpop.f32.mrb[4].mxu1  ;;  %787 = vmax.xlane.f32.xlu1 %v2488_v32 }
 0x268   : > { %v1493_v55 = vpop.f32.mrb[5].mxu1 }
 0x269   : > { %v2491_v33 = vadd.f32 %v1493_v55, %v1492_v54 }
 0x26b   : > { %v1495_v34 = vpop.f32.mrb[6].mxu1  ;;  %789 = vmax.xlane.f32.xlu0 %v2491_v33 }
 0x26c   : > { %v1496_v35 = vpop.f32.mrb[7].mxu1 }
 0x26d   : > { %v2494_v36 = vadd.f32 %v1496_v35, %v1495_v34 }
 0x26f   : > { %v1498_v37 = vpop.f32.mrb[8].mxu1  ;;  %791 = vmax.xlane.f32.xlu0 %v2494_v36 }
 0x270   : > { %v1499_v38 = vpop.f32.mrb[9].mxu1 }
 0x271   : > { %v2497_v39 = vadd.f32 %v1499_v38, %v1498_v37 }
 0x273   : > { %v1501_v40 = vpop.f32.mrb[10].mxu1 }
 0x274   : > { %v1502_v41 = vpop.f32.mrb[11].mxu1 }
 0x275   : > { %v2499_v42 = vadd.f32 %v1502_v41, %v1501_v40 }
 0x277   : > { %v1504_v43 = vpop.f32.mrb[12].mxu1 }
 0x278   : > { %v1505_v44 = vpop.f32.mrb[13].mxu1 }
 0x279   : > { %v2501_v45 = vadd.f32 %v1505_v44, %v1504_v43 }
 0x27b   : > { %v1507_v46 = vpop.f32.mrb[14].mxu1 }
 0x27c   : > { %v1508_v47 = vpop.f32.mrb[15].mxu1 }
 0x27d   : > { %v2503_v48 = vadd.f32 %v1508_v47, %v1507_v46 }
 0x27f   : > { %v1510_v49 = vpop.f32.mrb[16].mxu1 }
 0x280   : > { %v1511_v50 = vpop.f32.mrb[17].mxu1 }
 0x281   : > { %v1512_v51 = vadd.f32 %v1511_v50, %v1510_v49 }
 0x283   : > { %v1513_v52 = vpop.f32.mrb[18].mxu1  ;;  %801 = vmax.xlane.f32.xlu0 %v1512_v51 }
 0x284   : > { %v1514_v0 = vpop.f32.mrb[19].mxu1 }
 0x285   : > { %v1515_v53 = vadd.f32 %v1514_v0, %v1513_v52 }
 0x287   : > { %v1516_v56 = vpop.f32.mrb[20].mxu1  ;;  %803 = vmax.xlane.f32.xlu1 %v1515_v53  ;;  %793 = vmax.xlane.f32.xlu0 %v2497_v39 }
 0x288   : > { %v1517_v57 = vpop.f32.mrb[21].mxu1 }
 0x289   : > { %v2506_v58 = vadd.f32 %v1517_v57, %v1516_v56 }
 0x28b   : > { %v1519_v59 = vpop.f32.mrb[22].mxu1  ;;  %805 = vmax.xlane.f32.xlu1 %v2506_v58  ;;  %795 = vmax.xlane.f32.xlu0 %v2499_v42 }
 0x28c   : > { %v1520_v60 = vpop.f32.mrb[23].mxu1 }
 0x28d   : > { %v2510_v61 = vadd.f32 %v1520_v60, %v1519_v59 }
 0x28f   : > { %v1522_v62 = vpop.f32.mrb[24].mxu1  ;;  %807 = vmax.xlane.f32.xlu1 %v2510_v61  ;;  %797 = vmax.xlane.f32.xlu0 %v2501_v45 }
 0x290   : > { %v1523_v63 = vpop.f32.mrb[25].mxu1 }
 0x291   : > { %v2514_v1 = vadd.f32 %v1523_v63, %v1522_v62 }
 0x293   : > { %v1525_v2 = vpop.f32.mrb[26].mxu1  ;;  %809 = vmax.xlane.f32.xlu1 %v2514_v1  ;;  %799 = vmax.xlane.f32.xlu0 %v2503_v48 }
 0x294   : > { %v1526_v3 = vpop.f32.mrb[27].mxu1 }
 0x295   : > { %v2518_v4 = vadd.f32 %v1526_v3, %v1525_v2 }
 0x297   : > { %v1528_v5 = vpop.f32.mrb[28].mxu1  ;;  %811 = vmax.xlane.f32.xlu1 %v2518_v4 }
 0x298   : > { %v1529_v6 = vpop.f32.mrb[29].mxu1 }
 0x299   : > { %v2521_v7 = vadd.f32 %v1529_v6, %v1528_v5 }
 0x29b   : > { %v1531_v8 = vpop.f32.mrb[30].mxu1  ;;  %813 = vmax.xlane.f32.xlu1 %v2521_v7 }
 0x29c   : > { %v1532_v9 = vpop.f32.mrb[31].mxu1 }
 0x29d   : > { %v2524_v10 = vadd.f32 %v1532_v9, %v1531_v8 }
 0x29f   : > { %815 = vmax.xlane.f32.xlu1 %v2524_v10 }
 0x2f0   : > { %v786_v11 = vpop.xlane.xlu0 %785 }
 0x2f1   : > { %v817_v12 = vsub.f32 %v2485_v29, %v786_v11  ;;  %v1057_v11 = vld [vmem:[#allocation8] sm:$0xff] }
 0x2f3   : > { %v833_v13 = vmul.f32 1.442695, %v817_v12  ;;  %v1058_v12 = vld [vmem:[#allocation8 + $0x8] sm:$0xff] }
 0x2f4   : > { %v788_v14 = vpop.xlane.xlu1 %787 }
 0x2f5   : > { %1823 = vpow2.f32 %v833_v13  ;;  %v818_v15 = vsub.f32 %v2488_v32, %v788_v14  ;;  %v1059_v13 = vld [vmem:[#allocation8 + $0x10] sm:$0xff]  ;;  %v1686_v14 = vpack.c.bf16 %v1058_v12, %v1057_v11 }
 0x2f7   : > { %v835_v16 = vmul.f32 1.442695, %v818_v15  ;;  %v1060_v15 = vld [vmem:[#allocation8 + $0x18] sm:$0xff]  ;;  %1687 = vmatprep.subr.bf16.mxu0 %v1686_v14  ;;  %1718 = vmatprep.subr.bf16.mxu1 %v1686_v14 }
 0x2f8   : > { %v790_v17 = vpop.xlane.xlu0 %789  ;;  %1689 = vmatpush3.bf16.msra.mxu0 %v1686_v14  ;;  %1726 = vmatpush3.bf16.msra.mxu1 %v1686_v14 }
 0x2f9   : > { %1825 = vpow2.f32 %v835_v16  ;;  %v819_v18 = vsub.f32 %v2491_v33, %v790_v17  ;;  %v1690_v16 = vpack.c.bf16 %v1060_v15, %v1059_v13  ;;  %v1061_v17 = vld [vmem:[#allocation8 + $0x20] sm:$0xff] }
 0x2fb   : > { %v837_v19 = vmul.f32 1.442695, %v819_v18  ;;  %v1062_v18 = vld [vmem:[#allocation8 + $0x28] sm:$0xff]  ;;  %1691 = vmatprep.subr.bf16.mxu0 %v1690_v16  ;;  %1719 = vmatprep.subr.bf16.mxu1 %v1690_v16 }
 0x2fc   : > { %v792_v20 = vpop.xlane.xlu0 %791  ;;  %1693 = vmatpush3.bf16.msra.mxu0 %v1690_v16  ;;  %1727 = vmatpush3.bf16.msra.mxu1 %v1690_v16 }
 0x2fd   : > { %1827 = vpow2.f32 %v837_v19  ;;  %v820_v21 = vsub.f32 %v2494_v36, %v792_v20  ;;  %v1694_v19 = vpack.c.bf16 %v1062_v18, %v1061_v17  ;;  %v1063_v20 = vld [vmem:[#allocation8 + $0x30] sm:$0xff] }
 0x2ff   : > { %v2531_v22 = vpop.eup %1823  ;;  %v839_v23 = vmul.f32 1.442695, %v820_v21  ;;  %v1064_v21 = vld [vmem:[#allocation8 + $0x38] sm:$0xff]  ;;  %1695 = vmatprep.subr.bf16.mxu0 %v1694_v19  ;;  %1720 = vmatprep.subr.bf16.mxu1 %v1694_v19 }
 0x300   : > { %865 = vadd.xlane.f32.xlu0 %v2531_v22  ;;  %1697 = vmatpush3.bf16.msra.mxu0 %v1694_v19 }
 0x301   : > { %1829 = vpow2.f32 %v839_v23  ;;  %v1698_v23 = vpack.c.bf16 %v1064_v21, %v1063_v20  ;;  %1728 = vmatpush3.bf16.msra.mxu1 %v1694_v19 }
 0x303   : > { %v2534_v24 = vpop.eup %1825  ;;  %1699 = vmatprep.subr.bf16.mxu0 %v1698_v23  ;;  %1721 = vmatprep.subr.bf16.mxu1 %v1698_v23 }
 0x304   : > { %867 = vadd.xlane.f32.xlu0 %v2534_v24  ;;  %1701 = vmatpush3.bf16.msra.mxu0 %v1698_v23 }
 0x305   : > { %1729 = vmatpush3.bf16.msra.mxu1 %v1698_v23 }
 0x307   : > { %v2537_v25 = vpop.eup %1827 }
 0x308   : > { %869 = vadd.xlane.f32.xlu0 %v2537_v25 }
 0x30b   : > { %v2540_v26 = vpop.eup %1829 }
 0x30c   : > { %871 = vadd.xlane.f32.xlu0 %v2540_v26 }
 0x310   : > { %v802_v27 = vpop.xlane.xlu0 %801 }
 0x311   : > { %v825_v28 = vsub.f32 %v1512_v51, %v802_v27 }
 0x313   : > { %v849_v29 = vmul.f32 1.442695, %v825_v28 }
 0x314   : > { %v804_v30 = vpop.xlane.xlu1 %803  ;;  %v794_v31 = vpop.xlane.xlu0 %793 }
 0x315   : > { %1831 = vpow2.f32 %v849_v29  ;;  %v826_v32 = vsub.f32 %v1515_v53, %v804_v30  ;;  %v821_v54 = vsub.f32 %v2497_v39, %v794_v31 }
 0x317   : > { %v851_v55 = vmul.f32 1.442695, %v826_v32  ;;  %v841_v33 = vmul.f32 1.442695, %v821_v54 }
 0x318   : > { %v806_v34 = vpop.xlane.xlu1 %805  ;;  %v796_v35 = vpop.xlane.xlu0 %795 }
 0x319   : > { %1833 = vpow2.f32 %v851_v55  ;;  %v827_v36 = vsub.f32 %v2506_v58, %v806_v34  ;;  %v822_v37 = vsub.f32 %v2499_v42, %v796_v35 }
 0x31a   : > { %1835 = vpow2.f32 %v841_v33 }
 0x31b   : > { %v853_v38 = vmul.f32 1.442695, %v827_v36  ;;  %v843_v40 = vmul.f32 1.442695, %v822_v37 }
 0x31c   : > { %v808_v41 = vpop.xlane.xlu1 %807  ;;  %v798_v43 = vpop.xlane.xlu0 %797 }
 0x31d   : > { %1837 = vpow2.f32 %v853_v38  ;;  %v828_v44 = vsub.f32 %v2510_v61, %v808_v41  ;;  %v823_v46 = vsub.f32 %v2501_v45, %v798_v43  ;;  %v1066_v41 = vld [vmem:[#allocation8 + $0x48] sm:$0xff] }
 0x31e   : > { %1839 = vpow2.f32 %v843_v40 }
 0x31f   : > { %v2548_v39 = vpop.eup %1831  ;;  %v855_v47 = vmul.f32 1.442695, %v828_v44  ;;  %v845_v49 = vmul.f32 1.442695, %v823_v46  ;;  %v1068_v46 = vld [vmem:[#allocation8 + $0x58] sm:$0xff] }
 0x320   : > { %v810_v50 = vpop.xlane.xlu1 %809  ;;  %881 = vadd.xlane.f32.xlu1 %v2548_v39  ;;  %v800_v51 = vpop.xlane.xlu0 %799 }
 0x321   : > { %1841 = vpow2.f32 %v855_v47  ;;  %v829_v42 = vsub.f32 %v2514_v1, %v810_v50  ;;  %v824_v52 = vsub.f32 %v2503_v48, %v800_v51  ;;  %v1069_v50 = vld [vmem:[#allocation8 + $0x60] sm:$0xff]  ;;  %v1070_v51 = vld [vmem:[#allocation8 + $0x68] sm:$0xff] }
 0x322   : > { %1843 = vpow2.f32 %v845_v49 }
 0x323   : > { %v2553_v0 = vpop.eup %1833  ;;  %v857_v53 = vmul.f32 1.442695, %v829_v42  ;;  %v847_v56 = vmul.f32 1.442695, %v824_v52  ;;  %v1710_v52 = vpack.c.bf16 %v1070_v51, %v1069_v50 }
 0x324   : > { %v2555_v45 = vpop.eup %1835  ;;  %v812_v57 = vpop.xlane.xlu1 %811  ;;  %883 = vadd.xlane.f32.xlu1 %v2553_v0 }
 0x325   : > { %1845 = vpow2.f32 %v857_v53  ;;  %v830_v58 = vsub.f32 %v2518_v4, %v812_v57  ;;  %873 = vadd.xlane.f32.xlu0 %v2555_v45  ;;  %v1071_v57 = vld [vmem:[#allocation8 + $0x70] sm:$0xff] }
 0x326   : > { %1847 = vpow2.f32 %v847_v56 }
 0x327   : > { %v2560_v59 = vpop.eup %1837  ;;  %v859_v60 = vmul.f32 1.442695, %v830_v58  ;;  %v1072_v58 = vld [vmem:[#allocation8 + $0x78] sm:$0xff] }
 0x328   : > { %v2562_v48 = vpop.eup %1839  ;;  %v814_v61 = vpop.xlane.xlu1 %813  ;;  %885 = vadd.xlane.f32.xlu1 %v2560_v59 }
 0x329   : > { %1849 = vpow2.f32 %v859_v60  ;;  %v831_v62 = vsub.f32 %v2521_v7, %v814_v61  ;;  %875 = vadd.xlane.f32.xlu0 %v2562_v48 }
 0x32b   : > { %v2567_v63 = vpop.eup %1841  ;;  %v861_v1 = vmul.f32 1.442695, %v831_v62  ;;  %v1714_v62 = vpack.c.bf16 %v1072_v58, %v1071_v57 }
 0x32c   : > { %v2569_v2 = vpop.eup %1843  ;;  %v816_v3 = vpop.xlane.xlu1 %815  ;;  %887 = vadd.xlane.f32.xlu1 %v2567_v63 }
 0x32d   : > { %1851 = vpow2.f32 %v861_v1  ;;  %v832_v4 = vsub.f32 %v2524_v10, %v816_v3  ;;  %877 = vadd.xlane.f32.xlu0 %v2569_v2 }
 0x32f   : > { %v2574_v5 = vpop.eup %1845  ;;  %v863_v6 = vmul.f32 1.442695, %v832_v4 }
 0x330   : > { %v2576_v8 = vpop.eup %1847  ;;  %889 = vadd.xlane.f32.xlu1 %v2574_v5 }
 0x331   : > { %1853 = vpow2.f32 %v863_v6  ;;  %879 = vadd.xlane.f32.xlu0 %v2576_v8 }
 0x333   : > { %v2580_v7 = vpop.eup %1849 }
 0x334   : > { %891 = vadd.xlane.f32.xlu1 %v2580_v7 }
 0x337   : > { %v2583_v9 = vpop.eup %1851 }
 0x338   : > { %893 = vadd.xlane.f32.xlu1 %v2583_v9 }
 0x33b   : > { %v2586_v10 = vpop.eup %1853 }
 0x33c   : > { %895 = vadd.xlane.f32.xlu1 %v2586_v10 }
 0x38d   : > { %v866_v27 = vpop.xlane.xlu0 %865 }
 0x38e   : > { %1855 = vrcp.f32 %v866_v27 }
 0x391   : > { %v868_v28 = vpop.xlane.xlu0 %867 }
 0x392   : > { %1857 = vrcp.f32 %v868_v28 }
 0x395   : > { %v870_v29 = vpop.xlane.xlu0 %869 }
 0x396   : > { %1859 = vrcp.f32 %v870_v29 }
 0x398   : > { %v1856_v30 = vpop.eup %1855 }
 0x399   : > { %v872_v31 = vpop.xlane.xlu0 %871  ;;  %v913_v32 = vmul.f32 %v1856_v30, %v2531_v22 }
 0x39a   : > { %1861 = vrcp.f32 %v872_v31 }
 0x39b   : > { %vm929_vm0 = vcmp.gt.f32.partialorder %v913_v32, 0.0025 }
 0x39c   : > { %v1858_v54 = vpop.eup %1857  ;;  %v2590_v55 = vsel %vm929_vm0, %v913_v32, 0.0 }
 0x39d   : > { %961 = vadd.xlane.f32.xlu0 %v2590_v55  ;;  %v914_v33 = vmul.f32 %v1858_v54, %v2534_v24  ;;  %v1065_v24 = vld [vmem:[#allocation8 + $0x40] sm:$0xff] }
 0x39e   : > { %v1702_v44 = vpack.c.bf16 %v1066_v41, %v1065_v24 }
 0x39f   : > { %vm930_vm1 = vcmp.gt.f32.partialorder %v914_v33, 0.0025 }
 0x3a0   : > { %v1860_v34 = vpop.eup %1859  ;;  %v2594_v35 = vsel %vm930_vm1, %v914_v33, 0.0  ;;  %1703 = vmatprep.subr.bf16.mxu0 %v1702_v44  ;;  %1722 = vmatprep.subr.bf16.mxu1 %v1702_v44 }
 0x3a1   : > { %963 = vadd.xlane.f32.xlu0 %v2594_v35  ;;  %v915_v36 = vmul.f32 %v1860_v34, %v2537_v25  ;;  %1705 = vmatpush3.bf16.msra.mxu0 %v1702_v44  ;;  %v1067_v25 = vld [vmem:[#allocation8 + $0x50] sm:$0xff] }
 0x3a2   : > { %1730 = vmatpush3.bf16.msra.mxu1 %v1702_v44  ;;  %v1706_v49 = vpack.c.bf16 %v1068_v46, %v1067_v25 }
 0x3a3   : > { %vm931_vm2 = vcmp.gt.f32.partialorder %v915_v36, 0.0025 }
 0x3a4   : > { %v1862_v37 = vpop.eup %1861  ;;  %v2598_v22 = vsel %vm931_vm2, %v915_v36, 0.0  ;;  %1707 = vmatprep.subr.bf16.mxu0 %v1706_v49  ;;  %1723 = vmatprep.subr.bf16.mxu1 %v1706_v49 }
 0x3a5   : > { %965 = vadd.xlane.f32.xlu0 %v2598_v22  ;;  %v916_v38 = vmul.f32 %v1862_v37, %v2540_v26  ;;  %1709 = vmatpush3.bf16.msra.mxu0 %v1706_v49 }
 0x3a6   : > { %1731 = vmatpush3.bf16.msra.mxu1 %v1706_v49  ;;  %1711 = vmatprep.subr.bf16.mxu0 %v1710_v52 }
 0x3a7   : > { %vm932_vm3 = vcmp.gt.f32.partialorder %v916_v38, 0.0025  ;;  %1724 = vmatprep.subr.bf16.mxu1 %v1710_v52 }
 0x3a8   : > { %v2602_v40 = vsel %vm932_vm3, %v916_v38, 0.0 }
 0x3a9   : > { %967 = vadd.xlane.f32.xlu0 %v2602_v40  ;;  %1713 = vmatpush3.bf16.msra.mxu0 %v1710_v52 }
 0x3aa   : > { %1732 = vmatpush3.bf16.msra.mxu1 %v1710_v52  ;;  %1715 = vmatprep.subr.bf16.mxu0 %v1714_v62 }
 0x3ab   : > { %1725 = vmatprep.subr.bf16.mxu1 %v1714_v62 }
 0x3ad   : > { %v882_v43 = vpop.xlane.xlu1 %881  ;;  %1717 = vmatpush3.bf16.msra.mxu0 %v1714_v62 }
 0x3ae   : > { %1863 = vrcp.f32 %v882_v43  ;;  %1733 = vmatpush3.bf16.msra.mxu1 %v1714_v62 }
 0x3b1   : > { %v884_v47 = vpop.xlane.xlu1 %883 }
 0x3b2   : > { %1865 = vrcp.f32 %v884_v47  ;;  %v874_v26 = vpop.xlane.xlu0 %873 }
 0x3b3   : > { %1867 = vrcp.f32 %v874_v26 }
 0x3b5   : > { %v886_v42 = vpop.xlane.xlu1 %885 }
 0x3b6   : > { %1869 = vrcp.f32 %v886_v42  ;;  %v876_v53 = vpop.xlane.xlu0 %875 }
 0x3b7   : > { %1871 = vrcp.f32 %v876_v53 }
 0x3b8   : > { %v1864_v56 = vpop.eup %1863 }
 0x3b9   : > { %v888_v60 = vpop.xlane.xlu1 %887  ;;  %v921_v61 = vmul.f32 %v1864_v56, %v2548_v39 }
 0x3ba   : > { %1873 = vrcp.f32 %v888_v60  ;;  %v878_v1 = vpop.xlane.xlu0 %877 }
 0x3bb   : > { %1875 = vrcp.f32 %v878_v1  ;;  %vm937_vm4 = vcmp.gt.f32.partialorder %v921_v61, 0.0025 }
 0x3bc   : > { %v1866_v3 = vpop.eup %1865  ;;  %v2606_v4 = vsel %vm937_vm4, %v921_v61, 0.0 }
 0x3bd   : > { %v1868_v6 = vpop.eup %1867  ;;  %977 = vadd.xlane.f32.xlu1 %v2606_v4  ;;  %v890_v11 = vpop.xlane.xlu1 %889  ;;  %v922_v12 = vmul.f32 %v1866_v3, %v2553_v0 }
 0x3be   : > { %1877 = vrcp.f32 %v890_v11  ;;  %v880_v39 = vpop.xlane.xlu0 %879  ;;  %v917_v13 = vmul.f32 %v1868_v6, %v2555_v45 }
 0x3bf   : > { %1879 = vrcp.f32 %v880_v39  ;;  %vm938_vm5 = vcmp.gt.f32.partialorder %v922_v12, 0.0025 }
 0x3c0   : > { %v1870_v14 = vpop.eup %1869  ;;  %v2611_v15 = vsel %vm938_vm5, %v922_v12, 0.0  ;;  %vm933_vm6 = vcmp.gt.f32.partialorder %v917_v13, 0.0025 }
 0x3c1   : > { %v1872_v16 = vpop.eup %1871  ;;  %979 = vadd.xlane.f32.xlu1 %v2611_v15  ;;  %v892_v17 = vpop.xlane.xlu1 %891  ;;  %v2614_v18 = vsel %vm933_vm6, %v917_v13, 0.0  ;;  %v923_v19 = vmul.f32 %v1870_v14, %v2560_v59 }
 0x3c2   : > { %1881 = vrcp.f32 %v892_v17  ;;  %969 = vadd.xlane.f32.xlu0 %v2614_v18  ;;  %v918_v0 = vmul.f32 %v1872_v16, %v2562_v48 }
 0x3c3   : > { %vm939_vm7 = vcmp.gt.f32.partialorder %v923_v19, 0.0025 }
 0x3c4   : > { %v1874_v45 = vpop.eup %1873  ;;  %v2619_v20 = vsel %vm939_vm7, %v923_v19, 0.0  ;;  %vm934_vm8 = vcmp.gt.f32.partialorder %v918_v0, 0.0025 }
 0x3c5   : > { %v1876_v21 = vpop.eup %1875  ;;  %981 = vadd.xlane.f32.xlu1 %v2619_v20  ;;  %v894_v23 = vpop.xlane.xlu1 %893  ;;  %v2622_v27 = vsel %vm934_vm8, %v918_v0, 0.0  ;;  %v924_v28 = vmul.f32 %v1874_v45, %v2567_v63 }
 0x3c6   : > { %1883 = vrcp.f32 %v894_v23  ;;  %971 = vadd.xlane.f32.xlu0 %v2622_v27  ;;  %v919_v59 = vmul.f32 %v1876_v21, %v2569_v2 }
 0x3c7   : > { %vm940_vm9 = vcmp.gt.f32.partialorder %v924_v28, 0.0025 }
 0x3c8   : > { %v1878_v48 = vpop.eup %1877  ;;  %v2627_v29 = vsel %vm940_vm9, %v924_v28, 0.0  ;;  %vm935_vm10 = vcmp.gt.f32.partialorder %v919_v59, 0.0025 }
 0x3c9   : > { %v1880_v30 = vpop.eup %1879  ;;  %983 = vadd.xlane.f32.xlu1 %v2627_v29  ;;  %v896_v31 = vpop.xlane.xlu1 %895  ;;  %v2630_v32 = vsel %vm935_vm10, %v919_v59, 0.0  ;;  %v925_v54 = vmul.f32 %v1878_v48, %v2574_v5 }
 0x3ca   : > { %1885 = vrcp.f32 %v896_v31  ;;  %973 = vadd.xlane.f32.xlu0 %v2630_v32  ;;  %v920_v63 = vmul.f32 %v1880_v30, %v2576_v8 }
 0x3cb   : > { %vm941_vm11 = vcmp.gt.f32.partialorder %v925_v54, 0.0025 }
 0x3cc   : > { %v1882_v2 = vpop.eup %1881  ;;  %v2635_v33 = vsel %vm941_vm11, %v925_v54, 0.0  ;;  %vm936_vm12 = vcmp.gt.f32.partialorder %v920_v63, 0.0025 }
 0x3cd   : > { %985 = vadd.xlane.f32.xlu1 %v2635_v33  ;;  %v2638_v34 = vsel %vm936_vm12, %v920_v63, 0.0  ;;  %v926_v36 = vmul.f32 %v1882_v2, %v2580_v7 }
 0x3ce   : > { %975 = vadd.xlane.f32.xlu0 %v2638_v34 }
 0x3cf   : > { %vm942_vm13 = vcmp.gt.f32.partialorder %v926_v36, 0.0025 }
 0x3d0   : > { %v1884_v5 = vpop.eup %1883  ;;  %v2642_v37 = vsel %vm942_vm13, %v926_v36, 0.0 }
 0x3d1   : > { %987 = vadd.xlane.f32.xlu1 %v2642_v37  ;;  %v927_v8 = vmul.f32 %v1884_v5, %v2583_v9 }
 0x3d3   : > { %vm943_vm14 = vcmp.gt.f32.partialorder %v927_v8, 0.0025 }
 0x3d4   : > { %v1886_v38 = vpop.eup %1885  ;;  %v2646_v24 = vsel %vm943_vm14, %v927_v8, 0.0 }
 0x3d5   : > { %989 = vadd.xlane.f32.xlu1 %v2646_v24  ;;  %v928_v41 = vmul.f32 %v1886_v38, %v2586_v10 }
 0x3d7   : > { %vm944_vm15 = vcmp.gt.f32.partialorder %v928_v41, 0.0025 }
 0x3d8   : > { %v2650_v7 = vsel %vm944_vm15, %v928_v41, 0.0 }
 0x3d9   : > { %991 = vadd.xlane.f32.xlu1 %v2650_v7 }
 0x42a   : > { %v962_v43 = vpop.xlane.xlu0 %961 }
 0x42b   : > { %v993_v44 = vmax.f32 %v962_v43, 1e-12 }
 0x42d   : > { %1887 = vrcp.f32 %v993_v44 }
 0x42e   : > { %v964_v25 = vpop.xlane.xlu0 %963 }
 0x42f   : > { %v994_v46 = vmax.f32 %v964_v25, 1e-12 }
 0x431   : > { %1889 = vrcp.f32 %v994_v46 }
 0x432   : > { %v966_v9 = vpop.xlane.xlu0 %965 }
 0x433   : > { %v995_v47 = vmax.f32 %v966_v9, 1e-12 }
 0x435   : > { %1891 = vrcp.f32 %v995_v47 }
 0x436   : > { %v968_v49 = vpop.xlane.xlu0 %967 }
 0x437   : > { %v1888_v26 = vpop.eup %1887  ;;  %v996_v50 = vmax.f32 %v968_v49, 1e-12 }
 0x438   : > { %v1025_v10 = vmul.f32 %v1888_v26, %v2590_v55 }
 0x439   : > { %1893 = vrcp.f32 %v996_v50 }
 0x43a   : > { %1041 = vst [vmem:[%s2655_s29] sm:$0xff] %v1025_v10  ;;  %1598 = vmatprep.mubr.f32.mxu0 %v1025_v10 }
 0x43b   : > { %v1890_v51 = vpop.eup %1889 }
 0x43c   : > { %v1026_v42 = vmul.f32 %v1890_v51, %v2594_v35 }
 0x43e   : > { %1042 = vst [vmem:[%s2655_s29 + $0x8] sm:$0xff] %v1026_v42  ;;  %1599 = vmatmul.mubr.f32.vlgmr.msra.gmra.mrb[32].mxu0 %v1026_v42 }
 0x43f   : > { %v1892_v52 = vpop.eup %1891 }
 0x440   : > { %v1027_v53 = vmul.f32 %v1892_v52, %v2598_v22 }
 0x442   : > { %1043 = vst [vmem:[%s2655_s29 + $0x10] sm:$0xff] %v1027_v53  ;;  %1601 = vmatprep.mubr.f32.mxu0 %v1027_v53 }
 0x443   : > { %v1894_v55 = vpop.eup %1893 }
 0x444   : > { %v1028_v56 = vmul.f32 %v1894_v55, %v2602_v40 }
 0x446   : > { %1044 = vst [vmem:[%s2655_s29 + $0x18] sm:$0xff] %v1028_v56  ;;  %1602 = vmatmul.mubr.f32.gmra.mrb[34].mxu0 %v1028_v56 }
 0x44a   : > { %v978_v57 = vpop.xlane.xlu1 %977 }
 0x44b   : > { %v1001_v58 = vmax.f32 %v978_v57, 1e-12 }
 0x44d   : > { %1895 = vrcp.f32 %v1001_v58 }
 0x44e   : > { %v980_v60 = vpop.xlane.xlu1 %979 }
 0x44f   : > { %v1002_v61 = vmax.f32 %v980_v60, 1e-12  ;;  %v970_v62 = vpop.xlane.xlu0 %969 }
 0x450   : > { %v997_v1 = vmax.f32 %v970_v62, 1e-12 }
 0x451   : > { %1897 = vrcp.f32 %v1002_v61 }
 0x452   : > { %1899 = vrcp.f32 %v997_v1  ;;  %v982_v35 = vpop.xlane.xlu1 %981 }
 0x453   : > { %v1003_v3 = vmax.f32 %v982_v35, 1e-12  ;;  %v972_v22 = vpop.xlane.xlu0 %971 }
 0x454   : > { %v998_v6 = vmax.f32 %v972_v22, 1e-12 }
 0x455   : > { %1901 = vrcp.f32 %v1003_v3 }
 0x456   : > { %1903 = vrcp.f32 %v998_v6  ;;  %v984_v11 = vpop.xlane.xlu1 %983 }
 0x457   : > { %v1896_v40 = vpop.eup %1895  ;;  %v1004_v12 = vmax.f32 %v984_v11, 1e-12  ;;  %v974_v39 = vpop.xlane.xlu0 %973 }
 0x458   : > { %v999_v13 = vmax.f32 %v974_v39, 1e-12  ;;  %v1033_v14 = vmul.f32 %v1896_v40, %v2606_v4 }
 0x459   : > { %1905 = vrcp.f32 %v1004_v12 }
 0x45a   : > { %1907 = vrcp.f32 %v999_v13  ;;  %1049 = vst [vmem:[%s2655_s29 + $0x40] sm:$0xff] %v1033_v14  ;;  %1610 = vmatprep.mubr.f32.mxu1 %v1033_v14  ;;  %v986_v16 = vpop.xlane.xlu1 %985 }
 0x45b   : > { %v1898_v17 = vpop.eup %1897  ;;  %v1005_v19 = vmax.f32 %v986_v16, 1e-12  ;;  %v976_v0 = vpop.xlane.xlu0 %975 }
 0x45c   : > { %v1900_v45 = vpop.eup %1899  ;;  %v1000_v21 = vmax.f32 %v976_v0, 1e-12  ;;  %v1034_v23 = vmul.f32 %v1898_v17, %v2611_v15 }
 0x45d   : > { %1909 = vrcp.f32 %v1005_v19  ;;  %v1029_v28 = vmul.f32 %v1900_v45, %v2614_v18 }
 0x45e   : > { %1911 = vrcp.f32 %v1000_v21  ;;  %1050 = vst [vmem:[%s2655_s29 + $0x48] sm:$0xff] %v1034_v23  ;;  %1611 = vmatmul.mubr.f32.vlgmr.msra.gmra.mrb[32].mxu1 %v1034_v23  ;;  %v988_v4 = vpop.xlane.xlu1 %987 }
 0x45f   : > { %v1902_v59 = vpop.eup %1901  ;;  %v1006_v48 = vmax.f32 %v988_v4, 1e-12  ;;  %1045 = vst [vmem:[%s2655_s29 + $0x20] sm:$0xff] %v1029_v28  ;;  %1604 = vmatprep.mubr.f32.mxu0 %v1029_v28 }
 0x460   : > { %v1904_v30 = vpop.eup %1903  ;;  %v1035_v31 = vmul.f32 %v1902_v59, %v2619_v20 }
 0x461   : > { %1913 = vrcp.f32 %v1006_v48  ;;  %v1030_v54 = vmul.f32 %v1904_v30, %v2622_v27 }
 0x462   : > { %1051 = vst [vmem:[%s2655_s29 + $0x50] sm:$0xff] %v1035_v31  ;;  %1613 = vmatprep.mubr.f32.mxu1 %v1035_v31  ;;  %v990_v15 = vpop.xlane.xlu1 %989 }
 0x463   : > { %v1906_v18 = vpop.eup %1905  ;;  %v1007_v63 = vmax.f32 %v990_v15, 1e-12  ;;  %1046 = vst [vmem:[%s2655_s29 + $0x28] sm:$0xff] %v1030_v54  ;;  %1605 = vmatmul.mubr.f32.gmra.mrb[36].mxu0 %v1030_v54 }
 0x464   : > { %v1908_v2 = vpop.eup %1907  ;;  %v1036_v36 = vmul.f32 %v1906_v18, %v2627_v29 }
 0x465   : > { %1915 = vrcp.f32 %v1007_v63  ;;  %v1031_v5 = vmul.f32 %v1908_v2, %v2630_v32 }
 0x466   : > { %1052 = vst [vmem:[%s2655_s29 + $0x58] sm:$0xff] %v1036_v36  ;;  %1614 = vmatmul.mubr.f32.gmra.mrb[34].mxu1 %v1036_v36  ;;  %v992_v20 = vpop.xlane.xlu1 %991 }
 0x467   : > { %v1910_v27 = vpop.eup %1909  ;;  %v1008_v8 = vmax.f32 %v992_v20, 1e-12  ;;  %1047 = vst [vmem:[%s2655_s29 + $0x30] sm:$0xff] %v1031_v5  ;;  %1607 = vmatprep.mubr.f32.mxu0 %v1031_v5 }
 0x468   : > { %v1912_v38 = vpop.eup %1911  ;;  %v1037_v41 = vmul.f32 %v1910_v27, %v2635_v33 }
 0x469   : > { %1917 = vrcp.f32 %v1008_v8  ;;  %v1032_v29 = vmul.f32 %v1912_v38, %v2638_v34 }
 0x46a   : > { %1053 = vst [vmem:[%s2655_s29 + $0x60] sm:$0xff] %v1037_v41  ;;  %1616 = vmatprep.mubr.f32.mxu1 %v1037_v41 }
 0x46b   : > { %v1914_v32 = vpop.eup %1913  ;;  %1048 = vst [vmem:[%s2655_s29 + $0x38] sm:$0xff] %v1032_v29  ;;  %1608 = vmatmul.mubr.f32.gmra.mrb[38].mxu0 %v1032_v29 }
 0x46c   : > { %v1038_v43 = vmul.f32 %v1914_v32, %v2642_v37 }
 0x46e   : > { %1054 = vst [vmem:[%s2655_s29 + $0x68] sm:$0xff] %v1038_v43  ;;  %1617 = vmatmul.mubr.f32.gmra.mrb[36].mxu1 %v1038_v43 }
 0x46f   : > { %v1916_v44 = vpop.eup %1915 }
 0x470   : > { %v1039_v33 = vmul.f32 %v1916_v44, %v2646_v24 }
 0x472   : > { %1055 = vst [vmem:[%s2655_s29 + $0x70] sm:$0xff] %v1039_v33  ;;  %1619 = vmatprep.mubr.f32.mxu1 %v1039_v33 }
 0x473   : > { %v1918_v34 = vpop.eup %1917 }
 0x474   : > { %v1040_v25 = vmul.f32 %v1918_v34, %v2650_v7 }
 0x476   : > { %1056 = vst [vmem:[%s2655_s29 + $0x78] sm:$0xff] %v1040_v25  ;;  %1620 = vmatmul.mubr.f32.gmra.mrb[38].mxu1 %v1040_v25 }
 0x477   : > { %2046 = shalt.err (!%p2043_p4)
}
 0x478   : > { %s2047_s22 = scalar_lea.hbm %s2694_s8, 2048  ;;  %s2051_s29 = scalar_lea.hbm %s2810_s7, 4096 }
 0x479   : > { %p2048_p9 = scmp.ne.s32.totalorder %s2694_s8, %s2047_s22  ;;  %p2052_p8 = scmp.lt.u32.totalorder %s2694_s8, %s2810_s7 }
 0x47a   : > { %p2053_p13 = scmp.lt.u32.totalorder %s2051_s29, %s2047_s22  ;;  %p2055_p10 = scmp.lt.u32.totalorder %s2047_s22, %s2694_s8 }
 0x47b   : > { %p2049_p0 = pnand %p2048_p9, %p2342_p5 }
 0x47c   : > { %p2054_p6 = por %p2053_p13, %p2052_p8 }
 0x47d   : > { %p2050_p11 = pneg %p2049_p0 }
 0x47e   : > { %p2056_p3 = por %p2055_p10, %p2054_p6 }
 0x480   : > { %p2057_p7 = pnand %p2056_p3, %p2050_p11 }
 0x482   : > { %2060 = shalt.err (!%p2057_p7)
}
 0x483   : > { %s2151_s11 = smov 128   ;;  %s2152_s12 = smov 8   ;;  %v1442_v37 = vld [vmem:[%s2808_s5] ss:$0 sm:$0xff] }
 0x484   : > { %1749 = dma.vmem_to_hbm [thread:$0]  (%p2342_p5), %s2697_s23, 2048, %s2694_s8, %s1263_s16, %s2151_s11, %s2151_s11, %s2152_s12  }
 0x485   : > { %s2730_s22 = scalar_lea.vmem [#allocation10], %s2396_s21  ;;  %s2752_s16 = scalar_lea.hbm %s2809_s6, %s1452_s10 }
 0x486   : > { %s1276_s21 = sshll.u32 %s2730_s22, 4  ;;  %s1258_s30 = scalar_lea.sflag [#allocation4], %s2393_s20  ;;  %s2754_s21 = int_to_ptr.vmem [resolvable:$true] %s1276_s21 }
 0x487   : > { %s2061_s9 = scalar_lea.vmem %s2754_s21, 2048  ;;  %s2153_s29 = smov [#allocation10]  }
 0x488   : > { %p2062_p12 = scmp.ne.s32.totalorder %s2754_s21, %s2061_s9  ;;  %s2065_s28 = sshll.u32 %s2153_s29, 4  ;;  %s2066_s28 = int_to_ptr.vmem [resolvable:$false] %s2065_s28 }
 0x489   : > { %s2067_s17 = scalar_lea.vmem %s2066_s28, 4096  ;;  %p2068_p4 = scmp.lt.s32.totalorder %s2754_s21, %s2066_s28 }
 0x48a   : > { %p2063_p2 = pnand %p2062_p12, %p2342_p5  ;;  %p2069_p9 = scmp.lt.s32.totalorder %s2067_s17, %s2061_s9 }
 0x48c   : > { %p2064_p1 = pneg %p2063_p2  ;;  %p2070_p0 = por %p2069_p9, %p2068_p4 }
 0x48e   : > { %p2071_p11 = pnand %p2070_p0, %p2064_p1 }
 0x511   : > { %v1600_v24 = vpop.f32.mrb[32].mxu0 }
 0x512   : > { %v1152_v7 = vadd.f32 %v1600_v24, %v1442_v37  ;;  %v1146_v46 = vpop.f32.mrb[33].mxu0 }
 0x513   : > { %v1147_v9 = vadd.f32 %v1442_v37, %v1146_v46 }
 0x514   : > { %v1226_v47 = vmax.f32 %v1152_v7, 0.0 }
 0x515   : > { %v1225_v49 = vmax.f32 %v1147_v9, 0.0 }
 0x516   : > { %1242 = vst [vmem:[%s2730_s22 + $0x8] sm:$0xff] %v1226_v47 }
 0x517   : > { %1241 = vst [vmem:[%s2730_s22] sm:$0xff] %v1225_v49 }
 0x519   : > { %v1603_v26 = vpop.f32.mrb[34].mxu0 }
 0x51a   : > { %v1162_v50 = vadd.f32 %v1603_v26, %v1442_v37  ;;  %v1156_v10 = vpop.f32.mrb[35].mxu0 }
 0x51b   : > { %v1157_v51 = vadd.f32 %v1442_v37, %v1156_v10 }
 0x51c   : > { %v1228_v42 = vmax.f32 %v1162_v50, 0.0 }
 0x51d   : > { %v1227_v52 = vmax.f32 %v1157_v51, 0.0 }
 0x51e   : > { %1244 = vst [vmem:[%s2730_s22 + $0x18] sm:$0xff] %v1228_v42 }
 0x51f   : > { %1243 = vst [vmem:[%s2730_s22 + $0x10] sm:$0xff] %v1227_v52 }
 0x531   : > { %v1612_v53 = vpop.f32.mrb[32].mxu1 }
 0x532   : > { %v1192_v55 = vadd.f32 %v1612_v53, %v1442_v37  ;;  %v1186_v56 = vpop.f32.mrb[33].mxu1 }
 0x533   : > { %v1187_v57 = vadd.f32 %v1442_v37, %v1186_v56 }
 0x534   : > { %v1234_v58 = vmax.f32 %v1192_v55, 0.0 }
 0x535   : > { %v1233_v60 = vmax.f32 %v1187_v57, 0.0 }
 0x536   : > { %1250 = vst [vmem:[%s2730_s22 + $0x48] sm:$0xff] %v1234_v58  ;;  %v1606_v61 = vpop.f32.mrb[36].mxu0 }
 0x537   : > { %1249 = vst [vmem:[%s2730_s22 + $0x40] sm:$0xff] %v1233_v60  ;;  %v1172_v62 = vadd.f32 %v1606_v61, %v1442_v37  ;;  %v1166_v1 = vpop.f32.mrb[37].mxu0 }
 0x538   : > { %v1167_v35 = vadd.f32 %v1442_v37, %v1166_v1 }
 0x539   : > { %v1230_v3 = vmax.f32 %v1172_v62, 0.0  ;;  %v1615_v22 = vpop.f32.mrb[34].mxu1 }
 0x53a   : > { %v1229_v6 = vmax.f32 %v1167_v35, 0.0  ;;  %v1202_v11 = vadd.f32 %v1615_v22, %v1442_v37  ;;  %v1196_v40 = vpop.f32.mrb[35].mxu1 }
 0x53b   : > { %1246 = vst [vmem:[%s2730_s22 + $0x28] sm:$0xff] %v1230_v3  ;;  %v1197_v12 = vadd.f32 %v1442_v37, %v1196_v40 }
 0x53c   : > { %1245 = vst [vmem:[%s2730_s22 + $0x20] sm:$0xff] %v1229_v6  ;;  %v1236_v39 = vmax.f32 %v1202_v11, 0.0 }
 0x53d   : > { %v1235_v13 = vmax.f32 %v1197_v12, 0.0 }
 0x53e   : > { %1252 = vst [vmem:[%s2730_s22 + $0x58] sm:$0xff] %v1236_v39  ;;  %v1609_v14 = vpop.f32.mrb[38].mxu0 }
 0x53f   : > { %1251 = vst [vmem:[%s2730_s22 + $0x50] sm:$0xff] %v1235_v13  ;;  %v1182_v16 = vadd.f32 %v1609_v14, %v1442_v37  ;;  %v1176_v17 = vpop.f32.mrb[39].mxu0 }
 0x540   : > { %v1177_v19 = vadd.f32 %v1442_v37, %v1176_v17 }
 0x541   : > { %v1232_v0 = vmax.f32 %v1182_v16, 0.0  ;;  %v1618_v45 = vpop.f32.mrb[36].mxu1 }
 0x542   : > { %v1231_v21 = vmax.f32 %v1177_v19, 0.0  ;;  %v1212_v23 = vadd.f32 %v1618_v45, %v1442_v37  ;;  %v1206_v28 = vpop.f32.mrb[37].mxu1 }
 0x543   : > { %1248 = vst [vmem:[%s2730_s22 + $0x38] sm:$0xff] %v1232_v0  ;;  %v1207_v4 = vadd.f32 %v1442_v37, %v1206_v28 }
 0x544   : > { %1247 = vst [vmem:[%s2730_s22 + $0x30] sm:$0xff] %v1231_v21  ;;  %v1238_v59 = vmax.f32 %v1212_v23, 0.0 }
 0x545   : > { %v1237_v48 = vmax.f32 %v1207_v4, 0.0 }
 0x546   : > { %1254 = vst [vmem:[%s2730_s22 + $0x68] sm:$0xff] %v1238_v59 }
 0x547   : > { %1253 = vst [vmem:[%s2730_s22 + $0x60] sm:$0xff] %v1237_v48 }
 0x549   : > { %v1621_v30 = vpop.f32.mrb[38].mxu1 }
 0x54a   : > { %v1222_v31 = vadd.f32 %v1621_v30, %v1442_v37  ;;  %v1216_v54 = vpop.f32.mrb[39].mxu1 }
 0x54b   : > { %v1217_v15 = vadd.f32 %v1442_v37, %v1216_v54 }
 0x54c   : > { %v1240_v18 = vmax.f32 %v1222_v31, 0.0 }
 0x54d   : > { %v1239_v63 = vmax.f32 %v1217_v15, 0.0 }
 0x54e   : > { %1256 = vst [vmem:[%s2730_s22 + $0x78] sm:$0xff] %v1240_v18 }
 0x54f   : > { %1255 = vst [vmem:[%s2730_s22 + $0x70] sm:$0xff] %v1239_v63 }
 0x550   : > { %2074 = shalt.err (!%p2071_p11)
}
 0x551   : > { %s2075_s10 = scalar_lea.hbm %s2752_s16, 2048  ;;  %s2079_s1 = scalar_lea.hbm %s2809_s6, 4096 }
 0x552   : > { %p2076_p8 = scmp.ne.s32.totalorder %s2752_s16, %s2075_s10  ;;  %p2080_p10 = scmp.lt.u32.totalorder %s2752_s16, %s2809_s6 }
 0x553   : > { %p2081_p3 = scmp.lt.u32.totalorder %s2079_s1, %s2075_s10  ;;  %p2083_p12 = scmp.lt.u32.totalorder %s2075_s10, %s2752_s16 }
 0x554   : > { %p2077_p13 = pnand %p2076_p8, %p2342_p5 }
 0x555   : > { %p2082_p7 = por %p2081_p3, %p2080_p10 }
 0x556   : > { %p2078_p6 = pneg %p2077_p13 }
 0x557   : > { %p2084_p2 = por %p2083_p12, %p2082_p7 }
 0x559   : > { %p2085_p1 = pnand %p2084_p2, %p2078_p6 }
 0x55b   : > { %2088 = shalt.err (!%p2085_p1)
}
 0x55c   : > { %1748 = dma.vmem_to_hbm [thread:$0]  (%p2342_p5), %s2754_s21, 2048, %s2752_s16, %s1258_s30, %s2151_s11, %s2151_s11, %s2152_s12  }
 0x55d PF: > { %s2832_s23 = sld [smem:[#allocation18_spill]]  ;;  %s1307_s9 = sand.u32 1, %s2127_s24  }
 0x55e   : > { %p2834_p9 = scmp.ge.s32.totalorder %s2139_s27, 2  ;;  %s1308_s29 = scalar_lea.sflag [#allocation4], %s1307_s9 }
 0x563   : > { %p2833_p4 = scmp.ne.s32.totalorder %s2832_s23, 0 }
 0x565   : > { %p1767_p0 = pnand %p2834_p9, %p2833_p4 }
 0x567   : > { %2118 = dma.done.wait (!%p1767_p0), %s1308_s29, 2048  }
 0x568   : > { %2120 = vsyncadd (!%p1767_p0), %s1308_s29, 4294965248  ;;  %s1317_s15 = scalar_lea.sflag [#allocation12], %s1307_s9 }
 0x569   : > { %2122 = dma.done.wait (!%p1767_p0), %s1317_s15, 2048  }
 0x56a   : > { %2124 = vsyncadd (!%p1767_p0), %s1317_s15, 4294965248  ;;  %p26_p5 = scmp.ge.s32.totalorder %s2307_s18, 4   ;;  %s2835_s24 = smov %s2131_s25 }
 0x56b   : > { %s2836_s25 = smov %s2135_s26  ;;  %s2837_s26 = smov %s2338_s13 }
 0x56c   : > { %s2838_s27 = smov %s2307_s18  ;;  %28 = sbr.rel (!%p26_p5) target bundleno = 11 (0xb), region = 118 }
 0x573   :  { %1322 = vsyncpa [#allocation3], 1 }
 0x574   :  { %1324 = vsyncpa [#allocation3 + $0x1], 1 }
 0x575   :  { %1325 = vsyncpa [#allocation6], 1 }
 0x576   :  { %1326 = vsyncpa [#allocation9], 1 }
 0x577   :  { %1327 = vsyncpa [#allocation4], 1 }
 0x578   :  { %1329 = vsyncpa [#allocation4 + $0x1], 1 }
 0x579   :  { %1330 = vsyncpa [#allocation12], 1 }
 0x57a   :  { %1332 = vsyncpa [#allocation12 + $0x1], 1 }

</bundles_post_ra>
